<compile_context>
chip_gen: v7x
topology: tpu7x:2x2x1
jax: 0.10.0
libtpu: 0.0.40
codegen_flags: <defaults>
</compile_context>

<pallas_src>
import jax
import jax.numpy as jnp
from jax import lax
from jax.experimental import pallas as pl
from jax.experimental.pallas import tpu as pltpu


TILE_M = 512                                   # lane-axis tile (multiple of 128)
NEG = float(jnp.finfo(jnp.bfloat16).min)       # max-pool padding sentinel (bf16-safe)
_VMEM_LIMIT = 32 * 1024 * 1024


def _round_up(x, m):
    return (x + m - 1) // m * m


# ---------------------------------------------------------------------------
# Pallas kernels
# ---------------------------------------------------------------------------
def _conv_bn_prelu_kernel(p_ref, w_ref, s_ref, t_ref, a_ref, o_ref):
    # p_ref: (K, TILE_M) bf16 im2col patches (transposed), w_ref: (OC, K) bf16
    # s_ref/t_ref: (OC, 1) f32 folded BN scale/shift, a_ref: (1,) SMEM PReLU alpha
    y = jnp.dot(w_ref[...], p_ref[...], preferred_element_type=jnp.float32)
    y = y * s_ref[...] + t_ref[...]
    a = a_ref[0]
    o_ref[...] = jnp.where(y > 0, y, a * y).astype(o_ref.dtype)


def _maxpool_kernel(p_ref, o_ref):
    # p_ref: (KK, OC, TILE_M) bf16 stacked pool windows -> max over window axis
    o_ref[...] = jnp.max(p_ref[...], axis=0).astype(o_ref.dtype)


def _tail_kernel(p_ref, w3_ref, s3_ref, t3_ref, a3_ref,
                 w4_ref, b4_ref, a4_ref, w5_ref, b5_ref, o_ref):
    # Fused: conv3 + BN3 + PReLU3 + Linear(576,128) + PReLU4 + [sigmoid head | bbox head]
    # p_ref : (9, TB, 192) bf16 conv3 patches (spatial-position-major)
    # w3_ref: (192, 64) bf16, w4_ref: (9, 64, 128) bf16 (w4 regrouped per position)
    # w5_ref: (128, 8) bf16 (concat of conv5_1 / conv5_2, zero padded)
    pat = p_ref[...]                                                   # (9, TB, 192)
    w3b = jnp.broadcast_to(w3_ref[...], (pat.shape[0],) + w3_ref.shape)
    y3 = jnp.einsum('pbk,pkc->pbc', pat, w3b,
                    preferred_element_type=jnp.float32)                # (9, TB, 64)
    y3 = y3 * s3_ref[...] + t3_ref[...]
    a3 = a3_ref[0]
    y3 = jnp.where(y3 > 0, y3, a3 * y3)
    h = jnp.einsum('pbc,pcj->pbj', y3.astype(jnp.bfloat16), w4_ref[...],
                   preferred_element_type=jnp.float32)                 # (9, TB, 128)
    h = jnp.sum(h, axis=0) + b4_ref[...]                               # (TB, 128)
    a4 = a4_ref[0]
    h = jnp.where(h > 0, h, a4 * h)
    z = jnp.dot(h.astype(jnp.bfloat16), w5_ref[...],
                preferred_element_type=jnp.float32) + b5_ref[...]      # (TB, 8)
    col = lax.broadcasted_iota(jnp.int32, z.shape, 1)
    o_ref[...] = jnp.where(col == 0, jax.nn.sigmoid(z), z)


# ---------------------------------------------------------------------------
# pallas_call wrappers
# ---------------------------------------------------------------------------
def conv_bn_prelu(patches, w_mat, scale, shift, alpha):
    kp, m = patches.shape
    oc = w_mat.shape[0]
    grid = m // TILE_M
    return pl.pallas_call(
        _conv_bn_prelu_kernel,
        out_shape=jax.ShapeDtypeStruct((oc, m), jnp.bfloat16),
        grid=(grid,),
        in_specs=[
            pl.BlockSpec((kp, TILE_M), lambda j: (0, j)),
            pl.BlockSpec((oc, kp), lambda j: (0, 0)),
            pl.BlockSpec((oc, 1), lambda j: (0, 0)),
            pl.BlockSpec((oc, 1), lambda j: (0, 0)),
            pl.BlockSpec((1,), lambda j: (0,),
                         memory_space=pltpu.MemorySpace.SMEM),
        ],
        out_specs=pl.BlockSpec((oc, TILE_M), lambda j: (0, j)),
        compiler_params=pltpu.CompilerParams(
            dimension_semantics=("parallel",),
            vmem_limit_bytes=_VMEM_LIMIT),
    )(patches, w_mat, scale, shift, alpha)


def maxpool(stack):
    kk, oc, m = stack.shape
    grid = m // TILE_M
    return pl.pallas_call(
        _maxpool_kernel,
        out_shape=jax.ShapeDtypeStruct((oc, m), jnp.bfloat16),
        grid=(grid,),
        in_specs=[pl.BlockSpec((kk, oc, TILE_M), lambda j: (0, 0, j))],
        out_specs=pl.BlockSpec((oc, TILE_M), lambda j: (0, j)),
        compiler_params=pltpu.CompilerParams(
            dimension_semantics=("parallel",),
            vmem_limit_bytes=_VMEM_LIMIT),
    )(stack)


def tail(patches3, w3t, s3, t3, a3, w4r, b4, a4, w5, b5, tb):
    _, bp, k3 = patches3.shape
    grid = bp // tb
    return pl.pallas_call(
        _tail_kernel,
        out_shape=jax.ShapeDtypeStruct((bp, 8), jnp.float32),
        grid=(grid,),
        in_specs=[
            pl.BlockSpec((9, tb, k3), lambda i: (0, i, 0)),
            pl.BlockSpec((k3, 64), lambda i: (0, 0)),
            pl.BlockSpec((1, 1, 64), lambda i: (0, 0, 0)),
            pl.BlockSpec((1, 1, 64), lambda i: (0, 0, 0)),
            pl.BlockSpec((1,), lambda i: (0,),
                         memory_space=pltpu.MemorySpace.SMEM),
            pl.BlockSpec((9, 64, 128), lambda i: (0, 0, 0)),
            pl.BlockSpec((1, 128), lambda i: (0, 0)),
            pl.BlockSpec((1,), lambda i: (0,),
                         memory_space=pltpu.MemorySpace.SMEM),
            pl.BlockSpec((128, 8), lambda i: (0, 0)),
            pl.BlockSpec((1, 8), lambda i: (0, 0)),
        ],
        out_specs=pl.BlockSpec((tb, 8), lambda i: (i, 0)),
        compiler_params=pltpu.CompilerParams(
            dimension_semantics=("parallel",),
            vmem_limit_bytes=_VMEM_LIMIT),
    )(patches3, w3t, s3, t3, a3, w4r, b4, a4, w5, b5)


# ---------------------------------------------------------------------------
# JAX glue: layout plumbing only (channel-first feature maps: (C, B, H, W))
# ---------------------------------------------------------------------------
def _im2col_T(x_cbhw, k, kpad):
    """(C,B,H,W) -> transposed patches (kpad, B*OH*OW) bf16, row = (kh*K+kw)*C + c."""
    c, b, h, w = x_cbhw.shape
    oh, ow = h - k + 1, w - k + 1
    wins = [x_cbhw[:, :, i:i + oh, j:j + ow] for i in range(k) for j in range(k)]
    p = jnp.stack(wins, axis=0).reshape(k * k * c, b * oh * ow)
    p = jnp.pad(p, ((0, kpad - k * k * c), (0, 0)))
    return p.astype(jnp.bfloat16), oh, ow


def _pool_stack(x_cbhw, k, s, pad):
    """(C,B,H,W) -> (K*K, C, B*OH*OW) bf16 window stack for max pooling."""
    c, b, h, w = x_cbhw.shape
    if pad:
        x_cbhw = jnp.pad(x_cbhw, ((0, 0), (0, 0), (pad, pad), (pad, pad)),
                         constant_values=NEG)
        h, w = h + 2 * pad, w + 2 * pad
    oh = (h - k) // s + 1
    ow = (w - k) // s + 1
    wins = [x_cbhw[:, :, i:i + s * (oh - 1) + 1:s, j:j + s * (ow - 1) + 1:s]
            for i in range(k) for j in range(k)]
    stack = jnp.stack(wins, axis=0).reshape(k * k, c, b * oh * ow)
    return stack, oh, ow


def _pad_lanes(x, mult=TILE_M):
    m = x.shape[-1]
    mp = _round_up(m, mult)
    if mp == m:
        return x
    pads = [(0, 0)] * (x.ndim - 1) + [(0, mp - m)]
    return jnp.pad(x, pads)


# ---------------------------------------------------------------------------
# Parameters (deterministic synthetic init, PyTorch-compatible shapes)
# ---------------------------------------------------------------------------
def make_params(key):
    ks = jax.random.split(key, 32)
    it = iter(range(32))

    def nrm(shape, s=0.1):
        return s * jax.random.normal(ks[next(it)], shape, jnp.float32)

    p = {}
    p["w1"] = nrm((28, 3, 3, 3));   p["b1"] = nrm((28,))
    p["bn1"] = (1.0 + nrm((28,)), nrm((28,)), nrm((28,), 0.05),
                0.5 + jnp.abs(nrm((28,))))
    p["w2"] = nrm((48, 28, 3, 3));  p["b2"] = nrm((48,))
    p["bn2"] = (1.0 + nrm((48,)), nrm((48,)), nrm((48,), 0.05),
                0.5 + jnp.abs(nrm((48,))))
    p["w3"] = nrm((64, 48, 2, 2));  p["b3"] = nrm((64,))
    p["bn3"] = (1.0 + nrm((64,)), nrm((64,)), nrm((64,), 0.05),
                0.5 + jnp.abs(nrm((64,))))
    p["w4"] = nrm((128, 576));  p["b4"] = nrm((128,))
    p["w51"] = nrm((1, 128));   p["b51"] = nrm((1,))
    p["w52"] = nrm((4, 128));   p["b52"] = nrm((4,))
    for name in ("a1", "a2", "a3", "a4"):       # PyTorch default single alpha
        p[name] = jnp.full((1,), 0.25, jnp.float32)
    return p


def _prep_conv(w):
    """(OC, Cin, KH, KW) -> (OC, round_up(KH*KW*Cin, 16)) bf16, (kh,kw)-major, c-minor."""
    oc, cin, kh, kw = w.shape
    m = jnp.transpose(w, (0, 2, 3, 1)).reshape(oc, kh * kw * cin)
    kpad = _round_up(kh * kw * cin, 16)
    m = jnp.pad(m, ((0, 0), (0, kpad - kh * kw * cin)))
    return m.astype(jnp.bfloat16)


def _fold_bn(conv_b, gamma, beta, rmean, rvar, eps=1e-5):
    scale = gamma / jnp.sqrt(rvar + eps)
    shift = beta + (conv_b - rmean) * scale
    return (scale.reshape(-1, 1).astype(jnp.float32),
            shift.reshape(-1, 1).astype(jnp.float32))


def prepare_params(p):
    q = {}
    q["w1m"] = _prep_conv(p["w1"])
    q["s1"], q["t1"] = _fold_bn(p["b1"], *p["bn1"])
    q["w2m"] = _prep_conv(p["w2"])
    q["s2"], q["t2"] = _fold_bn(p["b2"], *p["bn2"])
    w3m = _prep_conv(p["w3"])                      # (64, 192)
    q["w3t"] = jnp.transpose(w3m)                  # (192, 64) bf16
    s3, t3 = _fold_bn(p["b3"], *p["bn3"])
    q["s3"] = s3.reshape(1, 1, 64)
    q["t3"] = t3.reshape(1, 1, 64)
    # w4 columns are in PyTorch NCHW-flatten order (c*9 + p); regroup per spatial
    # position so the kernel never has to transpose the feature map.
    q["w4r"] = jnp.transpose(p["w4"].reshape(128, 64, 9),
                             (2, 1, 0)).astype(jnp.bfloat16)   # (9, 64, 128)
    q["b4"] = p["b4"].reshape(1, 128).astype(jnp.float32)
    w5 = jnp.concatenate([p["w51"], p["w52"],
                          jnp.zeros((3, 128), jnp.float32)], axis=0)   # (8, 128)
    q["w5"] = jnp.transpose(w5).astype(jnp.bfloat16)                    # (128, 8)
    q["b5"] = jnp.concatenate([p["b51"], p["b52"],
                               jnp.zeros((3,), jnp.float32)]).reshape(1, 8)
    for name in ("a1", "a2", "a3", "a4"):
        q[name] = p[name]
    return q


# ---------------------------------------------------------------------------
# Full forward pass
# ---------------------------------------------------------------------------
def rnet_forward(x_nchw, q):
    b = x_nchw.shape[0]
    xcf = jnp.transpose(x_nchw, (1, 0, 2, 3)).astype(jnp.bfloat16)  # (3, B, 24, 24)

    # --- stage 1: Conv(3->28,k3)+BN+PReLU, MaxPool(3,2,pad=1) ---
    pat, oh, ow = _im2col_T(xcf, 3, q["w1m"].shape[1])              # 24 -> 22
    y = conv_bn_prelu(_pad_lanes(pat), q["w1m"], q["s1"], q["t1"], q["a1"])
    y = y[:, :b * oh * ow].reshape(28, b, oh, ow)
    stack, oh, ow = _pool_stack(y, 3, 2, 1)                          # 22 -> 11
    y = maxpool(_pad_lanes(stack))[:, :b * oh * ow].reshape(28, b, oh, ow)

    # --- stage 2: Conv(28->48,k3)+BN+PReLU, MaxPool(3,2) ---
    pat, oh, ow = _im2col_T(y, 3, q["w2m"].shape[1])                 # 11 -> 9
    y = conv_bn_prelu(_pad_lanes(pat), q["w2m"], q["s2"], q["t2"], q["a2"])
    y = y[:, :b * oh * ow].reshape(48, b, oh, ow)
    stack, oh, ow = _pool_stack(y, 3, 2, 0)                          # 9 -> 4
    y = maxpool(_pad_lanes(stack))[:, :b * oh * ow].reshape(48, b, oh, ow)

    # --- stage 3 + head, fused in one kernel ---
    # conv3 patches: (9 spatial positions, B, 192) with q = (kh*2+kw)*48 + c
    wins = [y[:, :, i:i + 3, j:j + 3] for i in range(2) for j in range(2)]
    p3 = jnp.stack(wins, axis=0)                      # (4, 48, B, 3, 3)
    p3 = jnp.transpose(p3, (3, 4, 2, 0, 1))           # (3, 3, B, 4, 48)
    p3 = p3.reshape(9, b, 192).astype(jnp.bfloat16)

    tb = 8
    bp = _round_up(b, tb)
    if bp != b:
        p3 = jnp.pad(p3, ((0, 0), (0, bp - b), (0, 0)))
    out = tail(p3, q["w3t"], q["s3"], q["t3"], q["a3"],
               q["w4r"], q["b4"], q["a4"], q["w5"], q["b5"], tb)
    out = out[:b]
    label = out[:, 0:1]
    offset = out[:, 1:5]
    return label, offset


if __name__ == "__main__":
    key = jax.random.PRNGKey(0)
    k_params, k_x = jax.random.split(key)
    raw_params = make_params(k_params)
    params = prepare_params(raw_params)

    # R-Net expects 24x24 RGB crops: (B, 3, 24, 24) in NCHW.
    B = 16
    x = jax.random.normal(k_x, (B, 3, 24, 24), jnp.float32)

    fwd = jax.jit(rnet_forward)
    label, offset = fwd(x, params)
    jax.block_until_ready((label, offset))

    assert label.shape == (B, 1) and offset.shape == (B, 4)
    assert bool(jnp.all((label >= 0.0) & (label <= 1.0)))
    assert bool(jnp.all(jnp.isfinite(offset)))
    print("KERNEL_OK")
</pallas_src>

<mosaic_0001>
module attributes {stable_mosaic.version = 11 : i64} {
  func.func @_conv_bn_prelu_kernel(%arg0: i32, %arg1: memref<32x512xbf16, #tpu.memory_space<vmem>>, %arg2: memref<28x32xbf16, #tpu.memory_space<vmem>>, %arg3: memref<28x1xf32, #tpu.memory_space<vmem>>, %arg4: memref<28x1xf32, #tpu.memory_space<vmem>>, %arg5: memref<1xf32, #tpu.memory_space<smem>>, %arg6: memref<28x512xbf16, #tpu.memory_space<vmem>>) attributes {dimension_semantics = [#tpu.dimension_semantics<parallel>], iteration_bounds = array<i64: 16>, scalar_prefetch = 0 : i64, scratch_operands = 0 : i64, tpu.core_type = #tpu.core_type<tc>, window_params = [{transform_indices = @transform_0, window_bounds = array<i64: 32, 512>}, {pipeline_mode = #tpu.pipeline_mode<synchronous>, transform_indices = @transform_1, window_bounds = array<i64: 28, 32>}, {pipeline_mode = #tpu.pipeline_mode<synchronous>, transform_indices = @transform_2, window_bounds = array<i64: 28, 1>}, {pipeline_mode = #tpu.pipeline_mode<synchronous>, transform_indices = @transform_3, window_bounds = array<i64: 28, 1>}, {transform_indices = @transform_4, window_bounds = array<i64: 1>}, {transform_indices = @transform_5, window_bounds = array<i64: 28, 512>}]} {
    %c0 = arith.constant 0 : index
    %c0_0 = arith.constant 0 : index
    %0 = vector.load %arg2[%c0, %c0_0] : memref<28x32xbf16, #tpu.memory_space<vmem>>, vector<28x32xbf16>
    %c0_1 = arith.constant 0 : index
    %c0_2 = arith.constant 0 : index
    %1 = vector.load %arg1[%c0_1, %c0_2] : memref<32x512xbf16, #tpu.memory_space<vmem>>, vector<32x512xbf16>
    %cst = arith.constant dense<0.000000e+00> : vector<28x512xf32>
    %2 = tpu.matmul %0, %1, %cst {dimension_numbers = #tpu.dot_dimension_numbers<[1], [0], [0], [1], [0, 0, 1, 1], [], []>} : vector<28x32xbf16>, vector<32x512xbf16>, vector<28x512xf32> -> vector<28x512xf32>
    %c0_3 = arith.constant 0 : index
    %c0_4 = arith.constant 0 : index
    %3 = vector.load %arg3[%c0_3, %c0_4] : memref<28x1xf32, #tpu.memory_space<vmem>>, vector<28x1xf32>
    %4 = vector.broadcast %3 : vector<28x1xf32> to vector<28x512xf32>
    %5 = arith.mulf %2, %4 : vector<28x512xf32>
    %c0_5 = arith.constant 0 : index
    %c0_6 = arith.constant 0 : index
    %6 = vector.load %arg4[%c0_5, %c0_6] : memref<28x1xf32, #tpu.memory_space<vmem>>, vector<28x1xf32>
    %7 = vector.broadcast %6 : vector<28x1xf32> to vector<28x512xf32>
    %8 = arith.addf %5, %7 : vector<28x512xf32>
    %c0_7 = arith.constant 0 : index
    %9 = memref.load %arg5[%c0_7] : memref<1xf32, #tpu.memory_space<smem>>
    %cst_8 = arith.constant 0.000000e+00 : f32
    %10 = vector.broadcast %cst_8 : f32 to vector<28x512xf32>
    %11 = arith.cmpf ogt, %8, %10 : vector<28x512xf32>
    %12 = vector.broadcast %9 : f32 to vector<28x512xf32>
    %13 = arith.mulf %12, %8 : vector<28x512xf32>
    %14 = arith.select %11, %8, %13 : vector<28x512xi1>, vector<28x512xf32>
    %15 = arith.truncf %14 : vector<28x512xf32> to vector<28x512xbf16>
    %c0_9 = arith.constant 0 : index
    %c0_10 = arith.constant 0 : index
    %16 = vector.load %arg6[%c0_9, %c0_10] : memref<28x512xbf16, #tpu.memory_space<vmem>>, vector<28x512xbf16>
    tpu.vector_store %arg6[%c0_9, %c0_10], %15 {strides = array<i32>} : memref<28x512xbf16, #tpu.memory_space<vmem>>, vector<28x512xbf16>,
    return
  }
  func.func @transform_0(%arg0: i32) -> (i32, i32) {
    %c0_i32 = arith.constant 0 : i32
    %c0_i32_0 = arith.constant 0 : i32
    return %c0_i32, %arg0 : i32, i32
  }
  func.func @transform_1(%arg0: i32) -> (i32, i32) {
    %c0_i32 = arith.constant 0 : i32
    %c0_i32_0 = arith.constant 0 : i32
    %c0_i32_1 = arith.constant 0 : i32
    return %c0_i32, %c0_i32_0 : i32, i32
  }
  func.func @transform_2(%arg0: i32) -> (i32, i32) {
    %c0_i32 = arith.constant 0 : i32
    %c0_i32_0 = arith.constant 0 : i32
    %c0_i32_1 = arith.constant 0 : i32
    return %c0_i32, %c0_i32_0 : i32, i32
  }
  func.func @transform_3(%arg0: i32) -> (i32, i32) {
    %c0_i32 = arith.constant 0 : i32
    %c0_i32_0 = arith.constant 0 : i32
    %c0_i32_1 = arith.constant 0 : i32
    return %c0_i32, %c0_i32_0 : i32, i32
  }
  func.func @transform_4(%arg0: i32) -> i32 {
    %c0_i32 = arith.constant 0 : i32
    %c0_i32_0 = arith.constant 0 : i32
    return %c0_i32 : i32
  }
  func.func @transform_5(%arg0: i32) -> (i32, i32) {
    %c0_i32 = arith.constant 0 : i32
    %c0_i32_0 = arith.constant 0 : i32
    return %c0_i32, %arg0 : i32, i32
  }
}

module attributes {stable_mosaic.version = 11 : i64} {
  func.func @_maxpool_kernel(%arg0: i32, %arg1: memref<9x28x512xbf16, #tpu.memory_space<vmem>>, %arg2: memref<28x512xbf16, #tpu.memory_space<vmem>>) attributes {dimension_semantics = [#tpu.dimension_semantics<parallel>], iteration_bounds = array<i64: 4>, scalar_prefetch = 0 : i64, scratch_operands = 0 : i64, tpu.core_type = #tpu.core_type<tc>, window_params = [{transform_indices = @transform_0, window_bounds = array<i64: 9, 28, 512>}, {transform_indices = @transform_1, window_bounds = array<i64: 28, 512>}]} {
    %c0 = arith.constant 0 : index
    %c0_0 = arith.constant 0 : index
    %c0_1 = arith.constant 0 : index
    %0 = vector.load %arg1[%c0, %c0_0, %c0_1] : memref<9x28x512xbf16, #tpu.memory_space<vmem>>, vector<9x28x512xbf16>
    %cst = arith.constant dense<0xFF80> : vector<28x512xbf16>
    %1 = vector.multi_reduction <maximumf>, %0, %cst [0] : vector<9x28x512xbf16> to vector<28x512xbf16>
    %c0_2 = arith.constant 0 : index
    %c0_3 = arith.constant 0 : index
    %2 = vector.load %arg2[%c0_2, %c0_3] : memref<28x512xbf16, #tpu.memory_space<vmem>>, vector<28x512xbf16>
    tpu.vector_store %arg2[%c0_2, %c0_3], %1 {strides = array<i32>} : memref<28x512xbf16, #tpu.memory_space<vmem>>, vector<28x512xbf16>,
    return
  }
  func.func @transform_0(%arg0: i32) -> (i32, i32, i32) {
    %c0_i32 = arith.constant 0 : i32
    %c0_i32_0 = arith.constant 0 : i32
    %c0_i32_1 = arith.constant 0 : i32
    return %c0_i32, %c0_i32_0, %arg0 : i32, i32, i32
  }
  func.func @transform_1(%arg0: i32) -> (i32, i32) {
    %c0_i32 = arith.constant 0 : i32
    %c0_i32_0 = arith.constant 0 : i32
    return %c0_i32, %arg0 : i32, i32
  }
}

module attributes {stable_mosaic.version = 11 : i64} {
  func.func @_conv_bn_prelu_kernel(%arg0: i32, %arg1: memref<256x512xbf16, #tpu.memory_space<vmem>>, %arg2: memref<48x256xbf16, #tpu.memory_space<vmem>>, %arg3: memref<48x1xf32, #tpu.memory_space<vmem>>, %arg4: memref<48x1xf32, #tpu.memory_space<vmem>>, %arg5: memref<1xf32, #tpu.memory_space<smem>>, %arg6: memref<48x512xbf16, #tpu.memory_space<vmem>>) attributes {dimension_semantics = [#tpu.dimension_semantics<parallel>], iteration_bounds = array<i64: 3>, scalar_prefetch = 0 : i64, scratch_operands = 0 : i64, tpu.core_type = #tpu.core_type<tc>, window_params = [{transform_indices = @transform_0, window_bounds = array<i64: 256, 512>}, {pipeline_mode = #tpu.pipeline_mode<synchronous>, transform_indices = @transform_1, window_bounds = array<i64: 48, 256>}, {pipeline_mode = #tpu.pipeline_mode<synchronous>, transform_indices = @transform_2, window_bounds = array<i64: 48, 1>}, {pipeline_mode = #tpu.pipeline_mode<synchronous>, transform_indices = @transform_3, window_bounds = array<i64: 48, 1>}, {transform_indices = @transform_4, window_bounds = array<i64: 1>}, {transform_indices = @transform_5, window_bounds = array<i64: 48, 512>}]} {
    %c0 = arith.constant 0 : index
    %c0_0 = arith.constant 0 : index
    %0 = vector.load %arg2[%c0, %c0_0] : memref<48x256xbf16, #tpu.memory_space<vmem>>, vector<48x256xbf16>
    %c0_1 = arith.constant 0 : index
    %c0_2 = arith.constant 0 : index
    %1 = vector.load %arg1[%c0_1, %c0_2] : memref<256x512xbf16, #tpu.memory_space<vmem>>, vector<256x512xbf16>
    %cst = arith.constant dense<0.000000e+00> : vector<48x512xf32>
    %2 = tpu.matmul %0, %1, %cst {dimension_numbers = #tpu.dot_dimension_numbers<[1], [0], [0], [1], [0, 0, 1, 1], [], []>} : vector<48x256xbf16>, vector<256x512xbf16>, vector<48x512xf32> -> vector<48x512xf32>
    %c0_3 = arith.constant 0 : index
    %c0_4 = arith.constant 0 : index
    %3 = vector.load %arg3[%c0_3, %c0_4] : memref<48x1xf32, #tpu.memory_space<vmem>>, vector<48x1xf32>
    %4 = vector.broadcast %3 : vector<48x1xf32> to vector<48x512xf32>
    %5 = arith.mulf %2, %4 : vector<48x512xf32>
    %c0_5 = arith.constant 0 : index
    %c0_6 = arith.constant 0 : index
    %6 = vector.load %arg4[%c0_5, %c0_6] : memref<48x1xf32, #tpu.memory_space<vmem>>, vector<48x1xf32>
    %7 = vector.broadcast %6 : vector<48x1xf32> to vector<48x512xf32>
    %8 = arith.addf %5, %7 : vector<48x512xf32>
    %c0_7 = arith.constant 0 : index
    %9 = memref.load %arg5[%c0_7] : memref<1xf32, #tpu.memory_space<smem>>
    %cst_8 = arith.constant 0.000000e+00 : f32
    %10 = vector.broadcast %cst_8 : f32 to vector<48x512xf32>
    %11 = arith.cmpf ogt, %8, %10 : vector<48x512xf32>
    %12 = vector.broadcast %9 : f32 to vector<48x512xf32>
    %13 = arith.mulf %12, %8 : vector<48x512xf32>
    %14 = arith.select %11, %8, %13 : vector<48x512xi1>, vector<48x512xf32>
    %15 = arith.truncf %14 : vector<48x512xf32> to vector<48x512xbf16>
    %c0_9 = arith.constant 0 : index
    %c0_10 = arith.constant 0 : index
    %16 = vector.load %arg6[%c0_9, %c0_10] : memref<48x512xbf16, #tpu.memory_space<vmem>>, vector<48x512xbf16>
    tpu.vector_store %arg6[%c0_9, %c0_10], %15 {strides = array<i32>} : memref<48x512xbf16, #tpu.memory_space<vmem>>, vector<48x512xbf16>,
    return
  }
  func.func @transform_0(%arg0: i32) -> (i32, i32) {
    %c0_i32 = arith.constant 0 : i32
    %c0_i32_0 = arith.constant 0 : i32
    return %c0_i32, %arg0 : i32, i32
  }
  func.func @transform_1(%arg0: i32) -> (i32, i32) {
    %c0_i32 = arith.constant 0 : i32
    %c0_i32_0 = arith.constant 0 : i32
    %c0_i32_1 = arith.constant 0 : i32
    return %c0_i32, %c0_i32_0 : i32, i32
  }
  func.func @transform_2(%arg0: i32) -> (i32, i32) {
    %c0_i32 = arith.constant 0 : i32
    %c0_i32_0 = arith.constant 0 : i32
    %c0_i32_1 = arith.constant 0 : i32
    return %c0_i32, %c0_i32_0 : i32, i32
  }
  func.func @transform_3(%arg0: i32) -> (i32, i32) {
    %c0_i32 = arith.constant 0 : i32
    %c0_i32_0 = arith.constant 0 : i32
    %c0_i32_1 = arith.constant 0 : i32
    return %c0_i32, %c0_i32_0 : i32, i32
  }
  func.func @transform_4(%arg0: i32) -> i32 {
    %c0_i32 = arith.constant 0 : i32
    %c0_i32_0 = arith.constant 0 : i32
    return %c0_i32 : i32
  }
  func.func @transform_5(%arg0: i32) -> (i32, i32) {
    %c0_i32 = arith.constant 0 : i32
    %c0_i32_0 = arith.constant 0 : i32
    return %c0_i32, %arg0 : i32, i32
  }
}

module attributes {stable_mosaic.version = 11 : i64} {
  func.func @_maxpool_kernel(%arg0: i32, %arg1: memref<9x48x512xbf16, #tpu.memory_space<vmem>>, %arg2: memref<48x512xbf16, #tpu.memory_space<vmem>>) attributes {dimension_semantics = [#tpu.dimension_semantics<parallel>], iteration_bounds = array<i64: 1>, scalar_prefetch = 0 : i64, scratch_operands = 0 : i64, tpu.core_type = #tpu.core_type<tc>, window_params = [{transform_indices = @transform_0, window_bounds = array<i64: 9, 48, 512>}, {transform_indices = @transform_1, window_bounds = array<i64: 48, 512>}]} {
    %c0 = arith.constant 0 : index
    %c0_0 = arith.constant 0 : index
    %c0_1 = arith.constant 0 : index
    %0 = vector.load %arg1[%c0, %c0_0, %c0_1] : memref<9x48x512xbf16, #tpu.memory_space<vmem>>, vector<9x48x512xbf16>
    %cst = arith.constant dense<0xFF80> : vector<48x512xbf16>
    %1 = vector.multi_reduction <maximumf>, %0, %cst [0] : vector<9x48x512xbf16> to vector<48x512xbf16>
    %c0_2 = arith.constant 0 : index
    %c0_3 = arith.constant 0 : index
    %2 = vector.load %arg2[%c0_2, %c0_3] : memref<48x512xbf16, #tpu.memory_space<vmem>>, vector<48x512xbf16>
    tpu.vector_store %arg2[%c0_2, %c0_3], %1 {strides = array<i32>} : memref<48x512xbf16, #tpu.memory_space<vmem>>, vector<48x512xbf16>,
    return
  }
  func.func @transform_0(%arg0: i32) -> (i32, i32, i32) {
    %c0_i32 = arith.constant 0 : i32
    %c0_i32_0 = arith.constant 0 : i32
    %c0_i32_1 = arith.constant 0 : i32
    return %c0_i32, %c0_i32_0, %arg0 : i32, i32, i32
  }
  func.func @transform_1(%arg0: i32) -> (i32, i32) {
    %c0_i32 = arith.constant 0 : i32
    %c0_i32_0 = arith.constant 0 : i32
    return %c0_i32, %arg0 : i32, i32
  }
}

module attributes {stable_mosaic.version = 11 : i64} {
  func.func @_tail_kernel(%arg0: i32, %arg1: memref<9x8x192xbf16, #tpu.memory_space<vmem>>, %arg2: memref<192x64xbf16, #tpu.memory_space<vmem>>, %arg3: memref<1x1x64xf32, #tpu.memory_space<vmem>>, %arg4: memref<1x1x64xf32, #tpu.memory_space<vmem>>, %arg5: memref<1xf32, #tpu.memory_space<smem>>, %arg6: memref<9x64x128xbf16, #tpu.memory_space<vmem>>, %arg7: memref<1x128xf32, #tpu.memory_space<vmem>>, %arg8: memref<1xf32, #tpu.memory_space<smem>>, %arg9: memref<128x8xbf16, #tpu.memory_space<vmem>>, %arg10: memref<1x8xf32, #tpu.memory_space<vmem>>, %arg11: memref<8x8xf32, #tpu.memory_space<vmem>>) attributes {dimension_semantics = [#tpu.dimension_semantics<parallel>], iteration_bounds = array<i64: 2>, scalar_prefetch = 0 : i64, scratch_operands = 0 : i64, tpu.core_type = #tpu.core_type<tc>, window_params = [{transform_indices = @transform_0, window_bounds = array<i64: 9, 8, 192>}, {pipeline_mode = #tpu.pipeline_mode<synchronous>, transform_indices = @transform_1, window_bounds = array<i64: 192, 64>}, {pipeline_mode = #tpu.pipeline_mode<synchronous>, transform_indices = @transform_2, window_bounds = array<i64: 1, 1, 64>}, {pipeline_mode = #tpu.pipeline_mode<synchronous>, transform_indices = @transform_3, window_bounds = array<i64: 1, 1, 64>}, {transform_indices = @transform_4, window_bounds = array<i64: 1>}, {pipeline_mode = #tpu.pipeline_mode<synchronous>, transform_indices = @transform_5, window_bounds = array<i64: 9, 64, 128>}, {pipeline_mode = #tpu.pipeline_mode<synchronous>, transform_indices = @transform_6, window_bounds = array<i64: 1, 128>}, {transform_indices = @transform_7, window_bounds = array<i64: 1>}, {pipeline_mode = #tpu.pipeline_mode<synchronous>, transform_indices = @transform_8, window_bounds = array<i64: 128, 8>}, {pipeline_mode = #tpu.pipeline_mode<synchronous>, transform_indices = @transform_9, window_bounds = array<i64: 1, 8>}, {transform_indices = @transform_10, window_bounds = array<i64: 8, 8>}]} {
    %c0 = arith.constant 0 : index
    %c0_0 = arith.constant 0 : index
    %c0_1 = arith.constant 0 : index
    %0 = vector.load %arg1[%c0, %c0_0, %c0_1] : memref<9x8x192xbf16, #tpu.memory_space<vmem>>, vector<9x8x192xbf16>
    %c0_2 = arith.constant 0 : index
    %c0_3 = arith.constant 0 : index
    %1 = vector.load %arg2[%c0_2, %c0_3] : memref<192x64xbf16, #tpu.memory_space<vmem>>, vector<192x64xbf16>
    %2 = vector.shape_cast %1 : vector<192x64xbf16> to vector<1x192x64xbf16>
    %3 = vector.broadcast %2 : vector<1x192x64xbf16> to vector<9x192x64xbf16>
    "tpu.trace_start"() <{level = 10 : i32, message = "pbk,pkc->pbc"}> : () -> ()
    %cst = arith.constant dense<0.000000e+00> : vector<9x8x64xf32>
    %4 = tpu.matmul %0, %3, %cst {dimension_numbers = #tpu.dot_dimension_numbers<[2], [1], [1], [2], [0, 0, 0, 1, 1, 2], [0], [0]>} : vector<9x8x192xbf16>, vector<9x192x64xbf16>, vector<9x8x64xf32> -> vector<9x8x64xf32>
    "tpu.trace_stop"() : () -> ()
    %c0_4 = arith.constant 0 : index
    %c0_5 = arith.constant 0 : index
    %c0_6 = arith.constant 0 : index
    %5 = vector.load %arg3[%c0_4, %c0_5, %c0_6] : memref<1x1x64xf32, #tpu.memory_space<vmem>>, vector<1x1x64xf32>
    %6 = vector.broadcast %5 : vector<1x1x64xf32> to vector<9x8x64xf32>
    %7 = arith.mulf %4, %6 : vector<9x8x64xf32>
    %c0_7 = arith.constant 0 : index
    %c0_8 = arith.constant 0 : index
    %c0_9 = arith.constant 0 : index
    %8 = vector.load %arg4[%c0_7, %c0_8, %c0_9] : memref<1x1x64xf32, #tpu.memory_space<vmem>>, vector<1x1x64xf32>
    %9 = vector.broadcast %8 : vector<1x1x64xf32> to vector<9x8x64xf32>
    %10 = arith.addf %7, %9 : vector<9x8x64xf32>
    %c0_10 = arith.constant 0 : index
    %11 = memref.load %arg5[%c0_10] : memref<1xf32, #tpu.memory_space<smem>>
    %cst_11 = arith.constant 0.000000e+00 : f32
    %12 = vector.broadcast %cst_11 : f32 to vector<9x8x64xf32>
    %13 = arith.cmpf ogt, %10, %12 : vector<9x8x64xf32>
    %14 = vector.broadcast %11 : f32 to vector<9x8x64xf32>
    %15 = arith.mulf %14, %10 : vector<9x8x64xf32>
    %16 = arith.select %13, %10, %15 : vector<9x8x64xi1>, vector<9x8x64xf32>
    %17 = arith.truncf %16 : vector<9x8x64xf32> to vector<9x8x64xbf16>
    %c0_12 = arith.constant 0 : index
    %c0_13 = arith.constant 0 : index
    %c0_14 = arith.constant 0 : index
    %18 = vector.load %arg6[%c0_12, %c0_13, %c0_14] : memref<9x64x128xbf16, #tpu.memory_space<vmem>>, vector<9x64x128xbf16>
    "tpu.trace_start"() <{level = 10 : i32, message = "pbc,pcj->pbj"}> : () -> ()
    %cst_15 = arith.constant dense<0.000000e+00> : vector<9x8x128xf32>
    %19 = tpu.matmul %17, %18, %cst_15 {dimension_numbers = #tpu.dot_dimension_numbers<[2], [1], [1], [2], [0, 0, 0, 1, 1, 2], [0], [0]>} : vector<9x8x64xbf16>, vector<9x64x128xbf16>, vector<9x8x128xf32> -> vector<9x8x128xf32>
    "tpu.trace_stop"() : () -> ()
    %cst_16 = arith.constant dense<0.000000e+00> : vector<8x128xf32>
    %20 = vector.multi_reduction <add>, %19, %cst_16 [0] : vector<9x8x128xf32> to vector<8x128xf32>
    %c0_17 = arith.constant 0 : index
    %c0_18 = arith.constant 0 : index
    %21 = vector.load %arg7[%c0_17, %c0_18] : memref<1x128xf32, #tpu.memory_space<vmem>>, vector<1x128xf32>
    %22 = vector.broadcast %21 : vector<1x128xf32> to vector<8x128xf32>
    %23 = arith.addf %20, %22 : vector<8x128xf32>
    %c0_19 = arith.constant 0 : index
    %24 = memref.load %arg8[%c0_19] : memref<1xf32, #tpu.memory_space<smem>>
    %cst_20 = arith.constant 0.000000e+00 : f32
    %25 = vector.broadcast %cst_20 : f32 to vector<8x128xf32>
    %26 = arith.cmpf ogt, %23, %25 : vector<8x128xf32>
    %27 = vector.broadcast %24 : f32 to vector<8x128xf32>
    %28 = arith.mulf %27, %23 : vector<8x128xf32>
    %29 = arith.select %26, %23, %28 : vector<8x128xi1>, vector<8x128xf32>
    %30 = arith.truncf %29 : vector<8x128xf32> to vector<8x128xbf16>
    %c0_21 = arith.constant 0 : index
    %c0_22 = arith.constant 0 : index
    %31 = vector.load %arg9[%c0_21, %c0_22] : memref<128x8xbf16, #tpu.memory_space<vmem>>, vector<128x8xbf16>
    %cst_23 = arith.constant dense<0.000000e+00> : vector<8x8xf32>
    %32 = tpu.matmul %30, %31, %cst_23 {dimension_numbers = #tpu.dot_dimension_numbers<[1], [0], [0], [1], [0, 0, 1, 1], [], []>} : vector<8x128xbf16>, vector<128x8xbf16>, vector<8x8xf32> -> vector<8x8xf32>
    %c0_24 = arith.constant 0 : index
    %c0_25 = arith.constant 0 : index
    %33 = vector.load %arg10[%c0_24, %c0_25] : memref<1x8xf32, #tpu.memory_space<vmem>>, vector<1x8xf32>
    %34 = vector.broadcast %33 : vector<1x8xf32> to vector<8x8xf32>
    %35 = arith.addf %32, %34 : vector<8x8xf32>
    %36 = tpu.iota {dimensions = array<i32: 1>} : vector<8x8xi32>
    %c0_i32 = arith.constant 0 : i32
    %37 = vector.broadcast %c0_i32 : i32 to vector<8x8xi32>
    %38 = arith.cmpi eq, %36, %37 : vector<8x8xi32>
    %39 = arith.negf %35 : vector<8x8xf32>
    %40 = math.exp %39 : vector<8x8xf32>
    %cst_26 = arith.constant 1.000000e+00 : f32
    %41 = vector.broadcast %cst_26 : f32 to vector<8x8xf32>
    %42 = arith.addf %41, %40 : vector<8x8xf32>
    %43 = arith.divf %41, %42 : vector<8x8xf32>
    %44 = arith.select %38, %43, %35 : vector<8x8xi1>, vector<8x8xf32>
    %c0_27 = arith.constant 0 : index
    %c0_28 = arith.constant 0 : index
    %45 = vector.load %arg11[%c0_27, %c0_28] : memref<8x8xf32, #tpu.memory_space<vmem>>, vector<8x8xf32>
    tpu.vector_store %arg11[%c0_27, %c0_28], %44 {strides = array<i32>} : memref<8x8xf32, #tpu.memory_space<vmem>>, vector<8x8xf32>,
    return
  }
  func.func @transform_0(%arg0: i32) -> (i32, i32, i32) {
    %c0_i32 = arith.constant 0 : i32
    %c0_i32_0 = arith.constant 0 : i32
    %c0_i32_1 = arith.constant 0 : i32
    return %c0_i32, %arg0, %c0_i32_0 : i32, i32, i32
  }
  func.func @transform_1(%arg0: i32) -> (i32, i32) {
    %c0_i32 = arith.constant 0 : i32
    %c0_i32_0 = arith.constant 0 : i32
    %c0_i32_1 = arith.constant 0 : i32
    return %c0_i32, %c0_i32_0 : i32, i32
  }
  func.func @transform_2(%arg0: i32) -> (i32, i32, i32) {
    %c0_i32 = arith.constant 0 : i32
    %c0_i32_0 = arith.constant 0 : i32
    %c0_i32_1 = arith.constant 0 : i32
    %c0_i32_2 = arith.constant 0 : i32
    return %c0_i32, %c0_i32_0, %c0_i32_1 : i32, i32, i32
  }
  func.func @transform_3(%arg0: i32) -> (i32, i32, i32) {
    %c0_i32 = arith.constant 0 : i32
    %c0_i32_0 = arith.constant 0 : i32
    %c0_i32_1 = arith.constant 0 : i32
    %c0_i32_2 = arith.constant 0 : i32
    return %c0_i32, %c0_i32_0, %c0_i32_1 : i32, i32, i32
  }
  func.func @transform_4(%arg0: i32) -> i32 {
    %c0_i32 = arith.constant 0 : i32
    %c0_i32_0 = arith.constant 0 : i32
    return %c0_i32 : i32
  }
  func.func @transform_5(%arg0: i32) -> (i32, i32, i32) {
    %c0_i32 = arith.constant 0 : i32
    %c0_i32_0 = arith.constant 0 : i32
    %c0_i32_1 = arith.constant 0 : i32
    %c0_i32_2 = arith.constant 0 : i32
    return %c0_i32, %c0_i32_0, %c0_i32_1 : i32, i32, i32
  }
  func.func @transform_6(%arg0: i32) -> (i32, i32) {
    %c0_i32 = arith.constant 0 : i32
    %c0_i32_0 = arith.constant 0 : i32
    %c0_i32_1 = arith.constant 0 : i32
    return %c0_i32, %c0_i32_0 : i32, i32
  }
  func.func @transform_7(%arg0: i32) -> i32 {
    %c0_i32 = arith.constant 0 : i32
    %c0_i32_0 = arith.constant 0 : i32
    return %c0_i32 : i32
  }
  func.func @transform_8(%arg0: i32) -> (i32, i32) {
    %c0_i32 = arith.constant 0 : i32
    %c0_i32_0 = arith.constant 0 : i32
    %c0_i32_1 = arith.constant 0 : i32
    return %c0_i32, %c0_i32_0 : i32, i32
  }
  func.func @transform_9(%arg0: i32) -> (i32, i32) {
    %c0_i32 = arith.constant 0 : i32
    %c0_i32_0 = arith.constant 0 : i32
    %c0_i32_1 = arith.constant 0 : i32
    return %c0_i32, %c0_i32_0 : i32, i32
  }
  func.func @transform_10(%arg0: i32) -> (i32, i32) {
    %c0_i32 = arith.constant 0 : i32
    %c0_i32_0 = arith.constant 0 : i32
    return %arg0, %c0_i32 : i32, i32
  }
}

</mosaic_0001>

<bundles_post_ra>
// kernel: rnet_forward.5
= control target key start
LH: loop header
LB: loop body
LE: loop exit
PB: predicated region body
PF: predicated region fallthrough
CT: control target
= control target key end

     0   :  { %s1008_s0 = inlined_call_operand.vmem [shape: bf16[32,8192], index: 0, kind: input, shape index: {}]   ;;  %s1009_s1 = inlined_call_operand.vmem [shape: bf16[28,32], index: 1, kind: input, shape index: {}]   ;;  %s1010_s2 = inlined_call_operand.vmem [shape: f32[28,1], index: 2, kind: input, shape index: {}]   ;;  %s1011_s3 = inlined_call_operand.vmem [shape: f32[28,1], index: 3, kind: input, shape index: {}]   ;;  %s1012_s4 = inlined_call_operand.<no memory space> [shape: f32[1], index: 4, kind: input, shape index: {}]   ;;  %s1013_s5 = inlined_call_operand.vmem [shape: bf16[28,8192], index: 5, kind: output, shape index: {}]  }
   0x1   :  { %10 = sst [smem:[#allocation2]] %s1012_s4 }
   0x2   :  { %s861_s20 = smov 0   ;;  %s863_s21 = smov 0  }
   0x3   :  { %s865_s22 = smov 0  }
   0x4 LB: > { %s715_s4 = sadd.s32 4294967295, %s825_s22   ;;  %s878_s23 = sadd.s32 1, %s825_s22   ;;  %s825_s22 = sphi %s865_s22, %s1017_s22   ;;  %s821_s21 = sphi %s863_s21, %s1016_s21   ;;  %s817_s20 = sphi %s861_s20, %s1015_s20  }
   0x5   : > { %s20_s24 = ssub.s32 %s825_s22, %s878_s23  ;;  %s23_s25 = sadd.s32 1, %s821_s21 }
   0x6   : > { %p21_p0 = scmp.eq.s32.totalorder %s20_s24, 0  ;;  %p30_p1 = scmp.ne.s32.totalorder %s821_s21, %s817_s20 }
   0x7   : > { %p31_p2 = scmp.eq.s32.totalorder %s825_s22, 0  ;;  %p144_p3 = scmp.eq.s32.totalorder %s715_s4, 15 }
   0x8   : > { %s889_s26 = scalar_select %p21_p0, %s821_s21, %s23_s25  }
   0x9   : > { %p32_p4 = por %p31_p2, %p30_p1  ;;  %p891_p5 = por %p144_p3, %p30_p1 }
   0xa   : > { %p718_p6 = scmp.ge.s32.totalorder %s825_s22, 16 }
   0xc   : > { %178 = sbr.rel (%p718_p6) target bundleno = 27 (0x1b), region = 32 }
  0x13   : > { %181 = sbr.rel (!%p32_p4) target bundleno = 27 (0x1b), region = 36  ;;  %s183_s28 = sand.u32 (%p32_p4), 1, %s821_s21  }
  0x14   : > { %s752_s29 = sshll.u32 (%p32_p4), %s825_s22, 4  ;;  %s719_s30 = sshll.u32 (%p32_p4), %s183_s28, 6 }
  0x15   : > { %s188_s8 = scalar_lea.vmem (%p32_p4), %s1008_s0, %s752_s29  ;;  %s185_s9 = scalar_lea.vmem (%p32_p4), [#allocation3], %s719_s30 }
  0x16   : > { %v201_v0 = vld [vmem:[%s188_s8] sm:$0xff] (%p32_p4)  ;;  %v203_v1 = vld [vmem:[%s188_s8 + $0x8] sm:$0xff] (%p32_p4) }
  0x17   : > { %v205_v2 = vld [vmem:[%s188_s8 + $0x100] sm:$0xff] (%p32_p4)  ;;  %202 = vst [vmem:[%s185_s9] sm:$0xff] (%p32_p4), %v201_v0  ;;  %204 = vst [vmem:[%s185_s9 + $0x8] sm:$0xff] (%p32_p4), %v203_v1  ;;  %v207_v3 = vld [vmem:[%s188_s8 + $0x108] sm:$0xff] (%p32_p4) }
  0x18   : > { %206 = vst [vmem:[%s185_s9 + $0x10] sm:$0xff] (%p32_p4), %v205_v2  ;;  %v209_v4 = vld [vmem:[%s188_s8 + $0x200] sm:$0xff] (%p32_p4)  ;;  %v211_v5 = vld [vmem:[%s188_s8 + $0x208] sm:$0xff] (%p32_p4)  ;;  %208 = vst [vmem:[%s185_s9 + $0x18] sm:$0xff] (%p32_p4), %v207_v3 }
  0x19   : > { %210 = vst [vmem:[%s185_s9 + $0x20] sm:$0xff] (%p32_p4), %v209_v4  ;;  %212 = vst [vmem:[%s185_s9 + $0x28] sm:$0xff] (%p32_p4), %v211_v5  ;;  %v213_v6 = vld [vmem:[%s188_s8 + $0x300] sm:$0xff] (%p32_p4)  ;;  %v215_v7 = vld [vmem:[%s188_s8 + $0x308] sm:$0xff] (%p32_p4) }
  0x1a   : > { %214 = vst [vmem:[%s185_s9 + $0x30] sm:$0xff] %v213_v6  ;;  %216 = vst [vmem:[%s185_s9 + $0x38] sm:$0xff] %v215_v7 }
  0x1b PF: > { %p722_p7 = scmp.ge.s32.totalorder %s825_s22, 1  ;;  %p221_p8 = scmp.lt.s32.totalorder %s825_s22, 17 }
  0x1d   : > { %p222_p9 = pnand %p722_p7, %p221_p8 }
  0x1e   : > { %s228_s10 = sand.u32 (!%p222_p9), 1, %s817_s20   ;;  %v827_v8 = vmov (!%p222_p9), 0   ;;  %v434_v9 = vld [vmem:[%s1010_s2 + $0x10] sm:$0xff] (!%p222_p9)  ;;  %v432_v18 = vld [vmem:[%s1010_s2] sm:$0xff] (!%p222_p9)  ;;  %v435_v19 = vld [vmem:[%s1010_s2 + $0x18] sm:$0xf] (!%p222_p9) }
  0x1f   : > { %225 = sbr.rel (%p222_p9) target bundleno = 291 (0x123), region = 59  ;;  %s904_s11 = sshll.u32 (!%p222_p9), %s228_s10, 6  ;;  %358 = vmatprep.mubr.bf16.mxu0 (!%p222_p9), %v827_v8  ;;  %411 = vmatprep.mubr.bf16.mxu1 (!%p222_p9), %v827_v8  ;;  %v801_v20 = vld [vmem:[%s1009_s1] sm:$0xff] (!%p222_p9)   ;;  %v433_v21 = vld [vmem:[%s1010_s2 + $0x8] sm:$0xff] (!%p222_p9)  ;;  %vm319_vm0 = vcmask (!%p222_p9), 261120   ;;  %v474_v26 = vld [vmem:[%s1011_s3 + $0x10] sm:$0xff] (!%p222_p9) }
  0x20   : > { %788 = vset.pattern.permute.xlu1 (!%p222_p9), %v827_v8  ;;  %787 = vset.pattern.permute.xlu0 (!%p222_p9), %v827_v8  ;;  %s230_s14 = scalar_lea.vmem (!%p222_p9), [#allocation3], %s904_s11  ;;  %v473_v22 = vld [vmem:[%s1011_s3 + $0x8] sm:$0xff] (!%p222_p9)  ;;  %v472_v23 = vld [vmem:[%s1011_s3] sm:$0xff] (!%p222_p9)  ;;  %v475_v24 = vld [vmem:[%s1011_s3 + $0x18] sm:$0xf] (!%p222_p9)  ;;  %s955_s15 = scalar_lea.vmem (!%p222_p9), [#allocation4], %s904_s11 }
  0x21   : > { %v789_v10 = vld [vmem:[%s230_s14 + $0x4] ss:$16 sps:$4 sm:$0xff] (!%p222_p9)   ;;  %448 = vperm.xlu1 (!%p222_p9), %788, %v434_v9   ;;  %v791_v11 = vld [vmem:[%s230_s14 + $0xc] ss:$16 sps:$4 sm:$0xff] (!%p222_p9)   ;;  %v793_v12 = vld [vmem:[%s230_s14] ss:$16 sps:$4 sm:$0xff] (!%p222_p9)   ;;  %438 = vperm.xlu0 (!%p222_p9), %787, %v432_v18  }
  0x22   : > { %326 = vmatprep.subr.bf16.mxu0 (!%p222_p9), %v789_v10  ;;  %v794_v13 = vld [vmem:[%s230_s14 + $0x8] ss:$16 sps:$4 sm:$0xff] (!%p222_p9)   ;;  %379 = vmatprep.subr.bf16.mxu1 (!%p222_p9), %v791_v11  ;;  %v795_v14 = vld [vmem:[%s230_s14 + $0x24] ss:$16 sps:$4 sm:$0xff] (!%p222_p9)   ;;  %v797_v15 = vld [vmem:[%s230_s14 + $0x2c] ss:$16 sps:$4 sm:$0xff] (!%p222_p9)  }
  0x23   : > { %327 = vmatpush1.bf16.msra.mxu0 (!%p222_p9), %v793_v12  ;;  %380 = vmatpush1.bf16.msra.mxu1 (!%p222_p9), %v794_v13  ;;  %v799_v16 = vld [vmem:[%s230_s14 + $0x20] ss:$16 sps:$4 sm:$0xff] (!%p222_p9)   ;;  %v800_v17 = vld [vmem:[%s230_s14 + $0x28] ss:$16 sps:$4 sm:$0xff] (!%p222_p9)   ;;  %s512_s14 = sld [smem:[#allocation2]] (!%p222_p9) }
  0x24   : > { %328 = vmatprep.subr.bf16.mxu0 (!%p222_p9), %v795_v14  ;;  %381 = vmatprep.subr.bf16.mxu1 (!%p222_p9), %v797_v15  ;;  %v802_v25 = vld [vmem:[%s1009_s1 + $0x8] sm:$0x3f] (!%p222_p9)  }
  0x25   : > { %453 = vperm.xlu1 (!%p222_p9), %788, %v435_v19   ;;  %443 = vperm.xlu0 (!%p222_p9), %787, %v433_v21  }
  0x26   : > { %s761_s11 = sshll.u32 (%p891_p5), %s715_s4, 4 }
  0x27   : > { %329 = vmatpush1.bf16.msra.mxu0 %v799_v16  ;;  %382 = vmatpush1.bf16.msra.mxu1 %v800_v17  ;;  %s627_s18 = scalar_lea.vmem (%p891_p5), %s1013_s5, %s761_s11 }
  0x29   : > { %483 = vperm.xlu1 %788, %v473_v22   ;;  %478 = vperm.xlu0 %787, %v472_v23   ;;  %v945_v38 = vstv %s512_s14 }
  0x2a   : > { %735 = vmatmul.mubr.msk.bf16.vlgmr.msra.gmra.mrb[0].mxu0 %vm319_vm0, %v801_v20  ;;  %737 = vmatmul.mubr.msk.bf16.vlgmr.msra.gmra.mrb[0].mxu1 %vm319_vm0, %v801_v20 }
  0x2b   : > { %368 = vmatprep.mubr.bf16.mxu0 %v827_v8  ;;  %421 = vmatprep.mubr.bf16.mxu1 %v827_v8 }
  0x2d   : > { %493 = vperm.xlu1 %788, %v475_v24   ;;  %488 = vperm.xlu0 %787, %v474_v26  }
  0x32   : > { %736 = vmatmul.mubr.msk.bf16.gmra.mrb[4].mxu0 %vm319_vm0, %v802_v25  ;;  %738 = vmatmul.mubr.msk.bf16.gmra.mrb[4].mxu1 %vm319_vm0, %v802_v25 }
  0xa0   : > { %v439_v27 = vpop.permute.xlu0 %438  ;;  %v941_v28 = vpop.permute.xlu1 %448 }
  0xa4   : > { %v444_v29 = vpop.permute.xlu0 %443  ;;  %v943_v30 = vpop.permute.xlu1 %453 }
  0xa8   : > { %v479_v31 = vpop.permute.xlu0 %478  ;;  %v484_v55 = vpop.permute.xlu1 %483 }
  0xac   : > { %v489_v18 = vpop.permute.xlu0 %488 }
  0xfd   : > { %v360_v32 = vpop.f32.mrb[0].mxu0  ;;  %v413_v33 = vpop.f32.mrb[0].mxu1 }
  0xfe   : > { %v456_v34 = vmul.f32 %v439_v27, %v360_v32  ;;  %v458_v35 = vmul.f32 %v439_v27, %v413_v33  ;;  %v362_v36 = vpop.f32.mrb[1].mxu0  ;;  %v415_v37 = vpop.f32.mrb[1].mxu1 }
  0xff   : > { %v457_v39 = vmul.f32 %v439_v27, %v362_v36  ;;  %v459_v40 = vmul.f32 %v439_v27, %v415_v37  ;;  %v364_v41 = vpop.f32.mrb[2].mxu0  ;;  %v417_v42 = vpop.f32.mrb[2].mxu1 }
 0x100   : > { %v496_v43 = vadd.f32 %v479_v31, %v456_v34  ;;  %v498_v44 = vadd.f32 %v479_v31, %v458_v35  ;;  %v460_v45 = vmul.f32 %v444_v29, %v364_v41  ;;  %v462_v46 = vmul.f32 %v444_v29, %v417_v42  ;;  %v366_v47 = vpop.f32.mrb[3].mxu0  ;;  %v419_v48 = vpop.f32.mrb[3].mxu1 }
 0x101   : > { %v497_v49 = vadd.f32 %v479_v31, %v457_v39  ;;  %v499_v50 = vadd.f32 %v479_v31, %v459_v40  ;;  %v461_v51 = vmul.f32 %v444_v29, %v366_v47  ;;  %v463_v52 = vmul.f32 %v444_v29, %v419_v48  ;;  %v494_v36 = vpop.permute.xlu1 %493 }
 0x102   : > { %vm513_vm1 = vcmp.gt.f32.partialorder %v496_v43, 0.0  ;;  %v530_v53 = vmul.f32 %v945_v38, %v496_v43  ;;  %vm515_vm2 = vcmp.gt.f32.partialorder %v498_v44, 0.0  ;;  %v532_v54 = vmul.f32 %v945_v38, %v498_v44 }
 0x103   : > { %vm514_vm3 = vcmp.gt.f32.partialorder %v497_v49, 0.0  ;;  %v531_v56 = vmul.f32 %v945_v38, %v497_v49  ;;  %vm516_vm4 = vcmp.gt.f32.partialorder %v499_v50, 0.0  ;;  %v533_v57 = vmul.f32 %v945_v38, %v499_v50 }
 0x104   : > { %v546_v58 = vsel %vm513_vm1, %v496_v43, %v530_v53  ;;  %v548_v59 = vsel %vm515_vm2, %v498_v44, %v532_v54  ;;  %v500_v60 = vadd.f32 %v484_v55, %v460_v45  ;;  %v502_v61 = vadd.f32 %v484_v55, %v462_v46 }
 0x105   : > { %v547_v62 = vsel %vm514_vm3, %v497_v49, %v531_v56  ;;  %v549_v63 = vsel %vm516_vm4, %v499_v50, %v533_v57  ;;  %v501_v0 = vadd.f32 %v484_v55, %v461_v51  ;;  %v503_v1 = vadd.f32 %v484_v55, %v463_v52  ;;  %v370_v2 = vpop.f32.mrb[4].mxu0  ;;  %v423_v3 = vpop.f32.mrb[4].mxu1 }
 0x106   : > { %v753_v4 = vpack.c.bf16 %v547_v62, %v546_v58  ;;  %v754_v5 = vpack.c.bf16 %v549_v63, %v548_v59  ;;  %vm517_vm5 = vcmp.gt.f32.partialorder %v500_v60, 0.0  ;;  %v534_v6 = vmul.f32 %v945_v38, %v500_v60  ;;  %v372_v7 = vpop.f32.mrb[5].mxu0  ;;  %v425_v8 = vpop.f32.mrb[5].mxu1 }
 0x107   : > { %vm519_vm6 = vcmp.gt.f32.partialorder %v502_v61, 0.0  ;;  %v536_v9 = vmul.f32 %v945_v38, %v502_v61  ;;  %vm518_vm7 = vcmp.gt.f32.partialorder %v501_v0, 0.0  ;;  %v535_v10 = vmul.f32 %v945_v38, %v501_v0  ;;  %v374_v11 = vpop.f32.mrb[6].mxu0  ;;  %v427_v12 = vpop.f32.mrb[6].mxu1 }
 0x108   : > { %610 = vst [vmem:[%s955_s15] sm:$0xff] %v753_v4  ;;  %611 = vst [vmem:[%s955_s15 + $0x8] sm:$0xff] %v754_v5  ;;  %v550_v13 = vsel %vm517_vm5, %v500_v60, %v534_v6  ;;  %vm520_vm8 = vcmp.gt.f32.partialorder %v503_v1, 0.0  ;;  %v537_v14 = vmul.f32 %v945_v38, %v503_v1  ;;  %v464_v15 = vmul.f32 %v941_v28, %v370_v2  ;;  %v376_v16 = vpop.f32.mrb[7].mxu0  ;;  %v429_v17 = vpop.f32.mrb[7].mxu1 }
 0x109   : > { %v552_v19 = vsel %vm519_vm6, %v502_v61, %v536_v9  ;;  %v551_v20 = vsel %vm518_vm7, %v501_v0, %v535_v10  ;;  %v466_v21 = vmul.f32 %v941_v28, %v423_v3  ;;  %v465_v22 = vmul.f32 %v941_v28, %v372_v7 }
 0x10a   : > { %v755_v23 = vpack.c.bf16 %v551_v20, %v550_v13  ;;  %v553_v24 = vsel %vm520_vm8, %v503_v1, %v537_v14  ;;  %v504_v25 = vadd.f32 %v489_v18, %v464_v15  ;;  %v467_v26 = vmul.f32 %v941_v28, %v425_v8 }
 0x10b   : > { %v756_v27 = vpack.c.bf16 %v553_v24, %v552_v19  ;;  %v506_v29 = vadd.f32 %v489_v18, %v466_v21  ;;  %v505_v31 = vadd.f32 %v489_v18, %v465_v22  ;;  %v468_v32 = vmul.f32 %v943_v30, %v374_v11 }
 0x10c   : > { %612 = vst [vmem:[%s955_s15 + $0x10] sm:$0xff] %v755_v23  ;;  %vm521_vm9 = vcmp.gt.f32.partialorder %v504_v25, 0.0  ;;  %v538_v33 = vmul.f32 %v945_v38, %v504_v25  ;;  %v507_v34 = vadd.f32 %v489_v18, %v467_v26  ;;  %v470_v35 = vmul.f32 %v943_v30, %v427_v12 }
 0x10d   : > { %613 = vst [vmem:[%s955_s15 + $0x18] sm:$0xff] %v756_v27  ;;  %vm523_vm10 = vcmp.gt.f32.partialorder %v506_v29, 0.0  ;;  %v540_v37 = vmul.f32 %v945_v38, %v506_v29  ;;  %vm522_vm11 = vcmp.gt.f32.partialorder %v505_v31, 0.0  ;;  %v539_v28 = vmul.f32 %v945_v38, %v505_v31 }
 0x10e   : > { %v554_v39 = vsel %vm521_vm9, %v504_v25, %v538_v33  ;;  %vm524_vm12 = vcmp.gt.f32.partialorder %v507_v34, 0.0  ;;  %v541_v40 = vmul.f32 %v945_v38, %v507_v34  ;;  %v508_v41 = vadd.f32 %v494_v36, %v468_v32 }
 0x10f   : > { %v556_v42 = vsel %vm523_vm10, %v506_v29, %v540_v37  ;;  %v555_v43 = vsel %vm522_vm11, %v505_v31, %v539_v28  ;;  %v510_v44 = vadd.f32 %v494_v36, %v470_v35  ;;  %v469_v45 = vmul.f32 %v943_v30, %v376_v16 }
 0x110   : > { %v757_v46 = vpack.c.bf16 %v555_v43, %v554_v39  ;;  %v557_v47 = vsel %vm524_vm12, %v507_v34, %v541_v40  ;;  %vm525_vm13 = vcmp.gt.f32.partialorder %v508_v41, 0.0  ;;  %v542_v48 = vmul.f32 %v945_v38, %v508_v41 }
 0x111   : > { %v758_v49 = vpack.c.bf16 %v557_v47, %v556_v42  ;;  %v509_v50 = vadd.f32 %v494_v36, %v469_v45  ;;  %v544_v51 = vmul.f32 %v945_v38, %v510_v44  ;;  %v471_v52 = vmul.f32 %v943_v30, %v429_v17  ;;  %v640_v30 = vld [vmem:[%s955_s15] sm:$0xff] (%p891_p5) }
 0x112   : > { %614 = vst [vmem:[%s955_s15 + $0x20] sm:$0xff] %v757_v46  ;;  %v558_v53 = vsel %vm525_vm13, %v508_v41, %v542_v48  ;;  %vm527_vm14 = vcmp.gt.f32.partialorder %v510_v44, 0.0  ;;  %641 = vst [vmem:[%s627_s18] sm:$0xff] (%p891_p5), %v640_v30 }
 0x113   : > { %615 = vst [vmem:[%s955_s15 + $0x28] sm:$0xff] %v758_v49  ;;  %vm526_vm15 = vcmp.gt.f32.partialorder %v509_v50, 0.0  ;;  %v543_v54 = vmul.f32 %v945_v38, %v509_v50  ;;  %v511_v55 = vadd.f32 %v494_v36, %v471_v52  ;;  %v560_v57 = vsel %vm527_vm14, %v510_v44, %v544_v51  ;;  %v644_v62 = vld [vmem:[%s955_s15 + $0x10] sm:$0xff] (%p891_p5) }
 0x114   : > { %624 = sbr.rel (!%p891_p5) target bundleno = 291 (0x123), region = 67  ;;  %v646_v63 = vld [vmem:[%s955_s15 + $0x18] sm:$0xff] (%p891_p5)  ;;  %645 = vst [vmem:[%s627_s18 + $0x100] sm:$0xff] (%p891_p5), %v644_v62 }
 0x115   : > { %v559_v56 = vsel %vm526_vm15, %v509_v50, %v543_v54  ;;  %vm528_vm0 = vcmp.gt.f32.partialorder %v511_v55, 0.0  ;;  %v545_v59 = vmul.f32 %v945_v38, %v511_v55  ;;  %v642_v38 = vld [vmem:[%s955_s15 + $0x8] sm:$0xff] (%p891_p5)  ;;  %647 = vst [vmem:[%s627_s18 + $0x108] sm:$0xff] (%p891_p5), %v646_v63 }
 0x116   : > { %v759_v58 = vpack.c.bf16 %v559_v56, %v558_v53  ;;  %643 = vst [vmem:[%s627_s18 + $0x8] sm:$0xff] (%p891_p5), %v642_v38 }
 0x117   : > { %v561_v60 = vsel %vm528_vm0, %v511_v55, %v545_v59 }
 0x118   : > { %616 = vst [vmem:[%s955_s15 + $0x30] sm:$0x33] %v759_v58  ;;  %v760_v61 = vpack.c.bf16 %v561_v60, %v560_v57 }
 0x119   : > { %v648_v0 = vld [vmem:[%s955_s15 + $0x20] sm:$0xff] (%p891_p5) }
 0x11a   : > { %617 = vst [vmem:[%s955_s15 + $0x38] sm:$0x33] %v760_v61  ;;  %v650_v1 = vld [vmem:[%s955_s15 + $0x28] sm:$0xff] (%p891_p5)  ;;  %649 = vst [vmem:[%s627_s18 + $0x200] sm:$0xff] (%p891_p5), %v648_v0 }
 0x11b   : > { %651 = vst [vmem:[%s627_s18 + $0x208] sm:$0xff] %v650_v1 }
 0x11f   : > { %v652_v2 = vld [vmem:[%s955_s15 + $0x30] sm:$0xff] }
 0x120   : > { %653 = vst [vmem:[%s627_s18 + $0x300] sm:$0xff] %v652_v2 }
 0x121   : > { %v654_v3 = vld [vmem:[%s955_s15 + $0x38] sm:$0xff] }
 0x122   : > { %655 = vst [vmem:[%s627_s18 + $0x308] sm:$0xff] %v654_v3 }
 0x123 PF: > { %p13_p10 = scmp.ge.s32.totalorder %s878_s23, 18   ;;  %s1015_s20 = smov %s821_s21 }
 0x124   : > { %s1016_s21 = smov %s889_s26  ;;  %s1017_s22 = smov %s878_s23 }
 0x125   :  { %15 = sbr.rel (!%p13_p10) target bundleno = 4 (0x4), region = 121 }

// kernel: rnet_forward.6
= control target key start
LH: loop header
LB: loop body
LE: loop exit
PB: predicated region body
PF: predicated region fallthrough
CT: control target
= control target key end

     0   :  { %s650_s6 = smov 0   ;;  %s652_s7 = smov 0   ;;  %s999_s0 = inlined_call_operand.vmem [shape: bf16[9,28,2048], index: 0, kind: input, shape index: {}]   ;;  %s1000_s1 = inlined_call_operand.vmem [shape: bf16[28,2048], index: 1, kind: output, shape index: {}]  }
   0x1   :  { %s654_s8 = smov 0  }
   0x2 LB: > { %s575_s9 = sadd.s32 4294967295, %s638_s8   ;;  %s667_s10 = sadd.s32 1, %s638_s8   ;;  %s638_s8 = sphi %s654_s8, %s1006_s8   ;;  %s634_s7 = sphi %s652_s7, %s1005_s7   ;;  %s630_s6 = sphi %s650_s6, %s1004_s6  }
   0x3   : > { %s15_s11 = ssub.s32 %s638_s8, %s667_s10  ;;  %s18_s12 = sadd.s32 1, %s634_s7 }
   0x4   : > { %p16_p0 = scmp.eq.s32.totalorder %s15_s11, 0  ;;  %p25_p1 = scmp.ne.s32.totalorder %s634_s7, %s630_s6 }
   0x5   : > { %p26_p2 = scmp.eq.s32.totalorder %s638_s8, 0  ;;  %p55_p3 = scmp.eq.s32.totalorder %s575_s9, 3 }
   0x6   : > { %s678_s13 = scalar_select %p16_p0, %s634_s7, %s18_s12  }
   0x7   : > { %p27_p4 = por %p26_p2, %p25_p1  ;;  %p680_p5 = por %p55_p3, %p25_p1 }
   0x8   : > { %p578_p6 = scmp.ge.s32.totalorder %s638_s8, 4 }
   0xa   : > { %77 = sbr.rel (%p578_p6) target bundleno = 57 (0x39), region = 16 }
  0x11   : > { %80 = sbr.rel (!%p27_p4) target bundleno = 57 (0x39), region = 20  ;;  %s82_s15 = sand.u32 (%p27_p4), 1, %s634_s7  }
  0x12   : > { %s588_s16 = sshll.u32 (%p27_p4), %s638_s8, 4  ;;  %s590_s17 = smul.u32 (%p27_p4), 576, %s82_s15 }
  0x13   : > { %s690_s20 = scalar_lea.vmem (%p27_p4), %s999_s0, %s588_s16 }
  0x14   : > { %v100_v0 = vld [vmem:[%s690_s20] sm:$0xff] (%p27_p4)  ;;  %v102_v1 = vld [vmem:[%s690_s20 + $0x8] sm:$0xff] (%p27_p4)  ;;  %s698_s21 = scalar_lea.vmem (%p27_p4), [#allocation2], %s590_s17 }
  0x15   : > { %v104_v2 = vld [vmem:[%s690_s20 + $0x40] sm:$0xff] (%p27_p4)  ;;  %v106_v3 = vld [vmem:[%s690_s20 + $0x48] sm:$0xff] (%p27_p4)  ;;  %101 = vst [vmem:[%s698_s21] sm:$0xff] (%p27_p4), %v100_v0  ;;  %103 = vst [vmem:[%s698_s21 + $0x8] sm:$0xff] (%p27_p4), %v102_v1 }
  0x16   : > { %v108_v4 = vld [vmem:[%s690_s20 + $0x80] sm:$0xff] (%p27_p4)  ;;  %v110_v5 = vld [vmem:[%s690_s20 + $0x88] sm:$0xff] (%p27_p4)  ;;  %105 = vst [vmem:[%s698_s21 + $0x10] sm:$0xff] (%p27_p4), %v104_v2  ;;  %107 = vst [vmem:[%s698_s21 + $0x18] sm:$0xff] (%p27_p4), %v106_v3 }
  0x17   : > { %109 = vst [vmem:[%s698_s21 + $0x20] sm:$0xff] (%p27_p4), %v108_v4  ;;  %111 = vst [vmem:[%s698_s21 + $0x28] sm:$0xff] (%p27_p4), %v110_v5  ;;  %v112_v6 = vld [vmem:[%s690_s20 + $0xc0] sm:$0xff] (%p27_p4)  ;;  %v114_v7 = vld [vmem:[%s690_s20 + $0xc8] sm:$0xff] (%p27_p4) }
  0x18   : > { %v116_v8 = vld [vmem:[%s690_s20 + $0x100] sm:$0xff]  ;;  %113 = vst [vmem:[%s698_s21 + $0x30] sm:$0xff] %v112_v6  ;;  %115 = vst [vmem:[%s698_s21 + $0x38] sm:$0xff] %v114_v7  ;;  %v118_v9 = vld [vmem:[%s690_s20 + $0x108] sm:$0xff] }
  0x19   : > { %117 = vst [vmem:[%s698_s21 + $0x40] sm:$0xff] %v116_v8  ;;  %v120_v10 = vld [vmem:[%s690_s20 + $0x140] sm:$0xff]  ;;  %v122_v11 = vld [vmem:[%s690_s20 + $0x148] sm:$0xff]  ;;  %119 = vst [vmem:[%s698_s21 + $0x48] sm:$0xff] %v118_v9 }
  0x1a   : > { %121 = vst [vmem:[%s698_s21 + $0x50] sm:$0xff] %v120_v10  ;;  %123 = vst [vmem:[%s698_s21 + $0x58] sm:$0xff] %v122_v11  ;;  %v124_v12 = vld [vmem:[%s690_s20 + $0x180] sm:$0xff]  ;;  %v126_v13 = vld [vmem:[%s690_s20 + $0x188] sm:$0xff] }
  0x1b   : > { %v128_v14 = vld [vmem:[%s690_s20 + $0x1c0] sm:$0xff]  ;;  %125 = vst [vmem:[%s698_s21 + $0x60] sm:$0xff] %v124_v12  ;;  %127 = vst [vmem:[%s698_s21 + $0x68] sm:$0xff] %v126_v13  ;;  %v130_v15 = vld [vmem:[%s690_s20 + $0x1c8] sm:$0xff] }
  0x1c   : > { %129 = vst [vmem:[%s698_s21 + $0x70] sm:$0xff] %v128_v14  ;;  %v132_v16 = vld [vmem:[%s690_s20 + $0x200] sm:$0xff]  ;;  %v134_v17 = vld [vmem:[%s690_s20 + $0x208] sm:$0xff]  ;;  %131 = vst [vmem:[%s698_s21 + $0x78] sm:$0xff] %v130_v15 }
  0x1d   : > { %133 = vst [vmem:[%s698_s21 + $0x80] sm:$0xff] %v132_v16  ;;  %135 = vst [vmem:[%s698_s21 + $0x88] sm:$0xff] %v134_v17  ;;  %v136_v18 = vld [vmem:[%s690_s20 + $0x240] sm:$0xff]  ;;  %v138_v19 = vld [vmem:[%s690_s20 + $0x248] sm:$0xff] }
  0x1e   : > { %v140_v20 = vld [vmem:[%s690_s20 + $0x280] sm:$0xff]  ;;  %137 = vst [vmem:[%s698_s21 + $0x90] sm:$0xff] %v136_v18  ;;  %139 = vst [vmem:[%s698_s21 + $0x98] sm:$0xff] %v138_v19  ;;  %v142_v21 = vld [vmem:[%s690_s20 + $0x288] sm:$0xff] }
  0x1f   : > { %141 = vst [vmem:[%s698_s21 + $0xa0] sm:$0xff] %v140_v20  ;;  %v144_v22 = vld [vmem:[%s690_s20 + $0x2c0] sm:$0xff]  ;;  %v146_v23 = vld [vmem:[%s690_s20 + $0x2c8] sm:$0xff]  ;;  %143 = vst [vmem:[%s698_s21 + $0xa8] sm:$0xff] %v142_v21 }
  0x20   : > { %145 = vst [vmem:[%s698_s21 + $0xb0] sm:$0xff] %v144_v22  ;;  %147 = vst [vmem:[%s698_s21 + $0xb8] sm:$0xff] %v146_v23  ;;  %v148_v24 = vld [vmem:[%s690_s20 + $0x300] sm:$0xff]  ;;  %v150_v25 = vld [vmem:[%s690_s20 + $0x308] sm:$0xff] }
  0x21   : > { %v152_v26 = vld [vmem:[%s690_s20 + $0x340] sm:$0xff]  ;;  %149 = vst [vmem:[%s698_s21 + $0xc0] sm:$0xff] %v148_v24  ;;  %151 = vst [vmem:[%s698_s21 + $0xc8] sm:$0xff] %v150_v25  ;;  %v154_v27 = vld [vmem:[%s690_s20 + $0x348] sm:$0xff] }
  0x22   : > { %153 = vst [vmem:[%s698_s21 + $0xd0] sm:$0xff] %v152_v26  ;;  %v156_v28 = vld [vmem:[%s690_s20 + $0x380] sm:$0xff]  ;;  %v158_v29 = vld [vmem:[%s690_s20 + $0x388] sm:$0xff]  ;;  %155 = vst [vmem:[%s698_s21 + $0xd8] sm:$0xff] %v154_v27 }
  0x23   : > { %157 = vst [vmem:[%s698_s21 + $0xe0] sm:$0xff] %v156_v28  ;;  %159 = vst [vmem:[%s698_s21 + $0xe8] sm:$0xff] %v158_v29  ;;  %v160_v30 = vld [vmem:[%s690_s20 + $0x3c0] sm:$0xff]  ;;  %v162_v31 = vld [vmem:[%s690_s20 + $0x3c8] sm:$0xff] }
  0x24   : > { %v164_v32 = vld [vmem:[%s690_s20 + $0x400] sm:$0xff]  ;;  %161 = vst [vmem:[%s698_s21 + $0xf0] sm:$0xff] %v160_v30  ;;  %163 = vst [vmem:[%s698_s21 + $0xf8] sm:$0xff] %v162_v31  ;;  %v166_v33 = vld [vmem:[%s690_s20 + $0x408] sm:$0xff] }
  0x25   : > { %165 = vst [vmem:[%s698_s21 + $0x100] sm:$0xff] %v164_v32  ;;  %v168_v34 = vld [vmem:[%s690_s20 + $0x440] sm:$0xff]  ;;  %v170_v35 = vld [vmem:[%s690_s20 + $0x448] sm:$0xff]  ;;  %167 = vst [vmem:[%s698_s21 + $0x108] sm:$0xff] %v166_v33 }
  0x26   : > { %169 = vst [vmem:[%s698_s21 + $0x110] sm:$0xff] %v168_v34  ;;  %171 = vst [vmem:[%s698_s21 + $0x118] sm:$0xff] %v170_v35  ;;  %v172_v36 = vld [vmem:[%s690_s20 + $0x480] sm:$0xff]  ;;  %v174_v37 = vld [vmem:[%s690_s20 + $0x488] sm:$0xff] }
  0x27   : > { %v176_v38 = vld [vmem:[%s690_s20 + $0x4c0] sm:$0xff]  ;;  %173 = vst [vmem:[%s698_s21 + $0x120] sm:$0xff] %v172_v36  ;;  %175 = vst [vmem:[%s698_s21 + $0x128] sm:$0xff] %v174_v37  ;;  %v178_v39 = vld [vmem:[%s690_s20 + $0x4c8] sm:$0xff] }
  0x28   : > { %177 = vst [vmem:[%s698_s21 + $0x130] sm:$0xff] %v176_v38  ;;  %v180_v40 = vld [vmem:[%s690_s20 + $0x500] sm:$0xff]  ;;  %v182_v41 = vld [vmem:[%s690_s20 + $0x508] sm:$0xff]  ;;  %179 = vst [vmem:[%s698_s21 + $0x138] sm:$0xff] %v178_v39 }
  0x29   : > { %181 = vst [vmem:[%s698_s21 + $0x140] sm:$0xff] %v180_v40  ;;  %183 = vst [vmem:[%s698_s21 + $0x148] sm:$0xff] %v182_v41  ;;  %v184_v42 = vld [vmem:[%s690_s20 + $0x540] sm:$0xff]  ;;  %v186_v43 = vld [vmem:[%s690_s20 + $0x548] sm:$0xff] }
  0x2a   : > { %v188_v44 = vld [vmem:[%s690_s20 + $0x580] sm:$0xff]  ;;  %185 = vst [vmem:[%s698_s21 + $0x150] sm:$0xff] %v184_v42  ;;  %187 = vst [vmem:[%s698_s21 + $0x158] sm:$0xff] %v186_v43  ;;  %v190_v45 = vld [vmem:[%s690_s20 + $0x588] sm:$0xff] }
  0x2b   : > { %189 = vst [vmem:[%s698_s21 + $0x160] sm:$0xff] %v188_v44  ;;  %v192_v46 = vld [vmem:[%s690_s20 + $0x5c0] sm:$0xff]  ;;  %v194_v47 = vld [vmem:[%s690_s20 + $0x5c8] sm:$0xff]  ;;  %191 = vst [vmem:[%s698_s21 + $0x168] sm:$0xff] %v190_v45 }
  0x2c   : > { %193 = vst [vmem:[%s698_s21 + $0x170] sm:$0xff] %v192_v46  ;;  %195 = vst [vmem:[%s698_s21 + $0x178] sm:$0xff] %v194_v47  ;;  %v196_v48 = vld [vmem:[%s690_s20 + $0x600] sm:$0xff]  ;;  %v198_v49 = vld [vmem:[%s690_s20 + $0x608] sm:$0xff] }
  0x2d   : > { %v200_v50 = vld [vmem:[%s690_s20 + $0x640] sm:$0xff]  ;;  %197 = vst [vmem:[%s698_s21 + $0x180] sm:$0xff] %v196_v48  ;;  %199 = vst [vmem:[%s698_s21 + $0x188] sm:$0xff] %v198_v49  ;;  %v202_v51 = vld [vmem:[%s690_s20 + $0x648] sm:$0xff] }
  0x2e   : > { %201 = vst [vmem:[%s698_s21 + $0x190] sm:$0xff] %v200_v50  ;;  %v204_v52 = vld [vmem:[%s690_s20 + $0x680] sm:$0xff]  ;;  %v206_v53 = vld [vmem:[%s690_s20 + $0x688] sm:$0xff]  ;;  %203 = vst [vmem:[%s698_s21 + $0x198] sm:$0xff] %v202_v51 }
  0x2f   : > { %205 = vst [vmem:[%s698_s21 + $0x1a0] sm:$0xff] %v204_v52  ;;  %207 = vst [vmem:[%s698_s21 + $0x1a8] sm:$0xff] %v206_v53  ;;  %v208_v54 = vld [vmem:[%s690_s20 + $0x6c0] sm:$0xff]  ;;  %v210_v55 = vld [vmem:[%s690_s20 + $0x6c8] sm:$0xff] }
  0x30   : > { %v212_v56 = vld [vmem:[%s690_s20 + $0x700] sm:$0xff]  ;;  %209 = vst [vmem:[%s698_s21 + $0x1b0] sm:$0xff] %v208_v54  ;;  %211 = vst [vmem:[%s698_s21 + $0x1b8] sm:$0xff] %v210_v55  ;;  %v214_v57 = vld [vmem:[%s690_s20 + $0x708] sm:$0xff] }
  0x31   : > { %213 = vst [vmem:[%s698_s21 + $0x1c0] sm:$0xff] %v212_v56  ;;  %v216_v58 = vld [vmem:[%s690_s20 + $0x740] sm:$0xff]  ;;  %v218_v59 = vld [vmem:[%s690_s20 + $0x748] sm:$0xff]  ;;  %215 = vst [vmem:[%s698_s21 + $0x1c8] sm:$0xff] %v214_v57 }
  0x32   : > { %217 = vst [vmem:[%s698_s21 + $0x1d0] sm:$0xff] %v216_v58  ;;  %219 = vst [vmem:[%s698_s21 + $0x1d8] sm:$0xff] %v218_v59  ;;  %v220_v60 = vld [vmem:[%s690_s20 + $0x780] sm:$0xff]  ;;  %v222_v61 = vld [vmem:[%s690_s20 + $0x788] sm:$0xff] }
  0x33   : > { %v224_v62 = vld [vmem:[%s690_s20 + $0x7c0] sm:$0xff]  ;;  %221 = vst [vmem:[%s698_s21 + $0x1e0] sm:$0xff] %v220_v60  ;;  %223 = vst [vmem:[%s698_s21 + $0x1e8] sm:$0xff] %v222_v61  ;;  %v226_v63 = vld [vmem:[%s690_s20 + $0x7c8] sm:$0xff] }
  0x34   : > { %225 = vst [vmem:[%s698_s21 + $0x1f0] sm:$0xff] %v224_v62  ;;  %v228_v0 = vld [vmem:[%s690_s20 + $0x800] sm:$0xff]  ;;  %v230_v1 = vld [vmem:[%s690_s20 + $0x808] sm:$0xff]  ;;  %227 = vst [vmem:[%s698_s21 + $0x1f8] sm:$0xff] %v226_v63 }
  0x35   : > { %229 = vst [vmem:[%s698_s21 + $0x200] sm:$0xff] %v228_v0  ;;  %231 = vst [vmem:[%s698_s21 + $0x208] sm:$0xff] %v230_v1  ;;  %v232_v2 = vld [vmem:[%s690_s20 + $0x840] sm:$0xff]  ;;  %v234_v3 = vld [vmem:[%s690_s20 + $0x848] sm:$0xff] }
  0x36   : > { %v236_v4 = vld [vmem:[%s690_s20 + $0x880] sm:$0xff]  ;;  %233 = vst [vmem:[%s698_s21 + $0x210] sm:$0xff] %v232_v2  ;;  %235 = vst [vmem:[%s698_s21 + $0x218] sm:$0xff] %v234_v3  ;;  %v238_v5 = vld [vmem:[%s690_s20 + $0x888] sm:$0xff] }
  0x37   : > { %237 = vst [vmem:[%s698_s21 + $0x220] sm:$0xff] %v236_v4  ;;  %v240_v6 = vld [vmem:[%s690_s20 + $0x8c0] sm:$0xff]  ;;  %v242_v7 = vld [vmem:[%s690_s20 + $0x8c8] sm:$0xff]  ;;  %239 = vst [vmem:[%s698_s21 + $0x228] sm:$0xff] %v238_v5 }
  0x38   : > { %241 = vst [vmem:[%s698_s21 + $0x230] sm:$0xff] %v240_v6  ;;  %243 = vst [vmem:[%s698_s21 + $0x238] sm:$0xff] %v242_v7 }
  0x39 PF: > { %p581_p7 = scmp.ge.s32.totalorder %s638_s8, 1  ;;  %p248_p8 = scmp.lt.s32.totalorder %s638_s8, 5 }
  0x3b   : > { %p249_p9 = pnand %p581_p7, %p248_p8 }
  0x3c   : > { %s255_s22 = sand.u32 (!%p249_p9), 1, %s630_s6   ;;  %vm396_vm0 = vcmask (!%p249_p9), 1041408   ;;  %vm397_vm1 = vcmask (!%p249_p9), 1045508  }
  0x3d   : > { %252 = sbr.rel (%p249_p9) target bundleno = 114 (0x72), region = 43  ;;  %s870_s25 = sshll.u32 (!%p249_p9), %s255_s22, 6  ;;  %vm891_vm2 = vmor (!%p249_p9), %vm397_vm1, %vm396_vm0 }
  0x3e   : > { %s591_s23 = smul.u32 (!%p249_p9), 576, %s255_s22  ;;  %s896_s26 = scalar_lea.vmem (!%p249_p9), [#allocation3], %s870_s25 }
  0x40   : > { %s843_s24 = scalar_lea.vmem (!%p249_p9), [#allocation2], %s591_s23 }
  0x41   : > { %v276_v8 = vld [vmem:[%s843_s24] sm:$0xff] (!%p249_p9)  ;;  %v277_v14 = vld [vmem:[%s843_s24 + $0x8] sm:$0xff] (!%p249_p9)  ;;  %v278_v23 = vld [vmem:[%s843_s24 + $0x10] sm:$0xff] (!%p249_p9) }
  0x42   : > { %v284_v9 = vld [vmem:[%s843_s24 + $0x40] sm:$0xff] (!%p249_p9)  ;;  %v285_v15 = vld [vmem:[%s843_s24 + $0x48] sm:$0xff] (!%p249_p9)  ;;  %v286_v24 = vld [vmem:[%s843_s24 + $0x50] sm:$0xff] (!%p249_p9) }
  0x43   : > { %v292_v10 = vld [vmem:[%s843_s24 + $0x80] sm:$0xff] (!%p249_p9)  ;;  %v348_v11 = vmax.bf16 (!%p249_p9), %v284_v9, %v276_v8  ;;  %v293_v16 = vld [vmem:[%s843_s24 + $0x88] sm:$0xff] (!%p249_p9)  ;;  %v356_v18 = vmax.bf16 (!%p249_p9), %v285_v15, %v277_v14  ;;  %v294_v25 = vld [vmem:[%s843_s24 + $0x90] sm:$0xff] (!%p249_p9)  ;;  %v364_v28 = vmax.bf16 (!%p249_p9), %v286_v24, %v278_v23 }
  0x44   : > { %v300_v12 = vld [vmem:[%s843_s24 + $0xc0] sm:$0xff]  ;;  %v301_v21 = vld [vmem:[%s843_s24 + $0xc8] sm:$0xff]  ;;  %v302_v32 = vld [vmem:[%s843_s24 + $0xd0] sm:$0xff]  ;;  %s589_s27 = sshll.u32 (%p680_p5), %s575_s9, 4 }
  0x45   : > { %v349_v13 = vmax.bf16 %v348_v11, %v292_v10  ;;  %v308_v17 = vld [vmem:[%s843_s24 + $0x100] sm:$0xff]  ;;  %v357_v22 = vmax.bf16 %v356_v18, %v293_v16  ;;  %v309_v27 = vld [vmem:[%s843_s24 + $0x108] sm:$0xff]  ;;  %v365_v34 = vmax.bf16 %v364_v28, %v294_v25  ;;  %v279_v35 = vld [vmem:[%s843_s24 + $0x18] sm:$0xff]  ;;  %s487_s30 = scalar_lea.vmem (%p680_p5), %s1000_s1, %s589_s27 }
  0x46   : > { %v316_v19 = vld [vmem:[%s843_s24 + $0x140] sm:$0xff]  ;;  %v317_v30 = vld [vmem:[%s843_s24 + $0x148] sm:$0xff]  ;;  %v287_v36 = vld [vmem:[%s843_s24 + $0x58] sm:$0xff] }
  0x47   : > { %v350_v20 = vmax.bf16 %v349_v13, %v300_v12  ;;  %v324_v29 = vld [vmem:[%s843_s24 + $0x180] sm:$0xff]  ;;  %v358_v31 = vmax.bf16 %v357_v22, %v301_v21  ;;  %v295_v37 = vld [vmem:[%s843_s24 + $0x98] sm:$0xff]  ;;  %v310_v41 = vld [vmem:[%s843_s24 + $0x110] sm:$0xff]  ;;  %v372_v42 = vmax.bf16 %v287_v36, %v279_v35  ;;  %v366_v46 = vmax.bf16 %v365_v34, %v302_v32 }
  0x48   : > { %v332_v38 = vld [vmem:[%s843_s24 + $0x1c0] sm:$0xff]  ;;  %v325_v44 = vld [vmem:[%s843_s24 + $0x188] sm:$0xff]  ;;  %v318_v45 = vld [vmem:[%s843_s24 + $0x150] sm:$0xff] }
  0x49   : > { %v351_v26 = vmax.bf16 %v350_v20, %v308_v17  ;;  %v340_v39 = vld [vmem:[%s843_s24 + $0x200] sm:$0xff]  ;;  %v359_v40 = vmax.bf16 %v358_v31, %v309_v27  ;;  %v303_v47 = vld [vmem:[%s843_s24 + $0xd8] sm:$0xff]  ;;  %v373_v49 = vmax.bf16 %v372_v42, %v295_v37  ;;  %v333_v54 = vld [vmem:[%s843_s24 + $0x1c8] sm:$0xff]  ;;  %v367_v56 = vmax.bf16 %v366_v46, %v310_v41 }
  0x4a   : > { %v280_v50 = vld [vmem:[%s843_s24 + $0x20] sm:$0xff]  ;;  %v341_v55 = vld [vmem:[%s843_s24 + $0x208] sm:$0xff]  ;;  %v311_v57 = vld [vmem:[%s843_s24 + $0x118] sm:$0xff] }
  0x4b   : > { %v352_v33 = vmax.bf16 %v351_v26, %v316_v19  ;;  %v360_v48 = vmax.bf16 %v359_v40, %v317_v30  ;;  %v288_v51 = vld [vmem:[%s843_s24 + $0x60] sm:$0xff]  ;;  %v326_v60 = vld [vmem:[%s843_s24 + $0x190] sm:$0xff]  ;;  %v319_v61 = vld [vmem:[%s843_s24 + $0x158] sm:$0xff]  ;;  %v374_v62 = vmax.bf16 %v373_v49, %v303_v47  ;;  %v368_v1 = vmax.bf16 %v367_v56, %v318_v45 }
  0x4c   : > { %v296_v52 = vld [vmem:[%s843_s24 + $0xa0] sm:$0xff]  ;;  %v380_v58 = vmax.bf16 %v288_v51, %v280_v50  ;;  %v281_v3 = vld [vmem:[%s843_s24 + $0x28] sm:$0xff]  ;;  %v334_v7 = vld [vmem:[%s843_s24 + $0x1d0] sm:$0xff] }
  0x4d   : > { %v353_v43 = vmax.bf16 %v352_v33, %v324_v29  ;;  %v361_v59 = vmax.bf16 %v360_v48, %v325_v44  ;;  %v304_v63 = vld [vmem:[%s843_s24 + $0xe0] sm:$0xff]  ;;  %v289_v4 = vld [vmem:[%s843_s24 + $0x68] sm:$0xff]  ;;  %v375_v8 = vmax.bf16 %v374_v62, %v311_v57  ;;  %v342_v12 = vld [vmem:[%s843_s24 + $0x210] sm:$0xff]  ;;  %v369_v13 = vmax.bf16 %v368_v1, %v326_v60 }
  0x4e   : > { %v381_v2 = vmax.bf16 %v380_v58, %v296_v52  ;;  %v297_v5 = vld [vmem:[%s843_s24 + $0xa8] sm:$0xff]  ;;  %v312_v9 = vld [vmem:[%s843_s24 + $0x120] sm:$0xff]  ;;  %v388_v10 = vmax.bf16 %v289_v4, %v281_v3  ;;  %v327_v14 = vld [vmem:[%s843_s24 + $0x198] sm:$0xff] }
  0x4f   : > { %v354_v53 = vmax.bf16 %v353_v43, %v332_v38  ;;  %v362_v6 = vmax.bf16 %v361_v59, %v333_v54  ;;  %v305_v16 = vld [vmem:[%s843_s24 + $0xe8] sm:$0xff]  ;;  %v376_v18 = vmax.bf16 %v375_v8, %v319_v61  ;;  %v320_v19 = vld [vmem:[%s843_s24 + $0x160] sm:$0xff]  ;;  %v282_v21 = vld [vmem:[%s843_s24 + $0x30] sm:$0x33]  ;;  %v370_v23 = vmax.bf16 %v369_v13, %v334_v7 }
  0x50   : > { %v382_v15 = vmax.bf16 %v381_v2, %v304_v63  ;;  %v389_v20 = vmax.bf16 %v388_v10, %v297_v5  ;;  %v290_v22 = vld [vmem:[%s843_s24 + $0x70] sm:$0x33]  ;;  %v335_v24 = vld [vmem:[%s843_s24 + $0x1d8] sm:$0xff]  ;;  %v313_v26 = vld [vmem:[%s843_s24 + $0x128] sm:$0xff]  ;;  %v401_v36 = vsel %vm891_vm2, %v282_v21, 4286644096 }
  0x51   : > { %v355_v0 = vmax.bf16 %v354_v53, %v340_v39  ;;  %v363_v17 = vmax.bf16 %v362_v6, %v341_v55  ;;  %v298_v27 = vld [vmem:[%s843_s24 + $0xb0] sm:$0x33]  ;;  %v377_v28 = vmax.bf16 %v376_v18, %v327_v14  ;;  %v328_v29 = vld [vmem:[%s843_s24 + $0x1a0] sm:$0xff]  ;;  %v371_v32 = vmax.bf16 %v370_v23, %v342_v12  ;;  %v343_v33 = vld [vmem:[%s843_s24 + $0x218] sm:$0xff] }
  0x52   : > { %v383_v25 = vmax.bf16 %v382_v15, %v312_v9  ;;  %v390_v30 = vmax.bf16 %v389_v20, %v305_v16  ;;  %v306_v31 = vld [vmem:[%s843_s24 + $0xf0] sm:$0x33]  ;;  %v321_v35 = vld [vmem:[%s843_s24 + $0x168] sm:$0xff]  ;;  %v404_v37 = vsel %vm891_vm2, %v290_v22, 4286644096  ;;  %v336_v39 = vld [vmem:[%s843_s24 + $0x1e0] sm:$0xff] }
  0x53   : > { %470 = vst [vmem:[%s896_s26] sm:$0xff] %v355_v0  ;;  %471 = vst [vmem:[%s896_s26 + $0x8] sm:$0xff] %v363_v17  ;;  %v378_v38 = vmax.bf16 %v377_v28, %v335_v24  ;;  %v314_v41 = vld [vmem:[%s843_s24 + $0x130] sm:$0x33]  ;;  %v406_v42 = vmax.bf16 %v404_v37, %v401_v36  ;;  %v408_v43 = vsel %vm891_vm2, %v298_v27, 4286644096  ;;  %v344_v44 = vld [vmem:[%s843_s24 + $0x220] sm:$0xff] }
  0x54   : > { %v384_v34 = vmax.bf16 %v383_v25, %v320_v19  ;;  %v391_v40 = vmax.bf16 %v390_v30, %v313_v26  ;;  %472 = vst [vmem:[%s896_s26 + $0x10] sm:$0xff] %v371_v32  ;;  %v329_v46 = vld [vmem:[%s843_s24 + $0x1a8] sm:$0xff]  ;;  %v322_v47 = vld [vmem:[%s843_s24 + $0x170] sm:$0x33]  ;;  %v412_v48 = vsel %vm891_vm2, %v306_v31, 4286644096 }
  0x55   : > { %v379_v49 = vmax.bf16 %v378_v38, %v343_v33  ;;  %v410_v51 = vmax.bf16 %v408_v43, %v406_v42  ;;  %v283_v52 = vld [vmem:[%s843_s24 + $0x38] sm:$0x33]  ;;  %v337_v56 = vld [vmem:[%s843_s24 + $0x1e8] sm:$0xff]  ;;  %v416_v58 = vsel %vm891_vm2, %v314_v41, 4286644096 }
  0x56   : > { %v385_v45 = vmax.bf16 %v384_v34, %v328_v29  ;;  %v392_v50 = vmax.bf16 %v391_v40, %v321_v35  ;;  %v291_v53 = vld [vmem:[%s843_s24 + $0x78] sm:$0x33]  ;;  %v345_v57 = vld [vmem:[%s843_s24 + $0x228] sm:$0xff]  ;;  %v330_v60 = vld [vmem:[%s843_s24 + $0x1b0] sm:$0x33] }
  0x57   : > { %v299_v54 = vld [vmem:[%s843_s24 + $0xb8] sm:$0x33]  ;;  %473 = vst [vmem:[%s896_s26 + $0x18] sm:$0xff] %v379_v49  ;;  %v414_v61 = vmax.bf16 %v412_v48, %v410_v51  ;;  %v420_v62 = vsel %vm891_vm2, %v322_v47, 4286644096 }
  0x58   : > { %v386_v55 = vmax.bf16 %v385_v45, %v336_v39  ;;  %v393_v59 = vmax.bf16 %v392_v50, %v329_v46  ;;  %v307_v63 = vld [vmem:[%s843_s24 + $0xf8] sm:$0x33]  ;;  %v436_v1 = vsel %vm891_vm2, %v283_v52, 4286644096  ;;  %v439_v2 = vsel %vm891_vm2, %v291_v53, 4286644096 }
  0x59   : > { %v443_v3 = vsel %vm891_vm2, %v299_v54, 4286644096  ;;  %v338_v5 = vld [vmem:[%s843_s24 + $0x1f0] sm:$0x33]  ;;  %v418_v6 = vmax.bf16 %v416_v58, %v414_v61  ;;  %v315_v7 = vld [vmem:[%s843_s24 + $0x138] sm:$0x33]  ;;  %v441_v8 = vmax.bf16 %v439_v2, %v436_v1 }
  0x5a   : > { %v387_v0 = vmax.bf16 %v386_v55, %v344_v44  ;;  %v394_v4 = vmax.bf16 %v393_v59, %v337_v56  ;;  %v424_v9 = vsel %vm891_vm2, %v330_v60, 4286644096  ;;  %v447_v10 = vsel %vm891_vm2, %v307_v63, 4286644096  ;;  %v346_v13 = vld [vmem:[%s843_s24 + $0x230] sm:$0x33] }
  0x5b   : > { %v422_v14 = vmax.bf16 %v420_v62, %v418_v6  ;;  %v323_v15 = vld [vmem:[%s843_s24 + $0x178] sm:$0x33]  ;;  %v445_v16 = vmax.bf16 %v443_v3, %v441_v8  ;;  %v428_v17 = vsel %vm891_vm2, %v338_v5, 4286644096  ;;  %v451_v18 = vsel %vm891_vm2, %v315_v7, 4286644096 }
  0x5c   : > { %474 = vst [vmem:[%s896_s26 + $0x20] sm:$0xff] %v387_v0  ;;  %v395_v12 = vmax.bf16 %v394_v4, %v345_v57  ;;  %v331_v20 = vld [vmem:[%s843_s24 + $0x1b8] sm:$0x33]  ;;  %v432_v22 = vsel %vm891_vm2, %v346_v13, 4286644096  ;;  %v500_v36 = vld [vmem:[%s896_s26] sm:$0xff] (%p680_p5) }
  0x5d   : > { %v426_v19 = vmax.bf16 %v424_v9, %v422_v14  ;;  %v449_v21 = vmax.bf16 %v447_v10, %v445_v16  ;;  %v455_v23 = vsel %vm891_vm2, %v323_v15, 4286644096  ;;  %v339_v25 = vld [vmem:[%s843_s24 + $0x1f8] sm:$0x33]  ;;  %v459_v27 = vsel %vm891_vm2, %v331_v20, 4286644096  ;;  %501 = vst [vmem:[%s487_s30] sm:$0xff] (%p680_p5), %v500_v36 }
  0x5e   : > { %475 = vst [vmem:[%s896_s26 + $0x28] sm:$0xff] %v395_v12  ;;  %v347_v29 = vld [vmem:[%s843_s24 + $0x238] sm:$0x33]  ;;  %v463_v31 = vsel %vm891_vm2, %v339_v25, 4286644096  ;;  %v502_v11 = vld [vmem:[%s896_s26 + $0x8] sm:$0xff] (%p680_p5) }
  0x5f   : > { %v430_v24 = vmax.bf16 %v428_v17, %v426_v19  ;;  %v453_v26 = vmax.bf16 %v451_v18, %v449_v21  ;;  %v467_v33 = vsel %vm891_vm2, %v347_v29, 4286644096  ;;  %v504_v37 = vld [vmem:[%s896_s26 + $0x10] sm:$0xff] (%p680_p5)  ;;  %v506_v38 = vld [vmem:[%s896_s26 + $0x18] sm:$0xff] (%p680_p5)  ;;  %503 = vst [vmem:[%s487_s30 + $0x8] sm:$0xff] (%p680_p5), %v502_v11 }
  0x60   : > { %505 = vst [vmem:[%s487_s30 + $0x40] sm:$0xff] (%p680_p5), %v504_v37  ;;  %507 = vst [vmem:[%s487_s30 + $0x48] sm:$0xff] (%p680_p5), %v506_v38 }
  0x61   : > { %v434_v28 = vmax.bf16 %v432_v22, %v430_v24  ;;  %v457_v30 = vmax.bf16 %v455_v23, %v453_v26 }
  0x63   : > { %476 = vst [vmem:[%s896_s26 + $0x30] sm:$0x33] %v434_v28  ;;  %v461_v32 = vmax.bf16 %v459_v27, %v457_v30  ;;  %484 = sbr.rel (!%p680_p5) target bundleno = 114 (0x72), region = 51  ;;  %v508_v39 = vld [vmem:[%s896_s26 + $0x20] sm:$0xff] (%p680_p5) }
  0x64   : > { %509 = vst [vmem:[%s487_s30 + $0x80] sm:$0xff] (%p680_p5), %v508_v39 }
  0x65   : > { %v465_v34 = vmax.bf16 %v463_v31, %v461_v32  ;;  %v510_v40 = vld [vmem:[%s896_s26 + $0x28] sm:$0xff] (%p680_p5) }
  0x66   : > { %511 = vst [vmem:[%s487_s30 + $0x88] sm:$0xff] (%p680_p5), %v510_v40 }
  0x67   : > { %v469_v35 = vmax.bf16 %v467_v33, %v465_v34 }
  0x69   : > { %477 = vst [vmem:[%s896_s26 + $0x38] sm:$0x33] %v469_v35 }
  0x6a   : > { %v512_v41 = vld [vmem:[%s896_s26 + $0x30] sm:$0xff] }
  0x6b   : > { %513 = vst [vmem:[%s487_s30 + $0xc0] sm:$0xff] %v512_v41 }
  0x70   : > { %v514_v42 = vld [vmem:[%s896_s26 + $0x38] sm:$0xff] }
  0x71   : > { %515 = vst [vmem:[%s487_s30 + $0xc8] sm:$0xff] %v514_v42 }
  0x72 PF: > { %p8_p10 = scmp.ge.s32.totalorder %s667_s10, 6   ;;  %s1004_s6 = smov %s634_s7 }
  0x73   : > { %s1005_s7 = smov %s678_s13  ;;  %s1006_s8 = smov %s667_s10 }
  0x74   :  { %10 = sbr.rel (!%p8_p10) target bundleno = 2 (0x2), region = 105 }

// kernel: rnet_forward.7
= control target key start
LH: loop header
LB: loop body
LE: loop exit
PB: predicated region body
PF: predicated region fallthrough
CT: control target
= control target key end

     0   :  { %s1993_s0 = inlined_call_operand.vmem [shape: bf16[256,1536], index: 0, kind: input, shape index: {}]   ;;  %s1994_s1 = inlined_call_operand.vmem [shape: bf16[48,256], index: 1, kind: input, shape index: {}]   ;;  %s1995_s2 = inlined_call_operand.vmem [shape: f32[48,1], index: 2, kind: input, shape index: {}]   ;;  %s1996_s3 = inlined_call_operand.vmem [shape: f32[48,1], index: 3, kind: input, shape index: {}]   ;;  %s1997_s4 = inlined_call_operand.<no memory space> [shape: f32[1], index: 4, kind: input, shape index: {}]   ;;  %s1998_s5 = inlined_call_operand.vmem [shape: bf16[48,1536], index: 5, kind: output, shape index: {}]  }
   0x1   :  { %10 = sst [smem:[#allocation2]] %s1997_s4 }
   0x2   :  { %s1597_s20 = smov 0   ;;  %s1599_s21 = smov 0  }
   0x3   :  { %s1601_s22 = smov 0  }
   0x4 LB: > { %s1297_s4 = sadd.s32 4294967295, %s1561_s22   ;;  %s1614_s23 = sadd.s32 1, %s1561_s22   ;;  %s1561_s22 = sphi %s1601_s22, %s2002_s22   ;;  %s1557_s21 = sphi %s1599_s21, %s2001_s21   ;;  %s1553_s20 = sphi %s1597_s20, %s2000_s20  }
   0x5   : > { %s20_s24 = ssub.s32 %s1561_s22, %s1614_s23  ;;  %s23_s25 = sadd.s32 1, %s1557_s21 }
   0x6   : > { %p21_p0 = scmp.eq.s32.totalorder %s20_s24, 0  ;;  %p30_p1 = scmp.ne.s32.totalorder %s1557_s21, %s1553_s20 }
   0x7   : > { %p31_p2 = scmp.eq.s32.totalorder %s1561_s22, 0  ;;  %p144_p3 = scmp.eq.s32.totalorder %s1297_s4, 2 }
   0x8   : > { %s1625_s26 = scalar_select %p21_p0, %s1557_s21, %s23_s25  }
   0x9   : > { %p32_p4 = por %p31_p2, %p30_p1  ;;  %p1627_p5 = por %p144_p3, %p30_p1 }
   0xa   : > { %p1300_p6 = scmp.ge.s32.totalorder %s1561_s22, 3 }
   0xc   : > { %178 = sbr.rel (%p1300_p6) target bundleno = 55 (0x37), region = 32 }
  0x13   : > { %181 = sbr.rel (!%p32_p4) target bundleno = 55 (0x37), region = 36  ;;  %s183_s28 = sand.u32 (%p32_p4), 1, %s1557_s21  }
  0x14   : > { %s1392_s29 = sshll.u32 (%p32_p4), %s1561_s22, 4  ;;  %s1301_s30 = sshll.u32 (%p32_p4), %s183_s28, 9 }
  0x15   : > { %s1637_s8 = scalar_lea.vmem (%p32_p4), %s1993_s0, %s1392_s29  ;;  %s1642_s9 = scalar_lea.vmem (%p32_p4), [#allocation3], %s1301_s30 }
  0x16   : > { %v201_v0 = vld [vmem:[%s1637_s8] sm:$0xff] (%p32_p4)  ;;  %v203_v1 = vld [vmem:[%s1637_s8 + $0x8] sm:$0xff] (%p32_p4)  ;;  %v205_v2 = vld [vmem:[%s1637_s8 + $0x30] sm:$0xff] (%p32_p4) }
  0x17   : > { %202 = vst [vmem:[%s1642_s9] sm:$0xff] (%p32_p4), %v201_v0  ;;  %204 = vst [vmem:[%s1642_s9 + $0x8] sm:$0xff] (%p32_p4), %v203_v1  ;;  %v207_v3 = vld [vmem:[%s1637_s8 + $0x38] sm:$0xff] (%p32_p4)  ;;  %v209_v4 = vld [vmem:[%s1637_s8 + $0x60] sm:$0xff] (%p32_p4) }
  0x18   : > { %206 = vst [vmem:[%s1642_s9 + $0x10] sm:$0xff] (%p32_p4), %v205_v2  ;;  %v211_v5 = vld [vmem:[%s1637_s8 + $0x68] sm:$0xff] (%p32_p4)  ;;  %208 = vst [vmem:[%s1642_s9 + $0x18] sm:$0xff] (%p32_p4), %v207_v3  ;;  %v213_v6 = vld [vmem:[%s1637_s8 + $0x90] sm:$0xff] (%p32_p4) }
  0x19   : > { %210 = vst [vmem:[%s1642_s9 + $0x20] sm:$0xff] (%p32_p4), %v209_v4  ;;  %212 = vst [vmem:[%s1642_s9 + $0x28] sm:$0xff] (%p32_p4), %v211_v5  ;;  %v215_v7 = vld [vmem:[%s1637_s8 + $0x98] sm:$0xff] (%p32_p4)  ;;  %v217_v8 = vld [vmem:[%s1637_s8 + $0xc0] sm:$0xff] (%p32_p4) }
  0x1a   : > { %214 = vst [vmem:[%s1642_s9 + $0x30] sm:$0xff] %v213_v6  ;;  %216 = vst [vmem:[%s1642_s9 + $0x38] sm:$0xff] %v215_v7  ;;  %v219_v9 = vld [vmem:[%s1637_s8 + $0xc8] sm:$0xff]  ;;  %v221_v10 = vld [vmem:[%s1637_s8 + $0xf0] sm:$0xff] }
  0x1b   : > { %218 = vst [vmem:[%s1642_s9 + $0x40] sm:$0xff] %v217_v8  ;;  %v223_v11 = vld [vmem:[%s1637_s8 + $0xf8] sm:$0xff]  ;;  %220 = vst [vmem:[%s1642_s9 + $0x48] sm:$0xff] %v219_v9  ;;  %v225_v12 = vld [vmem:[%s1637_s8 + $0x120] sm:$0xff] }
  0x1c   : > { %222 = vst [vmem:[%s1642_s9 + $0x50] sm:$0xff] %v221_v10  ;;  %224 = vst [vmem:[%s1642_s9 + $0x58] sm:$0xff] %v223_v11  ;;  %v227_v13 = vld [vmem:[%s1637_s8 + $0x128] sm:$0xff]  ;;  %v229_v14 = vld [vmem:[%s1637_s8 + $0x150] sm:$0xff] }
  0x1d   : > { %226 = vst [vmem:[%s1642_s9 + $0x60] sm:$0xff] %v225_v12  ;;  %228 = vst [vmem:[%s1642_s9 + $0x68] sm:$0xff] %v227_v13  ;;  %v231_v15 = vld [vmem:[%s1637_s8 + $0x158] sm:$0xff]  ;;  %v233_v16 = vld [vmem:[%s1637_s8 + $0x180] sm:$0xff] }
  0x1e   : > { %230 = vst [vmem:[%s1642_s9 + $0x70] sm:$0xff] %v229_v14  ;;  %v235_v17 = vld [vmem:[%s1637_s8 + $0x188] sm:$0xff]  ;;  %232 = vst [vmem:[%s1642_s9 + $0x78] sm:$0xff] %v231_v15  ;;  %v237_v18 = vld [vmem:[%s1637_s8 + $0x1b0] sm:$0xff] }
  0x1f   : > { %234 = vst [vmem:[%s1642_s9 + $0x80] sm:$0xff] %v233_v16  ;;  %236 = vst [vmem:[%s1642_s9 + $0x88] sm:$0xff] %v235_v17  ;;  %v239_v19 = vld [vmem:[%s1637_s8 + $0x1b8] sm:$0xff]  ;;  %v241_v20 = vld [vmem:[%s1637_s8 + $0x1e0] sm:$0xff] }
  0x20   : > { %238 = vst [vmem:[%s1642_s9 + $0x90] sm:$0xff] %v237_v18  ;;  %240 = vst [vmem:[%s1642_s9 + $0x98] sm:$0xff] %v239_v19  ;;  %v243_v21 = vld [vmem:[%s1637_s8 + $0x1e8] sm:$0xff]  ;;  %v245_v22 = vld [vmem:[%s1637_s8 + $0x210] sm:$0xff] }
  0x21   : > { %242 = vst [vmem:[%s1642_s9 + $0xa0] sm:$0xff] %v241_v20  ;;  %v247_v23 = vld [vmem:[%s1637_s8 + $0x218] sm:$0xff]  ;;  %244 = vst [vmem:[%s1642_s9 + $0xa8] sm:$0xff] %v243_v21  ;;  %v249_v24 = vld [vmem:[%s1637_s8 + $0x240] sm:$0xff] }
  0x22   : > { %246 = vst [vmem:[%s1642_s9 + $0xb0] sm:$0xff] %v245_v22  ;;  %248 = vst [vmem:[%s1642_s9 + $0xb8] sm:$0xff] %v247_v23  ;;  %v251_v25 = vld [vmem:[%s1637_s8 + $0x248] sm:$0xff]  ;;  %v253_v26 = vld [vmem:[%s1637_s8 + $0x270] sm:$0xff] }
  0x23   : > { %250 = vst [vmem:[%s1642_s9 + $0xc0] sm:$0xff] %v249_v24  ;;  %252 = vst [vmem:[%s1642_s9 + $0xc8] sm:$0xff] %v251_v25  ;;  %v255_v27 = vld [vmem:[%s1637_s8 + $0x278] sm:$0xff]  ;;  %v257_v28 = vld [vmem:[%s1637_s8 + $0x2a0] sm:$0xff] }
  0x24   : > { %254 = vst [vmem:[%s1642_s9 + $0xd0] sm:$0xff] %v253_v26  ;;  %v259_v29 = vld [vmem:[%s1637_s8 + $0x2a8] sm:$0xff]  ;;  %256 = vst [vmem:[%s1642_s9 + $0xd8] sm:$0xff] %v255_v27  ;;  %v261_v30 = vld [vmem:[%s1637_s8 + $0x2d0] sm:$0xff] }
  0x25   : > { %258 = vst [vmem:[%s1642_s9 + $0xe0] sm:$0xff] %v257_v28  ;;  %260 = vst [vmem:[%s1642_s9 + $0xe8] sm:$0xff] %v259_v29  ;;  %v263_v31 = vld [vmem:[%s1637_s8 + $0x2d8] sm:$0xff]  ;;  %v265_v32 = vld [vmem:[%s1637_s8 + $0x300] sm:$0xff] }
  0x26   : > { %262 = vst [vmem:[%s1642_s9 + $0xf0] sm:$0xff] %v261_v30  ;;  %264 = vst [vmem:[%s1642_s9 + $0xf8] sm:$0xff] %v263_v31  ;;  %v267_v33 = vld [vmem:[%s1637_s8 + $0x308] sm:$0xff]  ;;  %v269_v34 = vld [vmem:[%s1637_s8 + $0x330] sm:$0xff] }
  0x27   : > { %266 = vst [vmem:[%s1642_s9 + $0x100] sm:$0xff] %v265_v32  ;;  %v271_v35 = vld [vmem:[%s1637_s8 + $0x338] sm:$0xff]  ;;  %268 = vst [vmem:[%s1642_s9 + $0x108] sm:$0xff] %v267_v33  ;;  %v273_v36 = vld [vmem:[%s1637_s8 + $0x360] sm:$0xff] }
  0x28   : > { %270 = vst [vmem:[%s1642_s9 + $0x110] sm:$0xff] %v269_v34  ;;  %272 = vst [vmem:[%s1642_s9 + $0x118] sm:$0xff] %v271_v35  ;;  %v275_v37 = vld [vmem:[%s1637_s8 + $0x368] sm:$0xff]  ;;  %v277_v38 = vld [vmem:[%s1637_s8 + $0x390] sm:$0xff] }
  0x29   : > { %274 = vst [vmem:[%s1642_s9 + $0x120] sm:$0xff] %v273_v36  ;;  %276 = vst [vmem:[%s1642_s9 + $0x128] sm:$0xff] %v275_v37  ;;  %v279_v39 = vld [vmem:[%s1637_s8 + $0x398] sm:$0xff]  ;;  %v281_v40 = vld [vmem:[%s1637_s8 + $0x3c0] sm:$0xff] }
  0x2a   : > { %278 = vst [vmem:[%s1642_s9 + $0x130] sm:$0xff] %v277_v38  ;;  %v283_v41 = vld [vmem:[%s1637_s8 + $0x3c8] sm:$0xff]  ;;  %280 = vst [vmem:[%s1642_s9 + $0x138] sm:$0xff] %v279_v39  ;;  %v285_v42 = vld [vmem:[%s1637_s8 + $0x3f0] sm:$0xff] }
  0x2b   : > { %282 = vst [vmem:[%s1642_s9 + $0x140] sm:$0xff] %v281_v40  ;;  %284 = vst [vmem:[%s1642_s9 + $0x148] sm:$0xff] %v283_v41  ;;  %v287_v43 = vld [vmem:[%s1637_s8 + $0x3f8] sm:$0xff]  ;;  %v289_v44 = vld [vmem:[%s1637_s8 + $0x420] sm:$0xff] }
  0x2c   : > { %286 = vst [vmem:[%s1642_s9 + $0x150] sm:$0xff] %v285_v42  ;;  %288 = vst [vmem:[%s1642_s9 + $0x158] sm:$0xff] %v287_v43  ;;  %v291_v45 = vld [vmem:[%s1637_s8 + $0x428] sm:$0xff]  ;;  %v293_v46 = vld [vmem:[%s1637_s8 + $0x450] sm:$0xff] }
  0x2d   : > { %290 = vst [vmem:[%s1642_s9 + $0x160] sm:$0xff] %v289_v44  ;;  %v295_v47 = vld [vmem:[%s1637_s8 + $0x458] sm:$0xff]  ;;  %292 = vst [vmem:[%s1642_s9 + $0x168] sm:$0xff] %v291_v45  ;;  %v297_v48 = vld [vmem:[%s1637_s8 + $0x480] sm:$0xff] }
  0x2e   : > { %294 = vst [vmem:[%s1642_s9 + $0x170] sm:$0xff] %v293_v46  ;;  %296 = vst [vmem:[%s1642_s9 + $0x178] sm:$0xff] %v295_v47  ;;  %v299_v49 = vld [vmem:[%s1637_s8 + $0x488] sm:$0xff]  ;;  %v301_v50 = vld [vmem:[%s1637_s8 + $0x4b0] sm:$0xff] }
  0x2f   : > { %298 = vst [vmem:[%s1642_s9 + $0x180] sm:$0xff] %v297_v48  ;;  %300 = vst [vmem:[%s1642_s9 + $0x188] sm:$0xff] %v299_v49  ;;  %v303_v51 = vld [vmem:[%s1637_s8 + $0x4b8] sm:$0xff]  ;;  %v305_v52 = vld [vmem:[%s1637_s8 + $0x4e0] sm:$0xff] }
  0x30   : > { %302 = vst [vmem:[%s1642_s9 + $0x190] sm:$0xff] %v301_v50  ;;  %v307_v53 = vld [vmem:[%s1637_s8 + $0x4e8] sm:$0xff]  ;;  %304 = vst [vmem:[%s1642_s9 + $0x198] sm:$0xff] %v303_v51  ;;  %v309_v54 = vld [vmem:[%s1637_s8 + $0x510] sm:$0xff] }
  0x31   : > { %306 = vst [vmem:[%s1642_s9 + $0x1a0] sm:$0xff] %v305_v52  ;;  %308 = vst [vmem:[%s1642_s9 + $0x1a8] sm:$0xff] %v307_v53  ;;  %v311_v55 = vld [vmem:[%s1637_s8 + $0x518] sm:$0xff]  ;;  %v313_v56 = vld [vmem:[%s1637_s8 + $0x540] sm:$0xff] }
  0x32   : > { %310 = vst [vmem:[%s1642_s9 + $0x1b0] sm:$0xff] %v309_v54  ;;  %312 = vst [vmem:[%s1642_s9 + $0x1b8] sm:$0xff] %v311_v55  ;;  %v315_v57 = vld [vmem:[%s1637_s8 + $0x548] sm:$0xff]  ;;  %v317_v58 = vld [vmem:[%s1637_s8 + $0x570] sm:$0xff] }
  0x33   : > { %314 = vst [vmem:[%s1642_s9 + $0x1c0] sm:$0xff] %v313_v56  ;;  %v319_v59 = vld [vmem:[%s1637_s8 + $0x578] sm:$0xff]  ;;  %316 = vst [vmem:[%s1642_s9 + $0x1c8] sm:$0xff] %v315_v57  ;;  %v321_v60 = vld [vmem:[%s1637_s8 + $0x5a0] sm:$0xff] }
  0x34   : > { %318 = vst [vmem:[%s1642_s9 + $0x1d0] sm:$0xff] %v317_v58  ;;  %320 = vst [vmem:[%s1642_s9 + $0x1d8] sm:$0xff] %v319_v59  ;;  %v323_v61 = vld [vmem:[%s1637_s8 + $0x5a8] sm:$0xff]  ;;  %v325_v62 = vld [vmem:[%s1637_s8 + $0x5d0] sm:$0xff] }
  0x35   : > { %322 = vst [vmem:[%s1642_s9 + $0x1e0] sm:$0xff] %v321_v60  ;;  %324 = vst [vmem:[%s1642_s9 + $0x1e8] sm:$0xff] %v323_v61  ;;  %v327_v63 = vld [vmem:[%s1637_s8 + $0x5d8] sm:$0xff] }
  0x36   : > { %326 = vst [vmem:[%s1642_s9 + $0x1f0] sm:$0xff] %v325_v62  ;;  %328 = vst [vmem:[%s1642_s9 + $0x1f8] sm:$0xff] %v327_v63 }
  0x37 PF: > { %p1304_p7 = scmp.ge.s32.totalorder %s1561_s22, 1  ;;  %p333_p8 = scmp.lt.s32.totalorder %s1561_s22, 4 }
  0x39   : > { %p334_p9 = pnand %p1304_p7, %p333_p8 }
  0x3a   : > { %s340_s10 = sand.u32 (!%p334_p9), 1, %s1553_s20   ;;  %v1532_v0 = vld [vmem:[%s1994_s1 + $0x4] ss:$8 sps:$4 sm:$0xff] (!%p334_p9)   ;;  %v1563_v1 = vmov (!%p334_p9), 0   ;;  %v916_v48 = vld [vmem:[%s1995_s2 + $0x10] sm:$0xff] (!%p334_p9)  ;;  %v917_v54 = vld [vmem:[%s1995_s2 + $0x18] sm:$0xff] (!%p334_p9) }
  0x3b   : > { %337 = sbr.rel (%p334_p9) target bundleno = 386 (0x182), region = 59  ;;  %s1305_s11 = sshll.u32 (!%p334_p9), %s340_s10, 9  ;;  %1433 = vset.pattern.permute.xlu1 (!%p334_p9), %v1563_v1  ;;  %1432 = vset.pattern.permute.xlu0 (!%p334_p9), %v1563_v1  ;;  %v914_v51 = vld [vmem:[%s1995_s2] sm:$0xff] (!%p334_p9)  ;;  %v915_v55 = vld [vmem:[%s1995_s2 + $0x8] sm:$0xff] (!%p334_p9) }
  0x3c   : > { %s1777_s14 = scalar_lea.vmem (!%p334_p9), [#allocation3], %s1305_s11  ;;  %820 = vmatprep.mubr.bf16.mxu0 (!%p334_p9), %v1532_v0  ;;  %883 = vmatprep.mubr.bf16.mxu1 (!%p334_p9), %v1532_v0  ;;  %v919_v60 = vld [vmem:[%s1995_s2 + $0x28] sm:$0xff] (!%p334_p9)  ;;  %v918_v61 = vld [vmem:[%s1995_s2 + $0x20] sm:$0xff] (!%p334_p9)  ;;  %s1034_s13 = sld [smem:[#allocation2]] (!%p334_p9) }
  0x3d   : > { %v1434_v2 = vld [vmem:[%s1777_s14 + $0x4] ss:$16 sps:$4 sm:$0xff] (!%p334_p9)   ;;  %v1436_v3 = vld [vmem:[%s1777_s14 + $0xc] ss:$16 sps:$4 sm:$0xff] (!%p334_p9)   ;;  %v1438_v4 = vld [vmem:[%s1777_s14] ss:$16 sps:$4 sm:$0xff] (!%p334_p9)   ;;  %932 = vperm.xlu1 (!%p334_p9), %1433, %v916_v48   ;;  %922 = vperm.xlu0 (!%p334_p9), %1432, %v914_v51  }
  0x3e   : > { %788 = vmatprep.subr.bf16.mxu0 (!%p334_p9), %v1434_v2  ;;  %v1439_v5 = vld [vmem:[%s1777_s14 + $0x8] ss:$16 sps:$4 sm:$0xff] (!%p334_p9)   ;;  %851 = vmatprep.subr.bf16.mxu1 (!%p334_p9), %v1436_v3  ;;  %v1440_v6 = vld [vmem:[%s1777_s14 + $0x24] ss:$16 sps:$4 sm:$0xff] (!%p334_p9)   ;;  %v1442_v7 = vld [vmem:[%s1777_s14 + $0x2c] ss:$16 sps:$4 sm:$0xff] (!%p334_p9)  }
  0x3f   : > { %789 = vmatpush1.bf16.msra.mxu0 (!%p334_p9), %v1438_v4  ;;  %852 = vmatpush1.bf16.msra.mxu1 (!%p334_p9), %v1439_v5  ;;  %v1444_v8 = vld [vmem:[%s1777_s14 + $0x20] ss:$16 sps:$4 sm:$0xff] (!%p334_p9)   ;;  %v1445_v9 = vld [vmem:[%s1777_s14 + $0x28] ss:$16 sps:$4 sm:$0xff] (!%p334_p9)   ;;  %v1446_v10 = vld [vmem:[%s1777_s14 + $0x44] ss:$16 sps:$4 sm:$0xff] (!%p334_p9)  }
  0x40   : > { %790 = vmatprep.subr.bf16.mxu0 (!%p334_p9), %v1440_v6  ;;  %853 = vmatprep.subr.bf16.mxu1 (!%p334_p9), %v1442_v7  ;;  %v1448_v11 = vld [vmem:[%s1777_s14 + $0x4c] ss:$16 sps:$4 sm:$0xff] (!%p334_p9)   ;;  %v1450_v12 = vld [vmem:[%s1777_s14 + $0x40] ss:$16 sps:$4 sm:$0xff] (!%p334_p9)   ;;  %v1451_v13 = vld [vmem:[%s1777_s14 + $0x48] ss:$16 sps:$4 sm:$0xff] (!%p334_p9)  }
  0x41   : > { %v1452_v14 = vld [vmem:[%s1777_s14 + $0x64] ss:$16 sps:$4 sm:$0xff] (!%p334_p9)   ;;  %v1454_v15 = vld [vmem:[%s1777_s14 + $0x6c] ss:$16 sps:$4 sm:$0xff] (!%p334_p9)   ;;  %v1456_v16 = vld [vmem:[%s1777_s14 + $0x60] ss:$16 sps:$4 sm:$0xff] (!%p334_p9)   ;;  %937 = vperm.xlu1 (!%p334_p9), %1433, %v917_v54   ;;  %927 = vperm.xlu0 (!%p334_p9), %1432, %v915_v55  }
  0x42   : > { %v1457_v17 = vld [vmem:[%s1777_s14 + $0x68] ss:$16 sps:$4 sm:$0xff]   ;;  %v1458_v18 = vld [vmem:[%s1777_s14 + $0x84] ss:$16 sps:$4 sm:$0xff]   ;;  %v1460_v19 = vld [vmem:[%s1777_s14 + $0x8c] ss:$16 sps:$4 sm:$0xff]  }
  0x43   : > { %791 = vmatpush1.bf16.msra.mxu0 %v1444_v8  ;;  %854 = vmatpush1.bf16.msra.mxu1 %v1445_v9  ;;  %v1462_v20 = vld [vmem:[%s1777_s14 + $0x80] ss:$16 sps:$4 sm:$0xff]   ;;  %v1463_v21 = vld [vmem:[%s1777_s14 + $0x88] ss:$16 sps:$4 sm:$0xff]   ;;  %v1464_v22 = vld [vmem:[%s1777_s14 + $0xa4] ss:$16 sps:$4 sm:$0xff]  }
  0x44   : > { %792 = vmatprep.subr.bf16.mxu0 %v1446_v10  ;;  %855 = vmatprep.subr.bf16.mxu1 %v1448_v11  ;;  %v1466_v23 = vld [vmem:[%s1777_s14 + $0xac] ss:$16 sps:$4 sm:$0xff]   ;;  %v1468_v24 = vld [vmem:[%s1777_s14 + $0xa0] ss:$16 sps:$4 sm:$0xff]   ;;  %v1469_v25 = vld [vmem:[%s1777_s14 + $0xa8] ss:$16 sps:$4 sm:$0xff]  }
  0x45   : > { %v1470_v26 = vld [vmem:[%s1777_s14 + $0xc4] ss:$16 sps:$4 sm:$0xff]   ;;  %v1472_v27 = vld [vmem:[%s1777_s14 + $0xcc] ss:$16 sps:$4 sm:$0xff]   ;;  %v1474_v28 = vld [vmem:[%s1777_s14 + $0xc0] ss:$16 sps:$4 sm:$0xff]   ;;  %947 = vperm.xlu1 %1433, %v919_v60   ;;  %942 = vperm.xlu0 %1432, %v918_v61  }
  0x46   : > { %v1475_v29 = vld [vmem:[%s1777_s14 + $0xc8] ss:$16 sps:$4 sm:$0xff]   ;;  %v1476_v30 = vld [vmem:[%s1777_s14 + $0xe4] ss:$16 sps:$4 sm:$0xff]   ;;  %v1478_v31 = vld [vmem:[%s1777_s14 + $0xec] ss:$16 sps:$4 sm:$0xff]  }
  0x47   : > { %793 = vmatpush1.bf16.msra.mxu0 %v1450_v12  ;;  %856 = vmatpush1.bf16.msra.mxu1 %v1451_v13  ;;  %v1480_v32 = vld [vmem:[%s1777_s14 + $0xe0] ss:$16 sps:$4 sm:$0xff]   ;;  %v1481_v33 = vld [vmem:[%s1777_s14 + $0xe8] ss:$16 sps:$4 sm:$0xff]   ;;  %v1482_v34 = vld [vmem:[%s1777_s14 + $0x104] ss:$16 sps:$4 sm:$0xff]  }
  0x48   : > { %794 = vmatprep.subr.bf16.mxu0 %v1452_v14  ;;  %857 = vmatprep.subr.bf16.mxu1 %v1454_v15  ;;  %v1484_v35 = vld [vmem:[%s1777_s14 + $0x10c] ss:$16 sps:$4 sm:$0xff]   ;;  %v1486_v36 = vld [vmem:[%s1777_s14 + $0x100] ss:$16 sps:$4 sm:$0xff]   ;;  %v1487_v37 = vld [vmem:[%s1777_s14 + $0x108] ss:$16 sps:$4 sm:$0xff]  }
  0x49   : > { %v1488_v38 = vld [vmem:[%s1777_s14 + $0x124] ss:$16 sps:$4 sm:$0xff]   ;;  %v1490_v39 = vld [vmem:[%s1777_s14 + $0x12c] ss:$16 sps:$4 sm:$0xff]   ;;  %v1492_v40 = vld [vmem:[%s1777_s14 + $0x120] ss:$16 sps:$4 sm:$0xff]  }
  0x4a   : > { %v1493_v41 = vld [vmem:[%s1777_s14 + $0x128] ss:$16 sps:$4 sm:$0xff]   ;;  %v1494_v42 = vld [vmem:[%s1777_s14 + $0x144] ss:$16 sps:$4 sm:$0xff]   ;;  %v1496_v43 = vld [vmem:[%s1777_s14 + $0x14c] ss:$16 sps:$4 sm:$0xff]  }
  0x4b   : > { %795 = vmatpush1.bf16.msra.mxu0 %v1456_v16  ;;  %858 = vmatpush1.bf16.msra.mxu1 %v1457_v17  ;;  %v1498_v44 = vld [vmem:[%s1777_s14 + $0x140] ss:$16 sps:$4 sm:$0xff]   ;;  %v1499_v45 = vld [vmem:[%s1777_s14 + $0x148] ss:$16 sps:$4 sm:$0xff]   ;;  %v1500_v46 = vld [vmem:[%s1777_s14 + $0x164] ss:$16 sps:$4 sm:$0xff]  }
  0x4c   : > { %796 = vmatprep.subr.bf16.mxu0 %v1458_v18  ;;  %859 = vmatprep.subr.bf16.mxu1 %v1460_v19  ;;  %v1502_v47 = vld [vmem:[%s1777_s14 + $0x16c] ss:$16 sps:$4 sm:$0xff]   ;;  %v1504_v49 = vld [vmem:[%s1777_s14 + $0x160] ss:$16 sps:$4 sm:$0xff]   ;;  %v1505_v50 = vld [vmem:[%s1777_s14 + $0x168] ss:$16 sps:$4 sm:$0xff]  }
  0x4d   : > { %v1506_v52 = vld [vmem:[%s1777_s14 + $0x184] ss:$16 sps:$4 sm:$0xff]   ;;  %v1508_v53 = vld [vmem:[%s1777_s14 + $0x18c] ss:$16 sps:$4 sm:$0xff]   ;;  %v1510_v56 = vld [vmem:[%s1777_s14 + $0x180] ss:$16 sps:$4 sm:$0xff]  }
  0x4e   : > { %v1511_v57 = vld [vmem:[%s1777_s14 + $0x188] ss:$16 sps:$4 sm:$0xff]   ;;  %v1512_v58 = vld [vmem:[%s1777_s14 + $0x1a4] ss:$16 sps:$4 sm:$0xff]   ;;  %v1514_v59 = vld [vmem:[%s1777_s14 + $0x1ac] ss:$16 sps:$4 sm:$0xff]  }
  0x4f   : > { %797 = vmatpush1.bf16.msra.mxu0 %v1462_v20  ;;  %860 = vmatpush1.bf16.msra.mxu1 %v1463_v21  ;;  %v1516_v62 = vld [vmem:[%s1777_s14 + $0x1a0] ss:$16 sps:$4 sm:$0xff]   ;;  %v1517_v63 = vld [vmem:[%s1777_s14 + $0x1a8] ss:$16 sps:$4 sm:$0xff]   ;;  %v1518_v0 = vld [vmem:[%s1777_s14 + $0x1c4] ss:$16 sps:$4 sm:$0xff]  }
  0x50   : > { %798 = vmatprep.subr.bf16.mxu0 %v1464_v22  ;;  %861 = vmatprep.subr.bf16.mxu1 %v1466_v23  ;;  %v1520_v1 = vld [vmem:[%s1777_s14 + $0x1cc] ss:$16 sps:$4 sm:$0xff]   ;;  %v974_v3 = vld [vmem:[%s1996_s3] sm:$0xff]  ;;  %v1523_v5 = vld [vmem:[%s1777_s14 + $0x1c8] ss:$16 sps:$4 sm:$0xff]   ;;  %s1906_s15 = smul.u32 96, %s340_s10 }
  0x51   : > { %v975_v2 = vld [vmem:[%s1996_s3 + $0x8] sm:$0xff]  ;;  %v1522_v4 = vld [vmem:[%s1777_s14 + $0x1c0] ss:$16 sps:$4 sm:$0xff]   ;;  %v1524_v6 = vld [vmem:[%s1777_s14 + $0x1e4] ss:$16 sps:$4 sm:$0xff]   ;;  %982 = vperm.xlu0 %1432, %v974_v3   ;;  %s1405_s10 = sshll.u32 (%p1627_p5), %s1297_s4, 4 }
  0x52   : > { %v1526_v7 = vld [vmem:[%s1777_s14 + $0x1ec] ss:$16 sps:$4 sm:$0xff]   ;;  %987 = vperm.xlu1 %1433, %v975_v2   ;;  %v976_v9 = vld [vmem:[%s1996_s3 + $0x10] sm:$0xff]  ;;  %v1529_v11 = vld [vmem:[%s1777_s14 + $0x1e8] ss:$16 sps:$4 sm:$0xff]   ;;  %s1916_s20 = scalar_lea.vmem [#allocation4], %s1906_s15  ;;  %s1201_s27 = scalar_lea.vmem (%p1627_p5), %s1998_s5, %s1405_s10 }
  0x53   : > { %799 = vmatpush1.bf16.msra.mxu0 %v1468_v24  ;;  %862 = vmatpush1.bf16.msra.mxu1 %v1469_v25  ;;  %v977_v8 = vld [vmem:[%s1996_s3 + $0x18] sm:$0xff]  ;;  %v1528_v10 = vld [vmem:[%s1777_s14 + $0x1e0] ss:$16 sps:$4 sm:$0xff]   ;;  %v979_v13 = vld [vmem:[%s1996_s3 + $0x28] sm:$0xff] }
  0x54   : > { %800 = vmatprep.subr.bf16.mxu0 %v1470_v26  ;;  %863 = vmatprep.subr.bf16.mxu1 %v1472_v27  ;;  %v1530_v12 = vld [vmem:[%s1994_s1] ss:$8 sps:$4 sm:$0xff]   ;;  %v1533_v15 = vld [vmem:[%s1994_s1 + $0x14] ss:$8 sps:$4 sm:$0xff]   ;;  %v1535_v16 = vld [vmem:[%s1994_s1 + $0x10] ss:$8 sps:$4 sm:$0xff]  }
  0x55   : > { %992 = vperm.xlu0 %1432, %v976_v9   ;;  %v978_v14 = vld [vmem:[%s1996_s3 + $0x20] sm:$0xff] }
  0x56   : > { %997 = vperm.xlu1 %1433, %v977_v8   ;;  %v1536_v17 = vld [vmem:[%s1994_s1 + $0x24] ss:$8 sps:$4 sm:$0xff]   ;;  %v1538_v18 = vld [vmem:[%s1994_s1 + $0x20] ss:$8 sps:$4 sm:$0xff]  }
  0x57   : > { %801 = vmatpush1.bf16.msra.mxu0 %v1474_v28  ;;  %864 = vmatpush1.bf16.msra.mxu1 %v1475_v29 }
  0x58   : > { %802 = vmatprep.subr.bf16.mxu0 %v1476_v30  ;;  %865 = vmatprep.subr.bf16.mxu1 %v1478_v31 }
  0x59   : > { %1002 = vperm.xlu0 %1432, %v978_v14  }
  0x5a   : > { %1007 = vperm.xlu1 %1433, %v979_v13  }
  0x5b   : > { %803 = vmatpush1.bf16.msra.mxu0 %v1480_v32  ;;  %866 = vmatpush1.bf16.msra.mxu1 %v1481_v33  ;;  %v1902_v32 = vstv %s1034_s13 }
  0x5c   : > { %804 = vmatprep.subr.bf16.mxu0 %v1482_v34  ;;  %867 = vmatprep.subr.bf16.mxu1 %v1484_v35 }
  0x5f   : > { %805 = vmatpush1.bf16.msra.mxu0 %v1486_v36  ;;  %868 = vmatpush1.bf16.msra.mxu1 %v1487_v37 }
  0x60   : > { %806 = vmatprep.subr.bf16.mxu0 %v1488_v38  ;;  %869 = vmatprep.subr.bf16.mxu1 %v1490_v39 }
  0x63   : > { %807 = vmatpush1.bf16.msra.mxu0 %v1492_v40  ;;  %870 = vmatpush1.bf16.msra.mxu1 %v1493_v41 }
  0x64   : > { %808 = vmatprep.subr.bf16.mxu0 %v1494_v42  ;;  %871 = vmatprep.subr.bf16.mxu1 %v1496_v43 }
  0x67   : > { %809 = vmatpush1.bf16.msra.mxu0 %v1498_v44  ;;  %872 = vmatpush1.bf16.msra.mxu1 %v1499_v45 }
  0x68   : > { %810 = vmatprep.subr.bf16.mxu0 %v1500_v46  ;;  %873 = vmatprep.subr.bf16.mxu1 %v1502_v47 }
  0x6b   : > { %811 = vmatpush1.bf16.msra.mxu0 %v1504_v49  ;;  %874 = vmatpush1.bf16.msra.mxu1 %v1505_v50 }
  0x6c   : > { %812 = vmatprep.subr.bf16.mxu0 %v1506_v52  ;;  %875 = vmatprep.subr.bf16.mxu1 %v1508_v53 }
  0x6f   : > { %813 = vmatpush1.bf16.msra.mxu0 %v1510_v56  ;;  %876 = vmatpush1.bf16.msra.mxu1 %v1511_v57 }
  0x70   : > { %814 = vmatprep.subr.bf16.mxu0 %v1512_v58  ;;  %877 = vmatprep.subr.bf16.mxu1 %v1514_v59 }
  0x73   : > { %815 = vmatpush1.bf16.msra.mxu0 %v1516_v62  ;;  %878 = vmatpush1.bf16.msra.mxu1 %v1517_v63 }
  0x74   : > { %816 = vmatprep.subr.bf16.mxu0 %v1518_v0  ;;  %879 = vmatprep.subr.bf16.mxu1 %v1520_v1 }
  0x77   : > { %817 = vmatpush1.bf16.msra.mxu0 %v1522_v4  ;;  %880 = vmatpush1.bf16.msra.mxu1 %v1523_v5 }
  0x78   : > { %818 = vmatprep.subr.bf16.mxu0 %v1524_v6  ;;  %881 = vmatprep.subr.bf16.mxu1 %v1526_v7 }
  0x7b   : > { %819 = vmatpush1.bf16.msra.mxu0 %v1528_v10  ;;  %882 = vmatpush1.bf16.msra.mxu1 %v1529_v11 }
  0x7e   : > { %821 = vmatmul.mubr.bf16.vlgmr.msra.gmra.mrb[0].mxu0 %v1530_v12  ;;  %884 = vmatmul.mubr.bf16.vlgmr.msra.gmra.mrb[0].mxu1 %v1530_v12 }
  0x7f   : > { %830 = vmatprep.mubr.bf16.mxu0 %v1533_v15  ;;  %893 = vmatprep.mubr.bf16.mxu1 %v1533_v15 }
  0x86   : > { %831 = vmatmul.mubr.bf16.gmra.mrb[4].mxu0 %v1535_v16  ;;  %894 = vmatmul.mubr.bf16.gmra.mrb[4].mxu1 %v1535_v16 }
  0x87   : > { %840 = vmatprep.mubr.bf16.mxu0 %v1536_v17  ;;  %903 = vmatprep.mubr.bf16.mxu1 %v1536_v17 }
  0x8e   : > { %841 = vmatmul.mubr.bf16.gmra.mrb[8].mxu0 %v1538_v18  ;;  %904 = vmatmul.mubr.bf16.gmra.mrb[8].mxu1 %v1538_v18 }
  0xbc   : > { %v923_v19 = vpop.permute.xlu0 %922  ;;  %v1894_v20 = vpop.permute.xlu1 %932 }
  0xc0   : > { %v928_v21 = vpop.permute.xlu0 %927  ;;  %v1896_v22 = vpop.permute.xlu1 %937 }
  0xc4   : > { %v1898_v23 = vpop.permute.xlu0 %942  ;;  %v1900_v24 = vpop.permute.xlu1 %947 }
  0xd0   : > { %v983_v25 = vpop.permute.xlu0 %982 }
  0xd1   : > { %v988_v49 = vpop.permute.xlu1 %987 }
  0xd4   : > { %v993_v12 = vpop.permute.xlu0 %992 }
 0x151   : > { %v822_v26 = vpop.f32.mrb[0].mxu0  ;;  %v885_v27 = vpop.f32.mrb[0].mxu1 }
 0x152   : > { %v950_v28 = vmul.f32 %v923_v19, %v822_v26  ;;  %v952_v29 = vmul.f32 %v923_v19, %v885_v27  ;;  %v824_v30 = vpop.f32.mrb[1].mxu0  ;;  %v887_v31 = vpop.f32.mrb[1].mxu1 }
 0x153   : > { %v951_v33 = vmul.f32 %v923_v19, %v824_v30  ;;  %v953_v34 = vmul.f32 %v923_v19, %v887_v31  ;;  %v826_v35 = vpop.f32.mrb[2].mxu0  ;;  %v889_v36 = vpop.f32.mrb[2].mxu1 }
 0x154   : > { %v1010_v37 = vadd.f32 %v983_v25, %v950_v28  ;;  %v1012_v38 = vadd.f32 %v983_v25, %v952_v29  ;;  %v954_v39 = vmul.f32 %v928_v21, %v826_v35  ;;  %v956_v40 = vmul.f32 %v928_v21, %v889_v36  ;;  %v828_v41 = vpop.f32.mrb[3].mxu0  ;;  %v891_v42 = vpop.f32.mrb[3].mxu1 }
 0x155   : > { %v1011_v43 = vadd.f32 %v983_v25, %v951_v33  ;;  %v1013_v44 = vadd.f32 %v983_v25, %v953_v34  ;;  %v955_v45 = vmul.f32 %v928_v21, %v828_v41  ;;  %v957_v46 = vmul.f32 %v928_v21, %v891_v42  ;;  %v998_v29 = vpop.permute.xlu1 %997 }
 0x156   : > { %vm1035_vm0 = vcmp.gt.f32.partialorder %v1010_v37, 0.0  ;;  %v1060_v47 = vmul.f32 %v1902_v32, %v1010_v37  ;;  %vm1037_vm1 = vcmp.gt.f32.partialorder %v1012_v38, 0.0  ;;  %v1062_v48 = vmul.f32 %v1902_v32, %v1012_v38 }
 0x157   : > { %vm1036_vm2 = vcmp.gt.f32.partialorder %v1011_v43, 0.0  ;;  %v1061_v50 = vmul.f32 %v1902_v32, %v1011_v43  ;;  %vm1038_vm3 = vcmp.gt.f32.partialorder %v1013_v44, 0.0  ;;  %v1063_v51 = vmul.f32 %v1902_v32, %v1013_v44 }
 0x158   : > { %v1084_v52 = vsel %vm1035_vm0, %v1010_v37, %v1060_v47  ;;  %v1086_v53 = vsel %vm1037_vm1, %v1012_v38, %v1062_v48  ;;  %v1014_v54 = vadd.f32 %v988_v49, %v954_v39  ;;  %v1016_v55 = vadd.f32 %v988_v49, %v956_v40 }
 0x159   : > { %v1085_v56 = vsel %vm1036_vm2, %v1011_v43, %v1061_v50  ;;  %v1087_v57 = vsel %vm1038_vm3, %v1013_v44, %v1063_v51  ;;  %v1015_v58 = vadd.f32 %v988_v49, %v955_v45  ;;  %v1017_v59 = vadd.f32 %v988_v49, %v957_v46  ;;  %v832_v60 = vpop.f32.mrb[4].mxu0  ;;  %v895_v61 = vpop.f32.mrb[4].mxu1 }
 0x15a   : > { %v1393_v62 = vpack.c.bf16 %v1085_v56, %v1084_v52  ;;  %v1394_v63 = vpack.c.bf16 %v1087_v57, %v1086_v53  ;;  %vm1039_vm4 = vcmp.gt.f32.partialorder %v1014_v54, 0.0  ;;  %v1064_v0 = vmul.f32 %v1902_v32, %v1014_v54  ;;  %v834_v1 = vpop.f32.mrb[5].mxu0  ;;  %v897_v2 = vpop.f32.mrb[5].mxu1 }
 0x15b   : > { %vm1041_vm5 = vcmp.gt.f32.partialorder %v1016_v55, 0.0  ;;  %v1066_v3 = vmul.f32 %v1902_v32, %v1016_v55  ;;  %vm1040_vm6 = vcmp.gt.f32.partialorder %v1015_v58, 0.0  ;;  %v1065_v4 = vmul.f32 %v1902_v32, %v1015_v58  ;;  %v836_v5 = vpop.f32.mrb[6].mxu0  ;;  %v899_v6 = vpop.f32.mrb[6].mxu1 }
 0x15c   : > { %1180 = vst [vmem:[%s1916_s20] sm:$0xff] %v1393_v62  ;;  %1181 = vst [vmem:[%s1916_s20 + $0x8] sm:$0xff] %v1394_v63  ;;  %v1088_v7 = vsel %vm1039_vm4, %v1014_v54, %v1064_v0  ;;  %vm1042_vm7 = vcmp.gt.f32.partialorder %v1017_v59, 0.0  ;;  %v1067_v8 = vmul.f32 %v1902_v32, %v1017_v59  ;;  %v958_v9 = vmul.f32 %v1894_v20, %v832_v60  ;;  %v838_v10 = vpop.f32.mrb[7].mxu0  ;;  %v901_v11 = vpop.f32.mrb[7].mxu1 }
 0x15d   : > { %v1090_v13 = vsel %vm1041_vm5, %v1016_v55, %v1066_v3  ;;  %v1089_v14 = vsel %vm1040_vm6, %v1015_v58, %v1065_v4  ;;  %v960_v15 = vmul.f32 %v1894_v20, %v895_v61  ;;  %v959_v16 = vmul.f32 %v1894_v20, %v834_v1  ;;  %v1003_v60 = vpop.permute.xlu0 %1002 }
 0x15e   : > { %v1395_v17 = vpack.c.bf16 %v1089_v14, %v1088_v7  ;;  %v1091_v18 = vsel %vm1042_vm7, %v1017_v59, %v1067_v8  ;;  %v1018_v19 = vadd.f32 %v993_v12, %v958_v9  ;;  %v961_v21 = vmul.f32 %v1894_v20, %v897_v2  ;;  %v1008_v9 = vpop.permute.xlu1 %1007 }
 0x15f   : > { %v1396_v25 = vpack.c.bf16 %v1091_v18, %v1090_v13  ;;  %v1020_v26 = vadd.f32 %v993_v12, %v960_v15  ;;  %v1019_v27 = vadd.f32 %v993_v12, %v959_v16  ;;  %v962_v28 = vmul.f32 %v1896_v22, %v836_v5 }
 0x160   : > { %1182 = vst [vmem:[%s1916_s20 + $0x10] sm:$0xff] %v1395_v17  ;;  %vm1043_vm8 = vcmp.gt.f32.partialorder %v1018_v19, 0.0  ;;  %v1068_v30 = vmul.f32 %v1902_v32, %v1018_v19  ;;  %v1021_v31 = vadd.f32 %v993_v12, %v961_v21  ;;  %v964_v33 = vmul.f32 %v1896_v22, %v899_v6 }
 0x161   : > { %1183 = vst [vmem:[%s1916_s20 + $0x18] sm:$0xff] %v1396_v25  ;;  %vm1045_vm9 = vcmp.gt.f32.partialorder %v1020_v26, 0.0  ;;  %v1070_v34 = vmul.f32 %v1902_v32, %v1020_v26  ;;  %vm1044_vm10 = vcmp.gt.f32.partialorder %v1019_v27, 0.0  ;;  %v1069_v20 = vmul.f32 %v1902_v32, %v1019_v27  ;;  %v842_v35 = vpop.f32.mrb[8].mxu0  ;;  %v905_v36 = vpop.f32.mrb[8].mxu1 }
 0x162   : > { %v1092_v37 = vsel %vm1043_vm8, %v1018_v19, %v1068_v30  ;;  %vm1046_vm11 = vcmp.gt.f32.partialorder %v1021_v31, 0.0  ;;  %v1071_v38 = vmul.f32 %v1902_v32, %v1021_v31  ;;  %v1022_v39 = vadd.f32 %v998_v29, %v962_v28  ;;  %v844_v40 = vpop.f32.mrb[9].mxu0  ;;  %v907_v41 = vpop.f32.mrb[9].mxu1 }
 0x163   : > { %v1094_v42 = vsel %vm1045_vm9, %v1020_v26, %v1070_v34  ;;  %v1093_v43 = vsel %vm1044_vm10, %v1019_v27, %v1069_v20  ;;  %v1024_v44 = vadd.f32 %v998_v29, %v964_v33  ;;  %v963_v45 = vmul.f32 %v1896_v22, %v838_v10  ;;  %v846_v46 = vpop.f32.mrb[10].mxu0  ;;  %v909_v47 = vpop.f32.mrb[10].mxu1 }
 0x164   : > { %v1397_v48 = vpack.c.bf16 %v1093_v43, %v1092_v37  ;;  %v1095_v49 = vsel %vm1046_vm11, %v1021_v31, %v1071_v38  ;;  %vm1047_vm12 = vcmp.gt.f32.partialorder %v1022_v39, 0.0  ;;  %v1072_v50 = vmul.f32 %v1902_v32, %v1022_v39  ;;  %v848_v51 = vpop.f32.mrb[11].mxu0  ;;  %v911_v52 = vpop.f32.mrb[11].mxu1 }
 0x165   : > { %v1398_v53 = vpack.c.bf16 %v1095_v49, %v1094_v42  ;;  %vm1049_vm13 = vcmp.gt.f32.partialorder %v1024_v44, 0.0  ;;  %v1074_v54 = vmul.f32 %v1902_v32, %v1024_v44  ;;  %v1023_v55 = vadd.f32 %v998_v29, %v963_v45 }
 0x166   : > { %1184 = vst [vmem:[%s1916_s20 + $0x20] sm:$0xff] %v1397_v48  ;;  %v1096_v56 = vsel %vm1047_vm12, %v1022_v39, %v1072_v50  ;;  %v965_v57 = vmul.f32 %v1896_v22, %v901_v11  ;;  %v966_v58 = vmul.f32 %v1898_v23, %v842_v35  ;;  %v968_v59 = vmul.f32 %v1898_v23, %v905_v36 }
 0x167   : > { %1185 = vst [vmem:[%s1916_s20 + $0x28] sm:$0xff] %v1398_v53  ;;  %v1098_v61 = vsel %vm1049_vm13, %v1024_v44, %v1074_v54  ;;  %vm1048_vm14 = vcmp.gt.f32.partialorder %v1023_v55, 0.0  ;;  %v1073_v62 = vmul.f32 %v1902_v32, %v1023_v55  ;;  %v967_v63 = vmul.f32 %v1898_v23, %v844_v40  ;;  %v1218_v42 = vld [vmem:[%s1916_s20 + $0x10] sm:$0xff] (%p1627_p5) }
 0x168   : > { %v1025_v0 = vadd.f32 %v998_v29, %v965_v57  ;;  %v1026_v1 = vadd.f32 %v1003_v60, %v966_v58  ;;  %v1028_v2 = vadd.f32 %v1003_v60, %v968_v59  ;;  %v969_v3 = vmul.f32 %v1898_v23, %v907_v41  ;;  %v1220_v43 = vld [vmem:[%s1916_s20 + $0x18] sm:$0xff] (%p1627_p5)  ;;  %1219 = vst [vmem:[%s1201_s27 + $0x30] sm:$0xff] (%p1627_p5), %v1218_v42 }
 0x169   : > { %v1097_v4 = vsel %vm1048_vm14, %v1023_v55, %v1073_v62  ;;  %v1027_v22 = vadd.f32 %v1003_v60, %v967_v63  ;;  %v970_v5 = vmul.f32 %v1900_v24, %v846_v46  ;;  %v972_v6 = vmul.f32 %v1900_v24, %v909_v47  ;;  %1221 = vst [vmem:[%s1201_s27 + $0x38] sm:$0xff] (%p1627_p5), %v1220_v43 }
 0x16a   : > { %v1399_v7 = vpack.c.bf16 %v1097_v4, %v1096_v56  ;;  %vm1050_vm15 = vcmp.gt.f32.partialorder %v1025_v0, 0.0  ;;  %v1075_v8 = vmul.f32 %v1902_v32, %v1025_v0  ;;  %vm1051_vm0 = vcmp.gt.f32.partialorder %v1026_v1, 0.0 }
 0x16b   : > { %v1076_v10 = vmul.f32 %v1902_v32, %v1026_v1  ;;  %vm1053_vm1 = vcmp.gt.f32.partialorder %v1028_v2, 0.0  ;;  %v1078_v11 = vmul.f32 %v1902_v32, %v1028_v2  ;;  %vm1052_vm2 = vcmp.gt.f32.partialorder %v1027_v22, 0.0 }
 0x16c   : > { %1186 = vst [vmem:[%s1916_s20 + $0x30] sm:$0xff] %v1399_v7  ;;  %v1099_v23 = vsel %vm1050_vm15, %v1025_v0, %v1075_v8  ;;  %v1077_v12 = vmul.f32 %v1902_v32, %v1027_v22  ;;  %v1029_v13 = vadd.f32 %v1003_v60, %v969_v3  ;;  %v1030_v14 = vadd.f32 %v1008_v9, %v970_v5 }
 0x16d   : > { %v1400_v15 = vpack.c.bf16 %v1099_v23, %v1098_v61  ;;  %v1100_v16 = vsel %vm1051_vm0, %v1026_v1, %v1076_v10  ;;  %v1032_v17 = vadd.f32 %v1008_v9, %v972_v6  ;;  %v1102_v18 = vsel %vm1053_vm1, %v1028_v2, %v1078_v11  ;;  %v1222_v44 = vld [vmem:[%s1916_s20 + $0x20] sm:$0xff] (%p1627_p5) }
 0x16e   : > { %v1101_v19 = vsel %vm1052_vm2, %v1027_v22, %v1077_v12  ;;  %vm1054_vm3 = vcmp.gt.f32.partialorder %v1029_v13, 0.0  ;;  %v1079_v21 = vmul.f32 %v1902_v32, %v1029_v13  ;;  %vm1055_vm4 = vcmp.gt.f32.partialorder %v1030_v14, 0.0  ;;  %v1224_v45 = vld [vmem:[%s1916_s20 + $0x28] sm:$0xff] (%p1627_p5)  ;;  %1223 = vst [vmem:[%s1201_s27 + $0x60] sm:$0xff] (%p1627_p5), %v1222_v44 }
 0x16f   : > { %1187 = vst [vmem:[%s1916_s20 + $0x38] sm:$0xff] %v1400_v15  ;;  %v1401_v25 = vpack.c.bf16 %v1101_v19, %v1100_v16  ;;  %v1080_v26 = vmul.f32 %v1902_v32, %v1030_v14  ;;  %v1082_v27 = vmul.f32 %v1902_v32, %v1032_v17  ;;  %vm1057_vm5 = vcmp.gt.f32.partialorder %v1032_v17, 0.0  ;;  %1225 = vst [vmem:[%s1201_s27 + $0x68] sm:$0xff] (%p1627_p5), %v1224_v45 }
 0x170   : > { %v1103_v28 = vsel %vm1054_vm3, %v1029_v13, %v1079_v21  ;;  %v971_v29 = vmul.f32 %v1900_v24, %v848_v51  ;;  %v973_v30 = vmul.f32 %v1900_v24, %v911_v52  ;;  %v1214_v24 = vld [vmem:[%s1916_s20] sm:$0xff] (%p1627_p5) }
 0x171   : > { %1188 = vst [vmem:[%s1916_s20 + $0x40] sm:$0xff] %v1401_v25  ;;  %v1402_v31 = vpack.c.bf16 %v1103_v28, %v1102_v18  ;;  %v1104_v20 = vsel %vm1055_vm4, %v1030_v14, %v1080_v26  ;;  %v1106_v35 = vsel %vm1057_vm5, %v1032_v17, %v1082_v27  ;;  %1215 = vst [vmem:[%s1201_s27] sm:$0xff] (%p1627_p5), %v1214_v24 }
 0x172   : > { %v1031_v33 = vadd.f32 %v1008_v9, %v971_v29  ;;  %v1033_v34 = vadd.f32 %v1008_v9, %v973_v30 }
 0x173   : > { %1189 = vst [vmem:[%s1916_s20 + $0x48] sm:$0xff] %v1402_v31  ;;  %1198 = sbr.rel (!%p1627_p5) target bundleno = 386 (0x182), region = 67  ;;  %v1226_v46 = vld [vmem:[%s1916_s20 + $0x30] sm:$0xff] (%p1627_p5) }
 0x174   : > { %vm1056_vm6 = vcmp.gt.f32.partialorder %v1031_v33, 0.0  ;;  %v1081_v36 = vmul.f32 %v1902_v32, %v1031_v33  ;;  %vm1058_vm7 = vcmp.gt.f32.partialorder %v1033_v34, 0.0  ;;  %v1083_v37 = vmul.f32 %v1902_v32, %v1033_v34  ;;  %v1216_v32 = vld [vmem:[%s1916_s20 + $0x8] sm:$0xff] (%p1627_p5)  ;;  %1227 = vst [vmem:[%s1201_s27 + $0x90] sm:$0xff] (%p1627_p5), %v1226_v46 }
 0x175   : > { %1217 = vst [vmem:[%s1201_s27 + $0x8] sm:$0xff] (%p1627_p5), %v1216_v32 }
 0x176   : > { %v1105_v38 = vsel %vm1056_vm6, %v1031_v33, %v1081_v36  ;;  %v1107_v39 = vsel %vm1058_vm7, %v1033_v34, %v1083_v37  ;;  %v1228_v47 = vld [vmem:[%s1916_s20 + $0x38] sm:$0xff] (%p1627_p5) }
 0x177   : > { %v1403_v40 = vpack.c.bf16 %v1105_v38, %v1104_v20  ;;  %v1404_v41 = vpack.c.bf16 %v1107_v39, %v1106_v35  ;;  %1229 = vst [vmem:[%s1201_s27 + $0x98] sm:$0xff] (%p1627_p5), %v1228_v47 }
 0x178   : > { %v1230_v48 = vld [vmem:[%s1916_s20 + $0x40] sm:$0xff] (%p1627_p5) }
 0x179   : > { %1190 = vst [vmem:[%s1916_s20 + $0x50] sm:$0xff] %v1403_v40  ;;  %1191 = vst [vmem:[%s1916_s20 + $0x58] sm:$0xff] %v1404_v41 }
 0x17a   : > { %1231 = vst [vmem:[%s1201_s27 + $0xc0] sm:$0xff] %v1230_v48  ;;  %v1232_v49 = vld [vmem:[%s1916_s20 + $0x48] sm:$0xff] }
 0x17b   : > { %1233 = vst [vmem:[%s1201_s27 + $0xc8] sm:$0xff] %v1232_v49 }
 0x180   : > { %v1234_v50 = vld [vmem:[%s1916_s20 + $0x50] sm:$0xff]  ;;  %v1236_v51 = vld [vmem:[%s1916_s20 + $0x58] sm:$0xff] }
 0x181   : > { %1235 = vst [vmem:[%s1201_s27 + $0xf0] sm:$0xff] %v1234_v50  ;;  %1237 = vst [vmem:[%s1201_s27 + $0xf8] sm:$0xff] %v1236_v51 }
 0x182 PF: > { %p13_p10 = scmp.ge.s32.totalorder %s1614_s23, 5   ;;  %s2000_s20 = smov %s1557_s21 }
 0x183   : > { %s2001_s21 = smov %s1625_s26  ;;  %s2002_s22 = smov %s1614_s23 }
 0x184   :  { %15 = sbr.rel (!%p13_p10) target bundleno = 4 (0x4), region = 121 }

// kernel: rnet_forward.8
= control target key start
LH: loop header
LB: loop body
LE: loop exit
PB: predicated region body
PF: predicated region fallthrough
CT: control target
= control target key end

     0   :  { %s598_s0 = inlined_call_operand.vmem [shape: bf16[9,48,512], index: 0, kind: input, shape index: {}]   ;;  %s599_s1 = inlined_call_operand.vmem [shape: bf16[48,512], index: 1, kind: output, shape index: {}]  }
   0x1   :  { %v8_v0 = vld [vmem:[%s598_s0] sm:$0xff]  ;;  %v9_v6 = vld [vmem:[%s598_s0 + $0x8] sm:$0xff]  ;;  %v10_v15 = vld [vmem:[%s598_s0 + $0x10] sm:$0xff] }
   0x2   :  { %v20_v1 = vld [vmem:[%s598_s0 + $0x60] sm:$0xff]  ;;  %v21_v7 = vld [vmem:[%s598_s0 + $0x68] sm:$0xff]  ;;  %v22_v16 = vld [vmem:[%s598_s0 + $0x70] sm:$0xff] }
   0x3   :  { %v32_v2 = vld [vmem:[%s598_s0 + $0xc0] sm:$0xff]  ;;  %v116_v3 = vmax.bf16 %v20_v1, %v8_v0  ;;  %v33_v8 = vld [vmem:[%s598_s0 + $0xc8] sm:$0xff]  ;;  %v124_v10 = vmax.bf16 %v21_v7, %v9_v6  ;;  %v34_v17 = vld [vmem:[%s598_s0 + $0xd0] sm:$0xff]  ;;  %v132_v20 = vmax.bf16 %v22_v16, %v10_v15 }
   0x4   :  { %v44_v4 = vld [vmem:[%s598_s0 + $0x120] sm:$0xff]  ;;  %v45_v13 = vld [vmem:[%s598_s0 + $0x128] sm:$0xff]  ;;  %v46_v24 = vld [vmem:[%s598_s0 + $0x130] sm:$0xff] }
   0x5   :  { %v117_v5 = vmax.bf16 %v116_v3, %v32_v2  ;;  %v56_v9 = vld [vmem:[%s598_s0 + $0x180] sm:$0xff]  ;;  %v125_v14 = vmax.bf16 %v124_v10, %v33_v8  ;;  %v57_v19 = vld [vmem:[%s598_s0 + $0x188] sm:$0xff]  ;;  %v133_v26 = vmax.bf16 %v132_v20, %v34_v17  ;;  %v11_v27 = vld [vmem:[%s598_s0 + $0x18] sm:$0xff] }
   0x6   :  { %v68_v11 = vld [vmem:[%s598_s0 + $0x1e0] sm:$0xff]  ;;  %v69_v22 = vld [vmem:[%s598_s0 + $0x1e8] sm:$0xff]  ;;  %v23_v28 = vld [vmem:[%s598_s0 + $0x78] sm:$0xff] }
   0x7   :  { %v118_v12 = vmax.bf16 %v117_v5, %v44_v4  ;;  %v80_v21 = vld [vmem:[%s598_s0 + $0x240] sm:$0xff]  ;;  %v126_v23 = vmax.bf16 %v125_v14, %v45_v13  ;;  %v35_v29 = vld [vmem:[%s598_s0 + $0xd8] sm:$0xff]  ;;  %v58_v33 = vld [vmem:[%s598_s0 + $0x190] sm:$0xff]  ;;  %v140_v34 = vmax.bf16 %v23_v28, %v11_v27  ;;  %v134_v38 = vmax.bf16 %v133_v26, %v46_v24 }
   0x8   :  { %v92_v30 = vld [vmem:[%s598_s0 + $0x2a0] sm:$0xff]  ;;  %v81_v36 = vld [vmem:[%s598_s0 + $0x248] sm:$0xff]  ;;  %v70_v37 = vld [vmem:[%s598_s0 + $0x1f0] sm:$0xff] }
   0x9   :  { %v119_v18 = vmax.bf16 %v118_v12, %v56_v9  ;;  %v104_v31 = vld [vmem:[%s598_s0 + $0x300] sm:$0xff]  ;;  %v127_v32 = vmax.bf16 %v126_v23, %v57_v19  ;;  %v47_v39 = vld [vmem:[%s598_s0 + $0x138] sm:$0xff]  ;;  %v141_v41 = vmax.bf16 %v140_v34, %v35_v29  ;;  %v93_v46 = vld [vmem:[%s598_s0 + $0x2a8] sm:$0xff]  ;;  %v135_v48 = vmax.bf16 %v134_v38, %v58_v33 }
   0xa   :  { %v12_v42 = vld [vmem:[%s598_s0 + $0x20] sm:$0xff]  ;;  %v105_v47 = vld [vmem:[%s598_s0 + $0x308] sm:$0xff]  ;;  %v59_v49 = vld [vmem:[%s598_s0 + $0x198] sm:$0xff] }
   0xb   :  { %v120_v25 = vmax.bf16 %v119_v18, %v68_v11  ;;  %v128_v40 = vmax.bf16 %v127_v32, %v69_v22  ;;  %v24_v43 = vld [vmem:[%s598_s0 + $0x80] sm:$0xff]  ;;  %v82_v52 = vld [vmem:[%s598_s0 + $0x250] sm:$0xff]  ;;  %v71_v53 = vld [vmem:[%s598_s0 + $0x1f8] sm:$0xff]  ;;  %v142_v54 = vmax.bf16 %v141_v41, %v47_v39  ;;  %v136_v57 = vmax.bf16 %v135_v48, %v70_v37 }
   0xc   :  { %v36_v44 = vld [vmem:[%s598_s0 + $0xe0] sm:$0xff]  ;;  %v148_v50 = vmax.bf16 %v24_v43, %v12_v42  ;;  %v13_v59 = vld [vmem:[%s598_s0 + $0x28] sm:$0xff]  ;;  %v94_v63 = vld [vmem:[%s598_s0 + $0x2b0] sm:$0xff] }
   0xd   :  { %v121_v35 = vmax.bf16 %v120_v25, %v80_v21  ;;  %v129_v51 = vmax.bf16 %v128_v40, %v81_v36  ;;  %v48_v55 = vld [vmem:[%s598_s0 + $0x140] sm:$0xff]  ;;  %v25_v60 = vld [vmem:[%s598_s0 + $0x88] sm:$0xff]  ;;  %v106_v0 = vld [vmem:[%s598_s0 + $0x310] sm:$0xff]  ;;  %v143_v1 = vmax.bf16 %v142_v54, %v59_v49  ;;  %v137_v4 = vmax.bf16 %v136_v57, %v82_v52 }
   0xe   :  { %v149_v58 = vmax.bf16 %v148_v50, %v36_v44  ;;  %v37_v61 = vld [vmem:[%s598_s0 + $0xe8] sm:$0xff]  ;;  %v60_v2 = vld [vmem:[%s598_s0 + $0x1a0] sm:$0xff]  ;;  %v156_v3 = vmax.bf16 %v25_v60, %v13_v59  ;;  %v83_v5 = vld [vmem:[%s598_s0 + $0x258] sm:$0xff] }
   0xf   :  { %v122_v45 = vmax.bf16 %v121_v35, %v92_v30  ;;  %v130_v62 = vmax.bf16 %v129_v51, %v93_v46  ;;  %v72_v6 = vld [vmem:[%s598_s0 + $0x200] sm:$0xff]  ;;  %v49_v8 = vld [vmem:[%s598_s0 + $0x148] sm:$0xff]  ;;  %v144_v10 = vmax.bf16 %v143_v1, %v71_v53  ;;  %v14_v12 = vld [vmem:[%s598_s0 + $0x30] sm:$0xff]  ;;  %v138_v15 = vmax.bf16 %v137_v4, %v94_v63 }
  0x10   :  { %v150_v7 = vmax.bf16 %v149_v58, %v48_v55  ;;  %v157_v11 = vmax.bf16 %v156_v3, %v37_v61  ;;  %v26_v13 = vld [vmem:[%s598_s0 + $0x90] sm:$0xff]  ;;  %v95_v16 = vld [vmem:[%s598_s0 + $0x2b8] sm:$0xff]  ;;  %v61_v19 = vld [vmem:[%s598_s0 + $0x1a8] sm:$0xff] }
  0x11   :  { %v123_v56 = vmax.bf16 %v122_v45, %v104_v31  ;;  %v131_v9 = vmax.bf16 %v130_v62, %v105_v47  ;;  %v38_v14 = vld [vmem:[%s598_s0 + $0xf0] sm:$0xff]  ;;  %v107_v17 = vld [vmem:[%s598_s0 + $0x318] sm:$0xff]  ;;  %v164_v20 = vmax.bf16 %v26_v13, %v14_v12  ;;  %v145_v21 = vmax.bf16 %v144_v10, %v83_v5  ;;  %v84_v22 = vld [vmem:[%s598_s0 + $0x260] sm:$0xff] }
  0x12   :  { %v151_v18 = vmax.bf16 %v150_v7, %v60_v2  ;;  %v73_v23 = vld [vmem:[%s598_s0 + $0x208] sm:$0xff]  ;;  %v158_v24 = vmax.bf16 %v157_v11, %v49_v8  ;;  %v50_v25 = vld [vmem:[%s598_s0 + $0x150] sm:$0xff]  ;;  %v139_v26 = vmax.bf16 %v138_v15, %v106_v0  ;;  %v15_v29 = vld [vmem:[%s598_s0 + $0x38] sm:$0xff] }
  0x13   :  { %212 = vst [vmem:[%s599_s1] sm:$0xff] %v123_v56  ;;  %213 = vst [vmem:[%s599_s1 + $0x8] sm:$0xff] %v131_v9  ;;  %v165_v28 = vmax.bf16 %v164_v20, %v38_v14  ;;  %v27_v30 = vld [vmem:[%s598_s0 + $0x98] sm:$0xff]  ;;  %v146_v32 = vmax.bf16 %v145_v21, %v95_v16  ;;  %v96_v33 = vld [vmem:[%s598_s0 + $0x2c0] sm:$0xff] }
  0x14   :  { %v152_v27 = vmax.bf16 %v151_v18, %v72_v6  ;;  %v39_v31 = vld [vmem:[%s598_s0 + $0xf8] sm:$0xff]  ;;  %v108_v34 = vld [vmem:[%s598_s0 + $0x320] sm:$0xff]  ;;  %v159_v35 = vmax.bf16 %v158_v24, %v61_v19  ;;  %v62_v36 = vld [vmem:[%s598_s0 + $0x1b0] sm:$0xff]  ;;  %v172_v37 = vmax.bf16 %v27_v30, %v15_v29  ;;  %214 = vst [vmem:[%s599_s1 + $0x10] sm:$0xff] %v139_v26 }
  0x15   :  { %v85_v39 = vld [vmem:[%s598_s0 + $0x268] sm:$0xff]  ;;  %v74_v40 = vld [vmem:[%s598_s0 + $0x210] sm:$0xff]  ;;  %v166_v41 = vmax.bf16 %v165_v28, %v50_v25  ;;  %v51_v42 = vld [vmem:[%s598_s0 + $0x158] sm:$0xff]  ;;  %v147_v43 = vmax.bf16 %v146_v32, %v107_v17 }
  0x16   :  { %v153_v38 = vmax.bf16 %v152_v27, %v84_v22  ;;  %v160_v44 = vmax.bf16 %v159_v35, %v73_v23  ;;  %v173_v45 = vmax.bf16 %v172_v37, %v39_v31  ;;  %v16_v46 = vld [vmem:[%s598_s0 + $0x40] sm:$0xff]  ;;  %v97_v50 = vld [vmem:[%s598_s0 + $0x2c8] sm:$0xff]  ;;  %v63_v53 = vld [vmem:[%s598_s0 + $0x1b8] sm:$0xff] }
  0x17   :  { %v28_v47 = vld [vmem:[%s598_s0 + $0xa0] sm:$0xff]  ;;  %v109_v51 = vld [vmem:[%s598_s0 + $0x328] sm:$0xff]  ;;  %v167_v52 = vmax.bf16 %v166_v41, %v62_v36  ;;  %215 = vst [vmem:[%s599_s1 + $0x18] sm:$0xff] %v147_v43  ;;  %v86_v56 = vld [vmem:[%s598_s0 + $0x270] sm:$0xff] }
  0x18   :  { %v40_v48 = vld [vmem:[%s598_s0 + $0x100] sm:$0xff]  ;;  %v154_v49 = vmax.bf16 %v153_v38, %v96_v33  ;;  %v180_v54 = vmax.bf16 %v28_v47, %v16_v46  ;;  %v161_v55 = vmax.bf16 %v160_v44, %v85_v39  ;;  %v75_v57 = vld [vmem:[%s598_s0 + $0x218] sm:$0xff]  ;;  %v174_v58 = vmax.bf16 %v173_v45, %v51_v42  ;;  %v17_v63 = vld [vmem:[%s598_s0 + $0x48] sm:$0xff] }
  0x19   :  { %v52_v59 = vld [vmem:[%s598_s0 + $0x160] sm:$0xff]  ;;  %v168_v61 = vmax.bf16 %v167_v52, %v74_v40  ;;  %v29_v0 = vld [vmem:[%s598_s0 + $0xa8] sm:$0xff]  ;;  %v98_v3 = vld [vmem:[%s598_s0 + $0x2d0] sm:$0xff] }
  0x1a   :  { %v155_v60 = vmax.bf16 %v154_v49, %v108_v34  ;;  %v181_v62 = vmax.bf16 %v180_v54, %v40_v48  ;;  %v41_v1 = vld [vmem:[%s598_s0 + $0x108] sm:$0xff]  ;;  %v162_v2 = vmax.bf16 %v161_v55, %v97_v50  ;;  %v110_v4 = vld [vmem:[%s598_s0 + $0x330] sm:$0xff]  ;;  %v175_v5 = vmax.bf16 %v174_v58, %v63_v53  ;;  %v64_v6 = vld [vmem:[%s598_s0 + $0x1c0] sm:$0xff] }
  0x1b   :  { %v188_v7 = vmax.bf16 %v29_v0, %v17_v63  ;;  %v169_v8 = vmax.bf16 %v168_v61, %v86_v56  ;;  %v87_v9 = vld [vmem:[%s598_s0 + $0x278] sm:$0xff]  ;;  %v76_v10 = vld [vmem:[%s598_s0 + $0x220] sm:$0xff]  ;;  %v53_v12 = vld [vmem:[%s598_s0 + $0x168] sm:$0xff] }
  0x1c   :  { %216 = vst [vmem:[%s599_s1 + $0x20] sm:$0xff] %v155_v60  ;;  %v182_v11 = vmax.bf16 %v181_v62, %v52_v59  ;;  %v163_v13 = vmax.bf16 %v162_v2, %v109_v51  ;;  %v176_v14 = vmax.bf16 %v175_v5, %v75_v57  ;;  %v18_v16 = vld [vmem:[%s598_s0 + $0x50] sm:$0xff]  ;;  %v99_v20 = vld [vmem:[%s598_s0 + $0x2d8] sm:$0xff]  ;;  %v65_v23 = vld [vmem:[%s598_s0 + $0x1c8] sm:$0xff] }
  0x1d   :  { %v189_v15 = vmax.bf16 %v188_v7, %v41_v1  ;;  %v30_v17 = vld [vmem:[%s598_s0 + $0xb0] sm:$0xff]  ;;  %v170_v19 = vmax.bf16 %v169_v8, %v98_v3  ;;  %v111_v21 = vld [vmem:[%s598_s0 + $0x338] sm:$0xff]  ;;  %v88_v26 = vld [vmem:[%s598_s0 + $0x280] sm:$0xff] }
  0x1e   :  { %v42_v18 = vld [vmem:[%s598_s0 + $0x110] sm:$0xff]  ;;  %v183_v22 = vmax.bf16 %v182_v11, %v64_v6  ;;  %v196_v24 = vmax.bf16 %v30_v17, %v18_v16  ;;  %217 = vst [vmem:[%s599_s1 + $0x28] sm:$0xff] %v163_v13  ;;  %v177_v25 = vmax.bf16 %v176_v14, %v87_v9  ;;  %v77_v27 = vld [vmem:[%s598_s0 + $0x228] sm:$0xff]  ;;  %v19_v33 = vld [vmem:[%s598_s0 + $0x58] sm:$0xff] }
  0x1f   :  { %v190_v28 = vmax.bf16 %v189_v15, %v53_v12  ;;  %v54_v29 = vld [vmem:[%s598_s0 + $0x170] sm:$0xff]  ;;  %v171_v30 = vmax.bf16 %v170_v19, %v110_v4  ;;  %v31_v34 = vld [vmem:[%s598_s0 + $0xb8] sm:$0xff]  ;;  %v100_v37 = vld [vmem:[%s598_s0 + $0x2e0] sm:$0xff] }
  0x20   :  { %v184_v31 = vmax.bf16 %v183_v22, %v76_v10  ;;  %v197_v32 = vmax.bf16 %v196_v24, %v42_v18  ;;  %v43_v35 = vld [vmem:[%s598_s0 + $0x118] sm:$0xff]  ;;  %v178_v36 = vmax.bf16 %v177_v25, %v99_v20  ;;  %v66_v39 = vld [vmem:[%s598_s0 + $0x1d0] sm:$0xff]  ;;  %v204_v40 = vmax.bf16 %v31_v34, %v19_v33  ;;  %v89_v42 = vld [vmem:[%s598_s0 + $0x288] sm:$0xff] }
  0x21   :  { %v191_v38 = vmax.bf16 %v190_v28, %v65_v23  ;;  %218 = vst [vmem:[%s599_s1 + $0x30] sm:$0xff] %v171_v30  ;;  %v55_v44 = vld [vmem:[%s598_s0 + $0x178] sm:$0xff]  ;;  %v112_v46 = vld [vmem:[%s598_s0 + $0x340] sm:$0xff]  ;;  %v78_v48 = vld [vmem:[%s598_s0 + $0x230] sm:$0xff] }
  0x22   :  { %v185_v41 = vmax.bf16 %v184_v31, %v88_v26  ;;  %v198_v43 = vmax.bf16 %v197_v32, %v54_v29  ;;  %v179_v45 = vmax.bf16 %v178_v36, %v111_v21  ;;  %v205_v49 = vmax.bf16 %v204_v40, %v43_v35  ;;  %v101_v51 = vld [vmem:[%s598_s0 + $0x2e8] sm:$0xff]  ;;  %v67_v53 = vld [vmem:[%s598_s0 + $0x1d8] sm:$0xff]  ;;  %v90_v55 = vld [vmem:[%s598_s0 + $0x290] sm:$0xff] }
  0x23   :  { %v192_v47 = vmax.bf16 %v191_v38, %v77_v27  ;;  %v113_v58 = vld [vmem:[%s598_s0 + $0x348] sm:$0xff]  ;;  %v79_v60 = vld [vmem:[%s598_s0 + $0x238] sm:$0xff]  ;;  %v102_v62 = vld [vmem:[%s598_s0 + $0x2f0] sm:$0xff] }
  0x24   :  { %v186_v50 = vmax.bf16 %v185_v41, %v100_v37  ;;  %v199_v52 = vmax.bf16 %v198_v43, %v66_v39  ;;  %219 = vst [vmem:[%s599_s1 + $0x38] sm:$0xff] %v179_v45  ;;  %v206_v56 = vmax.bf16 %v205_v49, %v55_v44  ;;  %v91_v1 = vld [vmem:[%s598_s0 + $0x298] sm:$0xff]  ;;  %v114_v3 = vld [vmem:[%s598_s0 + $0x350] sm:$0xff] }
  0x25   :  { %v193_v54 = vmax.bf16 %v192_v47, %v89_v42  ;;  %v103_v6 = vld [vmem:[%s598_s0 + $0x2f8] sm:$0xff] }
  0x26   :  { %v187_v57 = vmax.bf16 %v186_v50, %v112_v46  ;;  %v200_v59 = vmax.bf16 %v199_v52, %v78_v48  ;;  %v207_v63 = vmax.bf16 %v206_v56, %v67_v53  ;;  %v115_v9 = vld [vmem:[%s598_s0 + $0x358] sm:$0xff] }
  0x27   :  { %v194_v61 = vmax.bf16 %v193_v54, %v101_v51 }
  0x28   :  { %220 = vst [vmem:[%s599_s1 + $0x40] sm:$0xff] %v187_v57  ;;  %v201_v0 = vmax.bf16 %v200_v59, %v90_v55  ;;  %v208_v4 = vmax.bf16 %v207_v63, %v79_v60 }
  0x29   :  { %v195_v2 = vmax.bf16 %v194_v61, %v113_v58 }
  0x2a   :  { %v202_v5 = vmax.bf16 %v201_v0, %v102_v62  ;;  %v209_v7 = vmax.bf16 %v208_v4, %v91_v1 }
  0x2b   :  { %221 = vst [vmem:[%s599_s1 + $0x48] sm:$0xff] %v195_v2 }
  0x2c   :  { %v203_v8 = vmax.bf16 %v202_v5, %v114_v3  ;;  %v210_v10 = vmax.bf16 %v209_v7, %v103_v6 }
  0x2e   :  { %222 = vst [vmem:[%s599_s1 + $0x50] sm:$0xff] %v203_v8  ;;  %v211_v11 = vmax.bf16 %v210_v10, %v115_v9 }
  0x30   :  { %223 = vst [vmem:[%s599_s1 + $0x58] sm:$0xff] %v211_v11 }

// kernel: rnet_forward.9
= control target key start
LH: loop header
LB: loop body
LE: loop exit
PB: predicated region body
PF: predicated region fallthrough
CT: control target
= control target key end

     0   :  { %s3045_s0 = inlined_call_operand.vmem [shape: bf16[9,16,192], index: 0, kind: input, shape index: {}]   ;;  %s3046_s1 = inlined_call_operand.vmem [shape: bf16[192,64], index: 1, kind: input, shape index: {}]   ;;  %s3047_s2 = inlined_call_operand.vmem [shape: f32[1,1,64], index: 2, kind: input, shape index: {}]   ;;  %s3048_s3 = inlined_call_operand.vmem [shape: f32[1,1,64], index: 3, kind: input, shape index: {}]   ;;  %s3049_s4 = inlined_call_operand.<no memory space> [shape: f32[1], index: 4, kind: input, shape index: {}]   ;;  %s3050_s5 = inlined_call_operand.vmem [shape: bf16[9,64,128], index: 5, kind: input, shape index: {}]   ;;  %s3051_s6 = inlined_call_operand.vmem [shape: f32[1,128], index: 6, kind: input, shape index: {}]   ;;  %s3052_s7 = inlined_call_operand.<no memory space> [shape: f32[1], index: 7, kind: input, shape index: {}]   ;;  %s3053_s8 = inlined_call_operand.vmem [shape: bf16[128,8], index: 8, kind: input, shape index: {}]   ;;  %s3054_s9 = inlined_call_operand.vmem [shape: f32[1,8], index: 9, kind: input, shape index: {}]   ;;  %s3055_s10 = inlined_call_operand.vmem [shape: f32[16,8], index: 10, kind: output, shape index: {}]  }
   0x1   :  { %15 = sst [smem:[#allocation2]] %s3049_s4 }
   0x2   :  { %16 = sst [smem:[#allocation3]] %s3052_s7 }
   0x3   :  { %s2409_s17 = smov 0   ;;  %s2411_s18 = smov 0  }
   0x4   :  { %s2413_s19 = smov 0  }
   0x5 LB: > { %s1924_s4 = sadd.s32 4294967295, %s2343_s19   ;;  %s2426_s7 = sadd.s32 1, %s2343_s19   ;;  %s2343_s19 = sphi %s2413_s19, %s3058_s19   ;;  %s2339_s18 = sphi %s2411_s18, %s3057_s18   ;;  %s2335_s17 = sphi %s2409_s17, %s3056_s17  }
   0x6   : > { %s26_s20 = ssub.s32 %s2343_s19, %s2426_s7  ;;  %s29_s21 = sadd.s32 1, %s2339_s18 }
   0x7   : > { %p27_p0 = scmp.eq.s32.totalorder %s26_s20, 0  ;;  %p36_p1 = scmp.ne.s32.totalorder %s2339_s18, %s2335_s17 }
   0x8   : > { %p37_p2 = scmp.eq.s32.totalorder %s2343_s19, 0  ;;  %p1927_p4 = scmp.ge.s32.totalorder %s2343_s19, 2 }
   0x9   : > { %s2435_s22 = scalar_select %p27_p0, %s2339_s18, %s29_s21  }
   0xa   : > { %p38_p3 = por %p37_p2, %p36_p1  ;;  %304 = sbr.rel (%p1927_p4) target bundleno = 26 (0x1a), region = 52 }
  0x11   : > { %307 = sbr.rel (!%p38_p3) target bundleno = 26 (0x1a), region = 56  ;;  %s309_s23 = sand.u32 (%p38_p3), 1, %s2339_s18  }
  0x12   : > { %s2031_s24 = sshll.u32 (%p38_p3), %s2343_s19, 3  ;;  %s2214_s25 = smul.u32 (%p38_p3), 72, %s309_s23 }
  0x13   : > { %s314_s28 = scalar_lea.vmem (%p38_p3), %s3045_s0, %s2031_s24 }
  0x14   : > { %v358_v0 = vld [vmem:[%s314_s28] sm:$0xff] (%p38_p3)  ;;  %v360_v1 = vld [vmem:[%s314_s28 + $0x10] sm:$0xff] (%p38_p3)  ;;  %s311_s29 = scalar_lea.vmem (%p38_p3), [#allocation4], %s2214_s25 }
  0x15   : > { %v362_v2 = vld [vmem:[%s314_s28 + $0x20] sm:$0xff] (%p38_p3)  ;;  %v364_v3 = vld [vmem:[%s314_s28 + $0x30] sm:$0xff] (%p38_p3)  ;;  %359 = vst [vmem:[%s311_s29] sm:$0xff] (%p38_p3), %v358_v0  ;;  %361 = vst [vmem:[%s311_s29 + $0x8] sm:$0xff] (%p38_p3), %v360_v1 }
  0x16   : > { %v366_v4 = vld [vmem:[%s314_s28 + $0x40] sm:$0xff] (%p38_p3)  ;;  %v368_v5 = vld [vmem:[%s314_s28 + $0x50] sm:$0xff] (%p38_p3)  ;;  %363 = vst [vmem:[%s311_s29 + $0x10] sm:$0xff] (%p38_p3), %v362_v2  ;;  %365 = vst [vmem:[%s311_s29 + $0x18] sm:$0xff] (%p38_p3), %v364_v3 }
  0x17   : > { %367 = vst [vmem:[%s311_s29 + $0x20] sm:$0xff] (%p38_p3), %v366_v4  ;;  %369 = vst [vmem:[%s311_s29 + $0x28] sm:$0xff] (%p38_p3), %v368_v5  ;;  %v370_v6 = vld [vmem:[%s314_s28 + $0x60] sm:$0xff] (%p38_p3)  ;;  %v372_v7 = vld [vmem:[%s314_s28 + $0x70] sm:$0xff] (%p38_p3) }
  0x18   : > { %v374_v8 = vld [vmem:[%s314_s28 + $0x80] sm:$0xff]  ;;  %371 = vst [vmem:[%s311_s29 + $0x30] sm:$0xff] %v370_v6  ;;  %373 = vst [vmem:[%s311_s29 + $0x38] sm:$0xff] %v372_v7 }
  0x19   : > { %375 = vst [vmem:[%s311_s29 + $0x40] sm:$0xff] %v374_v8 }
  0x1a PF: > { %p1930_p5 = scmp.ge.s32.totalorder %s2343_s19, 1  ;;  %p380_p6 = scmp.lt.s32.totalorder %s2343_s19, 3 }
  0x1c   : > { %p381_p7 = pnand %p1930_p5, %p380_p6 }
  0x1d   : > { %v2448_v9 = vld [vmem:[%s3046_s1] sm:$0xff] (!%p381_p7)   ;;  %v2345_v10 = vmov (!%p381_p7), 0   ;;  %v2457_v11 = vld [vmem:[%s3046_s1 + $0x8] sm:$0xff] (!%p381_p7)   ;;  %s387_s14 = sand.u32 (!%p381_p7), 1, %s2335_s17   ;;  %v2467_v12 = vld [vmem:[%s3046_s1 + $0x10] sm:$0xff] (!%p381_p7)   ;;  %vm539_vm0 = vcmask (!%p381_p7), 523264  }
  0x1e   : > { %384 = sbr.rel (%p381_p7) target bundleno = 954 (0x3ba), region = 94  ;;  %543 = vmatprep.subr.bf16.mxu0 (!%p381_p7), %v2345_v10  ;;  %592 = vmatprep.subr.bf16.mxu1 (!%p381_p7), %v2345_v10  ;;  %v2476_v13 = vld [vmem:[%s3046_s1 + $0x18] sm:$0xff] (!%p381_p7)   ;;  %v2487_v16 = vld [vmem:[%s3046_s1 + $0x20] sm:$0xff] (!%p381_p7)   ;;  %v2496_v19 = vld [vmem:[%s3046_s1 + $0x28] sm:$0xff] (!%p381_p7)   ;;  %v2346_v48 = vmov (!%p381_p7), 0.0   ;;  %vm2347_vm1 = vmmov (!%p381_p7), 0  }
  0x1f   : > { %544 = vmatpush1.bf16.msra.mxu0 (!%p381_p7), %v2448_v9  ;;  %593 = vmatpush1.bf16.msra.mxu1 (!%p381_p7), %v2448_v9  ;;  %s2215_s15 = smul.u32 (!%p381_p7), 72, %s387_s14  ;;  %v2507_v20 = vld [vmem:[%s3046_s1 + $0x30] sm:$0xff] (!%p381_p7)   ;;  %v2516_v21 = vld [vmem:[%s3046_s1 + $0x38] sm:$0xff] (!%p381_p7)   ;;  %v2525_v22 = vld [vmem:[%s3046_s1 + $0x40] sm:$0xff] (!%p381_p7)   ;;  %s1007_s21 = sld [smem:[#allocation2]] (!%p381_p7)  ;;  %vm1863_vm13 = vcmask (!%p381_p7), 64512  }
  0x20   : > { %545 = vmatprep.subr.bf16.mxu0 (!%p381_p7), %v2345_v10  ;;  %594 = vmatprep.subr.bf16.mxu1 (!%p381_p7), %v2345_v10  ;;  %v2534_v23 = vld [vmem:[%s3046_s1 + $0x48] sm:$0xff] (!%p381_p7)   ;;  %v2543_v24 = vld [vmem:[%s3046_s1 + $0x50] sm:$0xff] (!%p381_p7)   ;;  %v2552_v25 = vld [vmem:[%s3046_s1 + $0x58] sm:$0xff] (!%p381_p7)   ;;  %s1736_s11 = sld [smem:[#allocation3]] (!%p381_p7)  ;;  %p423_p8 = scmp.lt.s32.totalorder (!%p381_p7), %s1924_s4, 1 }
  0x21   : > { %s2480_s23 = scalar_lea.vmem (!%p381_p7), [#allocation4], %s2215_s15  ;;  %v2273_v49 = vld [vmem:[%s3050_s5] sm:$0xff] (!%p381_p7)   ;;  %v2274_v50 = vld [vmem:[%s3050_s5 + $0x8] sm:$0xff] (!%p381_p7)   ;;  %v2275_v51 = vld [vmem:[%s3050_s5 + $0x10] sm:$0xff] (!%p381_p7)  }
  0x22   : > { %v428_v14 = vld [vmem:[%s2480_s23] sm:$0xff] (!%p381_p7)  ;;  %v429_v15 = vld [vmem:[%s2480_s23 + $0x8] sm:$0xff] (!%p381_p7)  ;;  %v2559_v28 = vld [vmem:[%s2480_s23 + $0x10] sm:$0xff] (!%p381_p7) }
  0x23   : > { %546 = vmatpush1.bf16.msra.mxu0 (!%p381_p7), %v2457_v11  ;;  %595 = vmatpush1.bf16.msra.mxu1 (!%p381_p7), %v2457_v11  ;;  %v1933_v17 = vcombine.high (!%p381_p7), %v428_v14, %v428_v14  ;;  %v1948_v18 = vcombine.high (!%p381_p7), %v429_v15, %v429_v15  ;;  %v1932_v26 = vcombine.low (!%p381_p7), %v428_v14, %v428_v14  ;;  %v2562_v29 = vld [vmem:[%s2480_s23 + $0x18] sm:$0xff] (!%p381_p7)  ;;  %v2623_v34 = vld [vmem:[%s2480_s23 + $0x20] sm:$0xff] (!%p381_p7)  ;;  %v2626_v35 = vld [vmem:[%s2480_s23 + $0x28] sm:$0xff] (!%p381_p7) }
  0x24   : > { %547 = vmatprep.subr.bf16.mxu0 (!%p381_p7), %v2345_v10  ;;  %596 = vmatprep.subr.bf16.mxu1 (!%p381_p7), %v2345_v10  ;;  %v1947_v27 = vcombine.low (!%p381_p7), %v429_v15, %v429_v15  ;;  %v1951_v30 = vcombine.high (!%p381_p7), %v2559_v28, %v2559_v28  ;;  %v1954_v31 = vcombine.high (!%p381_p7), %v2562_v29, %v2562_v29  ;;  %v2687_v40 = vld [vmem:[%s2480_s23 + $0x30] sm:$0xff] (!%p381_p7)  ;;  %v2690_v41 = vld [vmem:[%s2480_s23 + $0x38] sm:$0xff] (!%p381_p7)  ;;  %v436_v44 = vld [vmem:[%s2480_s23 + $0x40] sm:$0xff] (!%p381_p7) }
  0x25   : > { %1946 = vmatprep.mubr.msk.bf16.mxu0 %vm539_vm0, %v1933_v17  ;;  %1949 = vmatprep.mubr.msk.bf16.mxu1 %vm539_vm0, %v1948_v18  ;;  %v1950_v32 = vcombine.low %v2559_v28, %v2559_v28  ;;  %v1953_v33 = vcombine.low %v2562_v29, %v2562_v29  ;;  %v1957_v36 = vcombine.high %v2623_v34, %v2623_v34  ;;  %v2276_v52 = vld [vmem:[%s3050_s5 + $0x18] sm:$0xff]   ;;  %v2290_v54 = vld [vmem:[%s3050_s5 + $0xa0] sm:$0xff]   ;;  %v2292_v55 = vld [vmem:[%s3050_s5 + $0xa8] sm:$0xff]   ;;  %v2827_v1 = vstv %s1007_s21  ;;  %s3060_s4 = smov (!%p423_p8, %s1924_s4), 1 }
  0x26   : > { %v1960_v37 = vcombine.high %v2626_v35, %v2626_v35  ;;  %v1956_v38 = vcombine.low %v2623_v34, %v2623_v34  ;;  %v1959_v39 = vcombine.low %v2626_v35, %v2626_v35  ;;  %v1963_v42 = vcombine.high %v2687_v40, %v2687_v40  ;;  %v2294_v56 = vld [vmem:[%s3050_s5 + $0xb0] sm:$0xff]   ;;  %v2296_v57 = vld [vmem:[%s3050_s5 + $0xb8] sm:$0xff]   ;;  %v2819_v58 = vld [vmem:[%s3047_s2] ss:$0 sm:$0xff]  ;;  %s1931_s16 = sshll.u32 %s3060_s4, 3 }
  0x27   : > { %548 = vmatpush1.bf16.msra.mxu0 %v2467_v12  ;;  %597 = vmatpush1.bf16.msra.mxu1 %v2467_v12  ;;  %v1966_v43 = vcombine.high %v2690_v41, %v2690_v41  ;;  %v1962_v45 = vcombine.low %v2687_v40, %v2687_v40  ;;  %v1965_v46 = vcombine.low %v2690_v41, %v2690_v41  ;;  %v2824_v60 = vld [vmem:[%s3048_s3] ss:$0 sm:$0xff]  ;;  %v2279_v15 = vld [vmem:[%s3050_s5 + $0x30] sm:$0xff]   ;;  %v2280_v17 = vld [vmem:[%s3050_s5 + $0x38] sm:$0xff]   ;;  %s426_s21 = scalar_lea.vmem %s3055_s10, %s1931_s16 }
  0x28   : > { %549 = vmatprep.subr.bf16.mxu0 %v2345_v10  ;;  %598 = vmatprep.subr.bf16.mxu1 %v2345_v10  ;;  %v1969_v47 = vcombine.high %v436_v44, %v436_v44  ;;  %v1968_v53 = vcombine.low %v436_v44, %v436_v44  ;;  %v2285_v35 = vld [vmem:[%s3050_s5 + $0x60] sm:$0xff]   ;;  %v2287_v41 = vld [vmem:[%s3050_s5 + $0x70] sm:$0xff]  }
  0x2b   : > { %550 = vmatpush1.bf16.msra.mxu0 %v2476_v13  ;;  %599 = vmatpush1.bf16.msra.mxu1 %v2476_v13 }
  0x2c   : > { %551 = vmatprep.subr.bf16.mxu0 %v2345_v10  ;;  %600 = vmatprep.subr.bf16.mxu1 %v2345_v10 }
  0x2f   : > { %552 = vmatpush1.bf16.msra.mxu0 %v2487_v16  ;;  %601 = vmatpush1.bf16.msra.mxu1 %v2487_v16 }
  0x30   : > { %553 = vmatprep.subr.bf16.mxu0 %v2345_v10  ;;  %602 = vmatprep.subr.bf16.mxu1 %v2345_v10 }
  0x33   : > { %554 = vmatpush1.bf16.msra.mxu0 %v2496_v19  ;;  %603 = vmatpush1.bf16.msra.mxu1 %v2496_v19 }
  0x34   : > { %555 = vmatprep.subr.bf16.mxu0 %v2345_v10  ;;  %604 = vmatprep.subr.bf16.mxu1 %v2345_v10 }
  0x37   : > { %556 = vmatpush1.bf16.msra.mxu0 %v2507_v20  ;;  %605 = vmatpush1.bf16.msra.mxu1 %v2507_v20 }
  0x38   : > { %557 = vmatprep.subr.bf16.mxu0 %v2345_v10  ;;  %606 = vmatprep.subr.bf16.mxu1 %v2345_v10 }
  0x3b   : > { %558 = vmatpush1.bf16.msra.mxu0 %v2516_v21  ;;  %607 = vmatpush1.bf16.msra.mxu1 %v2516_v21 }
  0x3c   : > { %559 = vmatprep.subr.bf16.mxu0 %v2345_v10  ;;  %608 = vmatprep.subr.bf16.mxu1 %v2345_v10 }
  0x3f   : > { %560 = vmatpush1.bf16.msra.mxu0 %v2525_v22  ;;  %609 = vmatpush1.bf16.msra.mxu1 %v2525_v22 }
  0x40   : > { %561 = vmatprep.subr.bf16.mxu0 %v2345_v10  ;;  %610 = vmatprep.subr.bf16.mxu1 %v2345_v10 }
  0x43   : > { %562 = vmatpush1.bf16.msra.mxu0 %v2534_v23  ;;  %611 = vmatpush1.bf16.msra.mxu1 %v2534_v23 }
  0x44   : > { %563 = vmatprep.subr.bf16.mxu0 %v2345_v10  ;;  %612 = vmatprep.subr.bf16.mxu1 %v2345_v10 }
  0x47   : > { %564 = vmatpush1.bf16.msra.mxu0 %v2543_v24  ;;  %613 = vmatpush1.bf16.msra.mxu1 %v2543_v24 }
  0x48   : > { %565 = vmatprep.subr.bf16.mxu0 %v2345_v10  ;;  %614 = vmatprep.subr.bf16.mxu1 %v2345_v10 }
  0x4b   : > { %566 = vmatpush1.bf16.msra.mxu0 %v2552_v25  ;;  %615 = vmatpush1.bf16.msra.mxu1 %v2552_v25 }
  0x4c   : > { %641 = vmatprep.subr.bf16.mxu0 %v2345_v10  ;;  %690 = vmatprep.subr.bf16.mxu1 %v2345_v10 }
  0x4e   : > { %576 = vmatmul.mubr.bf16.vlgmr.msra.gmra.mrb[0].mxu0 %v1932_v26  ;;  %625 = vmatmul.mubr.bf16.vlgmr.msra.gmra.mrb[0].mxu1 %v1947_v27 }
  0x4f   : > { %642 = vmatpush1.bf16.msra.mxu0 %v2448_v9  ;;  %691 = vmatpush1.bf16.msra.mxu1 %v2448_v9 }
  0x50   : > { %643 = vmatprep.subr.bf16.mxu0 %v2345_v10  ;;  %692 = vmatprep.subr.bf16.mxu1 %v2345_v10 }
  0x51   : > { %1952 = vmatprep.mubr.msk.bf16.mxu0 %vm539_vm0, %v1951_v30  ;;  %1955 = vmatprep.mubr.msk.bf16.mxu1 %vm539_vm0, %v1954_v31 }
  0x53   : > { %644 = vmatpush1.bf16.msra.mxu0 %v2457_v11  ;;  %693 = vmatpush1.bf16.msra.mxu1 %v2457_v11 }
  0x54   : > { %645 = vmatprep.subr.bf16.mxu0 %v2345_v10  ;;  %694 = vmatprep.subr.bf16.mxu1 %v2345_v10 }
  0x57   : > { %646 = vmatpush1.bf16.msra.mxu0 %v2467_v12  ;;  %695 = vmatpush1.bf16.msra.mxu1 %v2467_v12 }
  0x58   : > { %647 = vmatprep.subr.bf16.mxu0 %v2345_v10  ;;  %696 = vmatprep.subr.bf16.mxu1 %v2345_v10 }
  0x5b   : > { %648 = vmatpush1.bf16.msra.mxu0 %v2476_v13  ;;  %697 = vmatpush1.bf16.msra.mxu1 %v2476_v13 }
  0x5c   : > { %649 = vmatprep.subr.bf16.mxu0 %v2345_v10  ;;  %698 = vmatprep.subr.bf16.mxu1 %v2345_v10 }
  0x5f   : > { %650 = vmatpush1.bf16.msra.mxu0 %v2487_v16  ;;  %699 = vmatpush1.bf16.msra.mxu1 %v2487_v16 }
  0x60   : > { %651 = vmatprep.subr.bf16.mxu0 %v2345_v10  ;;  %700 = vmatprep.subr.bf16.mxu1 %v2345_v10 }
  0x63   : > { %652 = vmatpush1.bf16.msra.mxu0 %v2496_v19  ;;  %701 = vmatpush1.bf16.msra.mxu1 %v2496_v19 }
  0x64   : > { %653 = vmatprep.subr.bf16.mxu0 %v2345_v10  ;;  %702 = vmatprep.subr.bf16.mxu1 %v2345_v10 }
  0x67   : > { %654 = vmatpush1.bf16.msra.mxu0 %v2507_v20  ;;  %703 = vmatpush1.bf16.msra.mxu1 %v2507_v20 }
  0x68   : > { %655 = vmatprep.subr.bf16.mxu0 %v2345_v10  ;;  %704 = vmatprep.subr.bf16.mxu1 %v2345_v10 }
  0x6b   : > { %656 = vmatpush1.bf16.msra.mxu0 %v2516_v21  ;;  %705 = vmatpush1.bf16.msra.mxu1 %v2516_v21 }
  0x6c   : > { %657 = vmatprep.subr.bf16.mxu0 %v2345_v10  ;;  %706 = vmatprep.subr.bf16.mxu1 %v2345_v10 }
  0x6f   : > { %658 = vmatpush1.bf16.msra.mxu0 %v2525_v22  ;;  %707 = vmatpush1.bf16.msra.mxu1 %v2525_v22 }
  0x70   : > { %659 = vmatprep.subr.bf16.mxu0 %v2345_v10  ;;  %708 = vmatprep.subr.bf16.mxu1 %v2345_v10 }
  0x73   : > { %660 = vmatpush1.bf16.msra.mxu0 %v2534_v23  ;;  %709 = vmatpush1.bf16.msra.mxu1 %v2534_v23 }
  0x74   : > { %661 = vmatprep.subr.bf16.mxu0 %v2345_v10  ;;  %710 = vmatprep.subr.bf16.mxu1 %v2345_v10 }
  0x77   : > { %662 = vmatpush1.bf16.msra.mxu0 %v2543_v24  ;;  %711 = vmatpush1.bf16.msra.mxu1 %v2543_v24 }
  0x78   : > { %663 = vmatprep.subr.bf16.mxu0 %v2345_v10  ;;  %712 = vmatprep.subr.bf16.mxu1 %v2345_v10 }
  0x7b   : > { %664 = vmatpush1.bf16.msra.mxu0 %v2552_v25  ;;  %713 = vmatpush1.bf16.msra.mxu1 %v2552_v25 }
  0x7c   : > { %739 = vmatprep.subr.bf16.mxu0 %v2345_v10  ;;  %788 = vmatprep.subr.bf16.mxu1 %v2345_v10 }
  0x7e   : > { %674 = vmatmul.mubr.bf16.vlgmr.msra.gmra.mrb[4].mxu0 %v1950_v32  ;;  %723 = vmatmul.mubr.bf16.vlgmr.msra.gmra.mrb[4].mxu1 %v1953_v33 }
  0x7f   : > { %740 = vmatpush1.bf16.msra.mxu0 %v2448_v9  ;;  %789 = vmatpush1.bf16.msra.mxu1 %v2448_v9 }
  0x80   : > { %741 = vmatprep.subr.bf16.mxu0 %v2345_v10  ;;  %790 = vmatprep.subr.bf16.mxu1 %v2345_v10 }
  0x81   : > { %1958 = vmatprep.mubr.msk.bf16.mxu0 %vm539_vm0, %v1957_v36  ;;  %1961 = vmatprep.mubr.msk.bf16.mxu1 %vm539_vm0, %v1960_v37 }
  0x83   : > { %742 = vmatpush1.bf16.msra.mxu0 %v2457_v11  ;;  %791 = vmatpush1.bf16.msra.mxu1 %v2457_v11 }
  0x84   : > { %743 = vmatprep.subr.bf16.mxu0 %v2345_v10  ;;  %792 = vmatprep.subr.bf16.mxu1 %v2345_v10 }
  0x87   : > { %744 = vmatpush1.bf16.msra.mxu0 %v2467_v12  ;;  %793 = vmatpush1.bf16.msra.mxu1 %v2467_v12 }
  0x88   : > { %745 = vmatprep.subr.bf16.mxu0 %v2345_v10  ;;  %794 = vmatprep.subr.bf16.mxu1 %v2345_v10 }
  0x8b   : > { %746 = vmatpush1.bf16.msra.mxu0 %v2476_v13  ;;  %795 = vmatpush1.bf16.msra.mxu1 %v2476_v13 }
  0x8c   : > { %747 = vmatprep.subr.bf16.mxu0 %v2345_v10  ;;  %796 = vmatprep.subr.bf16.mxu1 %v2345_v10 }
  0x8f   : > { %748 = vmatpush1.bf16.msra.mxu0 %v2487_v16  ;;  %797 = vmatpush1.bf16.msra.mxu1 %v2487_v16 }
  0x90   : > { %749 = vmatprep.subr.bf16.mxu0 %v2345_v10  ;;  %798 = vmatprep.subr.bf16.mxu1 %v2345_v10 }
  0x93   : > { %750 = vmatpush1.bf16.msra.mxu0 %v2496_v19  ;;  %799 = vmatpush1.bf16.msra.mxu1 %v2496_v19 }
  0x94   : > { %751 = vmatprep.subr.bf16.mxu0 %v2345_v10  ;;  %800 = vmatprep.subr.bf16.mxu1 %v2345_v10 }
  0x97   : > { %752 = vmatpush1.bf16.msra.mxu0 %v2507_v20  ;;  %801 = vmatpush1.bf16.msra.mxu1 %v2507_v20 }
  0x98   : > { %753 = vmatprep.subr.bf16.mxu0 %v2345_v10  ;;  %802 = vmatprep.subr.bf16.mxu1 %v2345_v10 }
  0x9b   : > { %754 = vmatpush1.bf16.msra.mxu0 %v2516_v21  ;;  %803 = vmatpush1.bf16.msra.mxu1 %v2516_v21 }
  0x9c   : > { %755 = vmatprep.subr.bf16.mxu0 %v2345_v10  ;;  %804 = vmatprep.subr.bf16.mxu1 %v2345_v10 }
  0x9f   : > { %756 = vmatpush1.bf16.msra.mxu0 %v2525_v22  ;;  %805 = vmatpush1.bf16.msra.mxu1 %v2525_v22 }
  0xa0   : > { %757 = vmatprep.subr.bf16.mxu0 %v2345_v10  ;;  %806 = vmatprep.subr.bf16.mxu1 %v2345_v10 }
  0xa3   : > { %758 = vmatpush1.bf16.msra.mxu0 %v2534_v23  ;;  %807 = vmatpush1.bf16.msra.mxu1 %v2534_v23 }
  0xa4   : > { %759 = vmatprep.subr.bf16.mxu0 %v2345_v10  ;;  %808 = vmatprep.subr.bf16.mxu1 %v2345_v10 }
  0xa7   : > { %760 = vmatpush1.bf16.msra.mxu0 %v2543_v24  ;;  %809 = vmatpush1.bf16.msra.mxu1 %v2543_v24 }
  0xa8   : > { %761 = vmatprep.subr.bf16.mxu0 %v2345_v10  ;;  %810 = vmatprep.subr.bf16.mxu1 %v2345_v10 }
  0xab   : > { %762 = vmatpush1.bf16.msra.mxu0 %v2552_v25  ;;  %811 = vmatpush1.bf16.msra.mxu1 %v2552_v25 }
  0xac   : > { %837 = vmatprep.subr.bf16.mxu0 %v2345_v10  ;;  %886 = vmatprep.subr.bf16.mxu1 %v2345_v10 }
  0xae   : > { %772 = vmatmul.mubr.bf16.vlgmr.msra.gmra.mrb[8].mxu0 %v1956_v38  ;;  %821 = vmatmul.mubr.bf16.vlgmr.msra.gmra.mrb[8].mxu1 %v1959_v39  ;;  %v2286_v38 = vld [vmem:[%s3050_s5 + $0x68] sm:$0xff]  }
  0xaf   : > { %838 = vmatpush1.bf16.msra.mxu0 %v2448_v9  ;;  %887 = vmatpush1.bf16.msra.mxu1 %v2448_v9 }
  0xb0   : > { %839 = vmatprep.subr.bf16.mxu0 %v2345_v10  ;;  %888 = vmatprep.subr.bf16.mxu1 %v2345_v10 }
  0xb1   : > { %1964 = vmatprep.mubr.msk.bf16.mxu0 %vm539_vm0, %v1963_v42  ;;  %1967 = vmatprep.mubr.msk.bf16.mxu1 %vm539_vm0, %v1966_v43  ;;  %v2288_v43 = vld [vmem:[%s3050_s5 + $0x78] sm:$0xff]  }
  0xb3   : > { %840 = vmatpush1.bf16.msra.mxu0 %v2457_v11  ;;  %889 = vmatpush1.bf16.msra.mxu1 %v2457_v11 }
  0xb4   : > { %841 = vmatprep.subr.bf16.mxu0 %v2345_v10  ;;  %890 = vmatprep.subr.bf16.mxu1 %v2345_v10 }
  0xb7   : > { %842 = vmatpush1.bf16.msra.mxu0 %v2467_v12  ;;  %891 = vmatpush1.bf16.msra.mxu1 %v2467_v12 }
  0xb8   : > { %843 = vmatprep.subr.bf16.mxu0 %v2345_v10  ;;  %892 = vmatprep.subr.bf16.mxu1 %v2345_v10 }
  0xbb   : > { %844 = vmatpush1.bf16.msra.mxu0 %v2476_v13  ;;  %893 = vmatpush1.bf16.msra.mxu1 %v2476_v13 }
  0xbc   : > { %845 = vmatprep.subr.bf16.mxu0 %v2345_v10  ;;  %894 = vmatprep.subr.bf16.mxu1 %v2345_v10 }
  0xbf   : > { %846 = vmatpush1.bf16.msra.mxu0 %v2487_v16  ;;  %895 = vmatpush1.bf16.msra.mxu1 %v2487_v16 }
  0xc0   : > { %847 = vmatprep.subr.bf16.mxu0 %v2345_v10  ;;  %896 = vmatprep.subr.bf16.mxu1 %v2345_v10 }
  0xc3   : > { %848 = vmatpush1.bf16.msra.mxu0 %v2496_v19  ;;  %897 = vmatpush1.bf16.msra.mxu1 %v2496_v19 }
  0xc4   : > { %849 = vmatprep.subr.bf16.mxu0 %v2345_v10  ;;  %898 = vmatprep.subr.bf16.mxu1 %v2345_v10 }
  0xc7   : > { %850 = vmatpush1.bf16.msra.mxu0 %v2507_v20  ;;  %899 = vmatpush1.bf16.msra.mxu1 %v2507_v20 }
  0xc8   : > { %851 = vmatprep.subr.bf16.mxu0 %v2345_v10  ;;  %900 = vmatprep.subr.bf16.mxu1 %v2345_v10 }
  0xcb   : > { %852 = vmatpush1.bf16.msra.mxu0 %v2516_v21  ;;  %901 = vmatpush1.bf16.msra.mxu1 %v2516_v21 }
  0xcc   : > { %853 = vmatprep.subr.bf16.mxu0 %v2345_v10  ;;  %902 = vmatprep.subr.bf16.mxu1 %v2345_v10 }
  0xcf   : > { %854 = vmatpush1.bf16.msra.mxu0 %v2525_v22  ;;  %903 = vmatpush1.bf16.msra.mxu1 %v2525_v22 }
  0xd0   : > { %855 = vmatprep.subr.bf16.mxu0 %v2345_v10  ;;  %904 = vmatprep.subr.bf16.mxu1 %v2345_v10 }
  0xd3   : > { %856 = vmatpush1.bf16.msra.mxu0 %v2534_v23  ;;  %905 = vmatpush1.bf16.msra.mxu1 %v2534_v23 }
  0xd4   : > { %857 = vmatprep.subr.bf16.mxu0 %v2345_v10  ;;  %906 = vmatprep.subr.bf16.mxu1 %v2345_v10 }
  0xd7   : > { %858 = vmatpush1.bf16.msra.mxu0 %v2543_v24  ;;  %907 = vmatpush1.bf16.msra.mxu1 %v2543_v24 }
  0xd8   : > { %859 = vmatprep.subr.bf16.mxu0 %v2345_v10  ;;  %908 = vmatprep.subr.bf16.mxu1 %v2345_v10 }
  0xdb   : > { %860 = vmatpush1.bf16.msra.mxu0 %v2552_v25  ;;  %909 = vmatpush1.bf16.msra.mxu1 %v2552_v25 }
  0xdc   : > { %935 = vmatprep.subr.bf16.mxu0 %v2345_v10  ;;  %2086 = vmatprep.subr.bf16.mxu1 %v2346_v48 }
  0xde   : > { %870 = vmatmul.mubr.bf16.vlgmr.msra.gmra.mrb[12].mxu0 %v1962_v45  ;;  %919 = vmatmul.mubr.bf16.vlgmr.msra.gmra.mrb[12].mxu1 %v1965_v46  ;;  %v2289_v45 = vld [vmem:[%s3050_s5 + $0x80] sm:$0xff]   ;;  %v2291_v46 = vld [vmem:[%s3050_s5 + $0x88] sm:$0xff]  }
  0xdf   : > { %936 = vmatpush1.bf16.msra.mxu0 %v2448_v9  ;;  %1970 = vmatprep.mubr.msk.bf16.mxu0 %vm539_vm0, %v1969_v47  ;;  %v2277_v9 = vld [vmem:[%s3050_s5 + $0x20] sm:$0xff]   ;;  %v2293_v47 = vld [vmem:[%s3050_s5 + $0x90] sm:$0xff]  }
  0xe0   : > { %937 = vmatprep.subr.bf16.mxu0 %v2345_v10  ;;  %2087 = vmatpush3.bf16.msra.mxu1 %v2273_v49  ;;  %v2295_v49 = vld [vmem:[%s3050_s5 + $0x98] sm:$0xff]  }
  0xe1   : > { %2088 = vmatprep.subr.bf16.mxu1 %v2346_v48  ;;  %2094 = vmatprep.mubr.msk.bf16.mxu1 %vm2347_vm1, %v2346_v48 }
  0xe3   : > { %938 = vmatpush1.bf16.msra.mxu0 %v2457_v11 }
  0xe4   : > { %939 = vmatprep.subr.bf16.mxu0 %v2345_v10  ;;  %2089 = vmatpush3.bf16.msra.mxu1 %v2274_v50 }
  0xe5   : > { %2090 = vmatprep.subr.bf16.mxu1 %v2346_v48 }
  0xe7   : > { %940 = vmatpush1.bf16.msra.mxu0 %v2467_v12  ;;  %v2278_v12 = vld [vmem:[%s3050_s5 + $0x28] sm:$0xff]  }
  0xe8   : > { %941 = vmatprep.subr.bf16.mxu0 %v2345_v10  ;;  %2091 = vmatpush3.bf16.msra.mxu1 %v2275_v51 }
  0xe9   : > { %2092 = vmatprep.subr.bf16.mxu1 %v2346_v48 }
  0xeb   : > { %942 = vmatpush1.bf16.msra.mxu0 %v2476_v13 }
  0xec   : > { %943 = vmatprep.subr.bf16.mxu0 %v2345_v10  ;;  %2093 = vmatpush3.bf16.msra.mxu1 %v2276_v52 }
  0xed   : > { %2098 = vmatprep.subr.bf16.mxu1 %v2346_v48 }
  0xef   : > { %944 = vmatpush1.bf16.msra.mxu0 %v2487_v16 }
  0xf0   : > { %945 = vmatprep.subr.bf16.mxu0 %v2345_v10 }
  0xf3   : > { %946 = vmatpush1.bf16.msra.mxu0 %v2496_v19  ;;  %v2281_v19 = vld [vmem:[%s3050_s5 + $0x40] sm:$0xff]  }
  0xf4   : > { %947 = vmatprep.subr.bf16.mxu0 %v2345_v10 }
  0xf7   : > { %948 = vmatpush1.bf16.msra.mxu0 %v2507_v20  ;;  %v2282_v20 = vld [vmem:[%s3050_s5 + $0x48] sm:$0xff]  }
  0xf8   : > { %949 = vmatprep.subr.bf16.mxu0 %v2345_v10 }
  0xfb   : > { %950 = vmatpush1.bf16.msra.mxu0 %v2516_v21  ;;  %v2283_v21 = vld [vmem:[%s3050_s5 + $0x50] sm:$0xff]  }
  0xfc   : > { %951 = vmatprep.subr.bf16.mxu0 %v2345_v10 }
  0xff   : > { %952 = vmatpush1.bf16.msra.mxu0 %v2525_v22  ;;  %v2284_v22 = vld [vmem:[%s3050_s5 + $0x58] sm:$0xff]  }
 0x100   : > { %953 = vmatprep.subr.bf16.mxu0 %v2345_v10 }
 0x103   : > { %954 = vmatpush1.bf16.msra.mxu0 %v2534_v23 }
 0x104   : > { %955 = vmatprep.subr.bf16.mxu0 %v2345_v10 }
 0x107   : > { %956 = vmatpush1.bf16.msra.mxu0 %v2543_v24 }
 0x108   : > { %957 = vmatprep.subr.bf16.mxu0 %v2345_v10 }
 0x10b   : > { %958 = vmatpush1.bf16.msra.mxu0 %v2552_v25 }
 0x10c   : > { %2146 = vmatprep.subr.bf16.mxu0 %v2346_v48 }
 0x10e   : > { %968 = vmatmul.mubr.bf16.vlgmr.msra.gmra.mrb[16].mxu0 %v1968_v53 }
 0x10f   : > { %2147 = vmatpush3.bf16.msra.mxu0 %v2290_v54  ;;  %2154 = vmatprep.mubr.msk.bf16.mxu0 %vm2347_vm1, %v2346_v48 }
 0x110   : > { %2148 = vmatprep.subr.bf16.mxu0 %v2346_v48 }
 0x113   : > { %2149 = vmatpush3.bf16.msra.mxu0 %v2292_v55 }
 0x114   : > { %2150 = vmatprep.subr.bf16.mxu0 %v2346_v48 }
 0x117   : > { %2151 = vmatpush3.bf16.msra.mxu0 %v2294_v56 }
 0x118   : > { %2152 = vmatprep.subr.bf16.mxu0 %v2346_v48 }
 0x11b   : > { %2153 = vmatpush3.bf16.msra.mxu0 %v2296_v57 }
 0x11c   : > { %2170 = vmatprep.subr.bf16.mxu0 %v2346_v48 }
 0x121   : > { %v577_v59 = vpop.f32.mrb[0].mxu0  ;;  %v626_v61 = vpop.f32.mrb[0].mxu1 }
 0x122   : > { %v982_v62 = vmul.f32 %v2819_v58, %v577_v59  ;;  %v579_v63 = vpop.f32.mrb[1].mxu0  ;;  %v628_v0 = vpop.f32.mrb[1].mxu1  ;;  %v983_v10 = vmul.f32 %v2819_v58, %v626_v61 }
 0x123   : > { %v580_v2 = vpop.f32.mrb[2].mxu0  ;;  %v629_v3 = vpop.f32.mrb[2].mxu1 }
 0x124   : > { %v998_v4 = vadd.f32 %v2824_v60, %v982_v62  ;;  %v581_v5 = vpop.f32.mrb[3].mxu0  ;;  %v630_v6 = vpop.f32.mrb[3].mxu1  ;;  %v999_v13 = vadd.f32 %v2824_v60, %v983_v10  ;;  %v2300_v10 = vld [vmem:[%s3050_s5 + $0xe8] sm:$0xff]  }
 0x125   : > { %v2297_v5 = vld [vmem:[%s3050_s5 + $0xc0] sm:$0xff]  }
 0x126   : > { %vm1008_vm2 = vcmp.gt.f32.partialorder %v998_v4, 0.0  ;;  %v1018_v7 = vmul.f32 %v2827_v1, %v998_v4  ;;  %v1019_v14 = vmul.f32 %v2827_v1, %v999_v13  ;;  %vm1009_vm3 = vcmp.gt.f32.partialorder %v999_v13, 0.0  ;;  %v2298_v6 = vld [vmem:[%s3050_s5 + $0xe0] sm:$0xff]  }
 0x128   : > { %v1027_v8 = vsel %vm1008_vm2, %v998_v4, %v1018_v7  ;;  %v1028_v16 = vsel %vm1009_vm3, %v999_v13, %v1019_v14  ;;  %v2303_v13 = vld [vmem:[%s3050_s5 + $0xd8] sm:$0xff]  }
 0x129   : > { %v1036_v11 = vpack.c.bf16 %v1027_v8, %v1027_v8  ;;  %v1037_v18 = vpack.c.bf16 %v1028_v16, %v1028_v16  ;;  %v2304_v14 = vld [vmem:[%s3050_s5 + $0xf8] sm:$0xff]  }
 0x12b   : > { %2095 = vmatmul.mubr.msk.bf16.vlgmr.msra.gmra.mrb[16].mxu1 %vm539_vm0, %v1036_v11  ;;  %v2301_v11 = vld [vmem:[%s3050_s5 + $0xd0] sm:$0xff]  }
 0x12c   : > { %2099 = vmatpush3.bf16.msra.mxu1 %v2277_v9  ;;  %2106 = vmatprep.mubr.msk.bf16.mxu1 %vm2347_vm1, %v2346_v48  ;;  %v2299_v9 = vld [vmem:[%s3050_s5 + $0xc8] sm:$0xff]  }
 0x12d   : > { %2100 = vmatprep.subr.bf16.mxu1 %v2346_v48 }
 0x130   : > { %2101 = vmatpush3.bf16.msra.mxu1 %v2278_v12  ;;  %v2302_v12 = vld [vmem:[%s3050_s5 + $0xf0] sm:$0xff]  }
 0x131   : > { %2102 = vmatprep.subr.bf16.mxu1 %v2346_v48 }
 0x134   : > { %2103 = vmatpush3.bf16.msra.mxu1 %v2279_v15 }
 0x135   : > { %2104 = vmatprep.subr.bf16.mxu1 %v2346_v48 }
 0x138   : > { %2105 = vmatpush3.bf16.msra.mxu1 %v2280_v17 }
 0x139   : > { %2110 = vmatprep.subr.bf16.mxu1 %v2346_v48 }
 0x13b   : > { %2107 = vmatmul.mubr.msk.bf16.vlgmr.msra.gmra.mrb[20].mxu1 %vm539_vm0, %v1037_v18 }
 0x13c   : > { %2111 = vmatpush3.bf16.msra.mxu1 %v2281_v19  ;;  %2118 = vmatprep.mubr.msk.bf16.mxu1 %vm2347_vm1, %v2346_v48 }
 0x13d   : > { %2112 = vmatprep.subr.bf16.mxu1 %v2346_v48 }
 0x140   : > { %2113 = vmatpush3.bf16.msra.mxu1 %v2282_v20 }
 0x141   : > { %2114 = vmatprep.subr.bf16.mxu1 %v2346_v48 }
 0x144   : > { %2115 = vmatpush3.bf16.msra.mxu1 %v2283_v21 }
 0x145   : > { %2116 = vmatprep.subr.bf16.mxu1 %v2346_v48 }
 0x148   : > { %2117 = vmatpush3.bf16.msra.mxu1 %v2284_v22 }
 0x149   : > { %2122 = vmatprep.subr.bf16.mxu1 %v2346_v48 }
 0x151   : > { %v675_v23 = vpop.f32.mrb[4].mxu0  ;;  %v724_v24 = vpop.f32.mrb[4].mxu1 }
 0x152   : > { %v984_v25 = vmul.f32 %v2819_v58, %v675_v23  ;;  %v677_v26 = vpop.f32.mrb[5].mxu0  ;;  %v726_v27 = vpop.f32.mrb[5].mxu1  ;;  %v985_v36 = vmul.f32 %v2819_v58, %v724_v24 }
 0x153   : > { %v678_v28 = vpop.f32.mrb[6].mxu0  ;;  %v727_v29 = vpop.f32.mrb[6].mxu1 }
 0x154   : > { %v1000_v30 = vadd.f32 %v2824_v60, %v984_v25  ;;  %v679_v31 = vpop.f32.mrb[7].mxu0  ;;  %v728_v32 = vpop.f32.mrb[7].mxu1  ;;  %v1001_v39 = vadd.f32 %v2824_v60, %v985_v36  ;;  %v2308_v36 = vld [vmem:[%s3050_s5 + $0x118] sm:$0xff]  }
 0x155   : > { %v2305_v31 = vld [vmem:[%s3050_s5 + $0x100] sm:$0xff]  }
 0x156   : > { %vm1010_vm4 = vcmp.gt.f32.partialorder %v1000_v30, 0.0  ;;  %v1020_v33 = vmul.f32 %v2827_v1, %v1000_v30  ;;  %v1021_v40 = vmul.f32 %v2827_v1, %v1001_v39  ;;  %vm1011_vm5 = vcmp.gt.f32.partialorder %v1001_v39, 0.0 }
 0x158   : > { %v1029_v34 = vsel %vm1010_vm4, %v1000_v30, %v1020_v33  ;;  %v1030_v42 = vsel %vm1011_vm5, %v1001_v39, %v1021_v40 }
 0x159   : > { %v1038_v37 = vpack.c.bf16 %v1029_v34, %v1029_v34  ;;  %v1039_v44 = vpack.c.bf16 %v1030_v42, %v1030_v42  ;;  %v2306_v34 = vld [vmem:[%s3050_s5 + $0x108] sm:$0xff]  }
 0x15b   : > { %2119 = vmatmul.mubr.msk.bf16.vlgmr.msra.gmra.mrb[24].mxu1 %vm539_vm0, %v1038_v37 }
 0x15c   : > { %2123 = vmatpush3.bf16.msra.mxu1 %v2285_v35  ;;  %2130 = vmatprep.mubr.msk.bf16.mxu1 %vm2347_vm1, %v2346_v48  ;;  %v2307_v35 = vld [vmem:[%s3050_s5 + $0x110] sm:$0xff]  }
 0x15d   : > { %2124 = vmatprep.subr.bf16.mxu1 %v2346_v48 }
 0x160   : > { %2125 = vmatpush3.bf16.msra.mxu1 %v2286_v38 }
 0x161   : > { %2126 = vmatprep.subr.bf16.mxu1 %v2346_v48 }
 0x164   : > { %2127 = vmatpush3.bf16.msra.mxu1 %v2287_v41 }
 0x165   : > { %2128 = vmatprep.subr.bf16.mxu1 %v2346_v48 }
 0x168   : > { %2129 = vmatpush3.bf16.msra.mxu1 %v2288_v43 }
 0x169   : > { %2134 = vmatprep.subr.bf16.mxu1 %v2346_v48 }
 0x16b   : > { %2131 = vmatmul.mubr.msk.bf16.vlgmr.msra.gmra.mrb[28].mxu1 %vm539_vm0, %v1039_v44 }
 0x16c   : > { %2135 = vmatpush3.bf16.msra.mxu1 %v2289_v45  ;;  %2142 = vmatprep.mubr.msk.bf16.mxu1 %vm2347_vm1, %v2346_v48 }
 0x16d   : > { %2136 = vmatprep.subr.bf16.mxu1 %v2346_v48 }
 0x170   : > { %2137 = vmatpush3.bf16.msra.mxu1 %v2291_v46 }
 0x171   : > { %2138 = vmatprep.subr.bf16.mxu1 %v2346_v48 }
 0x174   : > { %2139 = vmatpush3.bf16.msra.mxu1 %v2293_v47 }
 0x175   : > { %2140 = vmatprep.subr.bf16.mxu1 %v2346_v48 }
 0x178   : > { %2141 = vmatpush3.bf16.msra.mxu1 %v2295_v49 }
 0x179   : > { %2158 = vmatprep.subr.bf16.mxu1 %v2346_v48 }
 0x181   : > { %v773_v50 = vpop.f32.mrb[8].mxu0  ;;  %v822_v51 = vpop.f32.mrb[8].mxu1 }
 0x182   : > { %v986_v52 = vmul.f32 %v2819_v58, %v773_v50  ;;  %v775_v53 = vpop.f32.mrb[9].mxu0  ;;  %v987_v54 = vmul.f32 %v2819_v58, %v822_v51  ;;  %v824_v55 = vpop.f32.mrb[9].mxu1 }
 0x183   : > { %v776_v56 = vpop.f32.mrb[10].mxu0  ;;  %v825_v57 = vpop.f32.mrb[10].mxu1  ;;  %v2311_v55 = vld [vmem:[%s3053_s8 + $0x10] sm:$0xff]  }
 0x184   : > { %v1002_v59 = vadd.f32 %v2824_v60, %v986_v52  ;;  %v1003_v61 = vadd.f32 %v2824_v60, %v987_v54  ;;  %v777_v62 = vpop.f32.mrb[11].mxu0  ;;  %v826_v63 = vpop.f32.mrb[11].mxu1  ;;  %v2312_v56 = vld [vmem:[%s3053_s8 + $0x18] sm:$0xff]   ;;  %v2313_v57 = vld [vmem:[%s3053_s8 + $0x20] sm:$0xff]  }
 0x186   : > { %vm1012_vm6 = vcmp.gt.f32.partialorder %v1002_v59, 0.0  ;;  %v1022_v0 = vmul.f32 %v2827_v1, %v1002_v59  ;;  %vm1013_vm7 = vcmp.gt.f32.partialorder %v1003_v61, 0.0  ;;  %v1023_v2 = vmul.f32 %v2827_v1, %v1003_v61 }
 0x188   : > { %v1031_v3 = vsel %vm1012_vm6, %v1002_v59, %v1022_v0  ;;  %v1032_v4 = vsel %vm1013_vm7, %v1003_v61, %v1023_v2  ;;  %v2314_v59 = vld [vmem:[%s3053_s8 + $0x28] sm:$0xff]  }
 0x189   : > { %v1040_v7 = vpack.c.bf16 %v1031_v3, %v1031_v3  ;;  %v1041_v8 = vpack.c.bf16 %v1032_v4, %v1032_v4 }
 0x18b   : > { %2143 = vmatmul.mubr.msk.bf16.vlgmr.msra.gmra.mrb[32].mxu1 %vm539_vm0, %v1040_v7  ;;  %2155 = vmatmul.mubr.msk.bf16.vlgmr.msra.gmra.mrb[20].mxu0 %vm539_vm0, %v1041_v8  ;;  %v2315_v7 = vld [vmem:[%s3053_s8 + $0x30] sm:$0xff]  }
 0x18c   : > { %2159 = vmatpush3.bf16.msra.mxu1 %v2297_v5  ;;  %2171 = vmatpush3.bf16.msra.mxu0 %v2298_v6 }
 0x18d   : > { %2160 = vmatprep.subr.bf16.mxu1 %v2346_v48  ;;  %2172 = vmatprep.subr.bf16.mxu0 %v2346_v48 }
 0x18e   : > { %2166 = vmatprep.mubr.msk.bf16.mxu1 %vm2347_vm1, %v2346_v48  ;;  %2178 = vmatprep.mubr.msk.bf16.mxu0 %vm2347_vm1, %v2346_v48 }
 0x190   : > { %2161 = vmatpush3.bf16.msra.mxu1 %v2299_v9  ;;  %2173 = vmatpush3.bf16.msra.mxu0 %v2300_v10  ;;  %v2316_v9 = vld [vmem:[%s3053_s8 + $0x38] sm:$0xff]  }
 0x191   : > { %2162 = vmatprep.subr.bf16.mxu1 %v2346_v48  ;;  %2174 = vmatprep.subr.bf16.mxu0 %v2346_v48 }
 0x194   : > { %2163 = vmatpush3.bf16.msra.mxu1 %v2301_v11  ;;  %2175 = vmatpush3.bf16.msra.mxu0 %v2302_v12 }
 0x195   : > { %2164 = vmatprep.subr.bf16.mxu1 %v2346_v48  ;;  %2176 = vmatprep.subr.bf16.mxu0 %v2346_v48 }
 0x198   : > { %2165 = vmatpush3.bf16.msra.mxu1 %v2303_v13  ;;  %2177 = vmatpush3.bf16.msra.mxu0 %v2304_v14 }
 0x199   : > { %2182 = vmatprep.subr.bf16.mxu1 %v2346_v48  ;;  %2194 = vmatprep.subr.bf16.mxu0 %v2346_v48 }
 0x1b1   : > { %v871_v15 = vpop.f32.mrb[12].mxu0  ;;  %v920_v16 = vpop.f32.mrb[12].mxu1 }
 0x1b2   : > { %v988_v17 = vmul.f32 %v2819_v58, %v871_v15  ;;  %v873_v18 = vpop.f32.mrb[13].mxu0  ;;  %v989_v19 = vmul.f32 %v2819_v58, %v920_v16  ;;  %v922_v20 = vpop.f32.mrb[13].mxu1 }
 0x1b3   : > { %v874_v21 = vpop.f32.mrb[14].mxu0  ;;  %v923_v22 = vpop.f32.mrb[14].mxu1 }
 0x1b4   : > { %v1004_v23 = vadd.f32 %v2824_v60, %v988_v17  ;;  %v1005_v24 = vadd.f32 %v2824_v60, %v989_v19  ;;  %v875_v25 = vpop.f32.mrb[15].mxu0  ;;  %v924_v26 = vpop.f32.mrb[15].mxu1 }
 0x1b6   : > { %vm1014_vm8 = vcmp.gt.f32.partialorder %v1004_v23, 0.0  ;;  %v1024_v27 = vmul.f32 %v2827_v1, %v1004_v23  ;;  %vm1015_vm9 = vcmp.gt.f32.partialorder %v1005_v24, 0.0  ;;  %v1025_v28 = vmul.f32 %v2827_v1, %v1005_v24 }
 0x1b8   : > { %v1033_v29 = vsel %vm1014_vm8, %v1004_v23, %v1024_v27  ;;  %v1034_v30 = vsel %vm1015_vm9, %v1005_v24, %v1025_v28 }
 0x1b9   : > { %v1042_v32 = vpack.c.bf16 %v1033_v29, %v1033_v29  ;;  %v1043_v33 = vpack.c.bf16 %v1034_v30, %v1034_v30  ;;  %v2018_v30 = vld [vmem:[%s3051_s6] ss:$0 sm:$0xff] }
 0x1bb   : > { %2167 = vmatmul.mubr.msk.bf16.vlgmr.msra.gmra.mrb[36].mxu1 %vm539_vm0, %v1042_v32  ;;  %2179 = vmatmul.mubr.msk.bf16.vlgmr.msra.gmra.mrb[24].mxu0 %vm539_vm0, %v1043_v33  ;;  %v1738_v33 = vstv %s1736_s11 }
 0x1bc   : > { %2183 = vmatpush3.bf16.msra.mxu1 %v2305_v31  ;;  %2190 = vmatprep.mubr.msk.bf16.mxu1 %vm2347_vm1, %v2346_v48 }
 0x1bd   : > { %2184 = vmatprep.subr.bf16.mxu1 %v2346_v48  ;;  %2210 = vmatprep.mubr.msk.bf16.mxu0 %vm2347_vm1, %v2346_v48 }
 0x1c0   : > { %2185 = vmatpush3.bf16.msra.mxu1 %v2306_v34 }
 0x1c1   : > { %2186 = vmatprep.subr.bf16.mxu1 %v2346_v48 }
 0x1c4   : > { %2187 = vmatpush3.bf16.msra.mxu1 %v2307_v35 }
 0x1c5   : > { %2188 = vmatprep.subr.bf16.mxu1 %v2346_v48 }
 0x1c8   : > { %2189 = vmatpush3.bf16.msra.mxu1 %v2308_v36 }
 0x1e1   : > { %v969_v37 = vpop.f32.mrb[16].mxu0 }
 0x1e2   : > { %v990_v38 = vmul.f32 %v2819_v58, %v969_v37  ;;  %v971_v39 = vpop.f32.mrb[17].mxu0 }
 0x1e3   : > { %v972_v40 = vpop.f32.mrb[18].mxu0 }
 0x1e4   : > { %v1006_v41 = vadd.f32 %v2824_v60, %v990_v38  ;;  %v973_v42 = vpop.f32.mrb[19].mxu0  ;;  %v2309_v60 = vld [vmem:[%s3053_s8] sm:$0xff]  }
 0x1e5   : > { %2195 = vmatpush3.bf16.msra.mxu0 %v2309_v60  ;;  %v2019_v40 = vld [vmem:[%s3054_s9] ss:$0 sm:$0xff] }
 0x1e6   : > { %vm1016_vm10 = vcmp.gt.f32.partialorder %v1006_v41, 0.0  ;;  %v1026_v43 = vmul.f32 %v2827_v1, %v1006_v41  ;;  %v2310_v1 = vld [vmem:[%s3053_s8 + $0x8] sm:$0xff]   ;;  %2196 = vmatprep.subr.bf16.mxu0 %v2346_v48 }
 0x1e8   : > { %v1035_v44 = vsel %vm1016_vm10, %v1006_v41, %v1026_v43 }
 0x1e9   : > { %v1044_v45 = vpack.c.bf16 %v1035_v44, %v1035_v44  ;;  %2197 = vmatpush3.bf16.msra.mxu0 %v2310_v1 }
 0x1ea   : > { %2198 = vmatprep.subr.bf16.mxu0 %v2346_v48 }
 0x1eb   : > { %2191 = vmatmul.mubr.msk.bf16.vlgmr.msra.gmra.mrb[40].mxu1 %vm539_vm0, %v1044_v45 }
 0x1ed   : > { %2199 = vmatpush3.bf16.msra.mxu0 %v2311_v55 }
 0x1ee   : > { %2200 = vmatprep.subr.bf16.mxu0 %v2346_v48 }
 0x1f1   : > { %2201 = vmatpush3.bf16.msra.mxu0 %v2312_v56 }
 0x1f2   : > { %2202 = vmatprep.subr.bf16.mxu0 %v2346_v48 }
 0x1f5   : > { %2203 = vmatpush3.bf16.msra.mxu0 %v2313_v57 }
 0x1f6   : > { %2204 = vmatprep.subr.bf16.mxu0 %v2346_v48 }
 0x1f9   : > { %2205 = vmatpush3.bf16.msra.mxu0 %v2314_v59 }
 0x1fa   : > { %2206 = vmatprep.subr.bf16.mxu0 %v2346_v48 }
 0x1fd   : > { %2207 = vmatpush3.bf16.msra.mxu0 %v2315_v7 }
 0x1fe   : > { %v1178_v46 = vpop.f32.mrb[16].mxu1  ;;  %2208 = vmatprep.subr.bf16.mxu0 %v2346_v48 }
 0x1ff   : > { %v2096_v47 = vpop.f32.mrb[17].mxu1 }
 0x200   : > { %v1181_v49 = vpop.f32.mrb[18].mxu1 }
 0x201   : > { %v2097_v50 = vpop.f32.mrb[19].mxu1  ;;  %2209 = vmatpush3.bf16.msra.mxu0 %v2316_v9 }
 0x202   : > { %v1853_v50 = vlaneseq }
 0x20e   : > { %v1245_v51 = vpop.f32.mrb[20].mxu1 }
 0x20f   : > { %v1720_v52 = vadd.f32 %v1245_v51, %v1178_v46  ;;  %v2108_v53 = vpop.f32.mrb[21].mxu1  ;;  %v1854_v51 = vand.u32 127, %v1853_v50 }
 0x210   : > { %v1248_v58 = vpop.f32.mrb[22].mxu1 }
 0x211   : > { %v2109_v54 = vpop.f32.mrb[23].mxu1  ;;  %vm1855_vm12 = vcmp.eq.s32.totalorder %v1854_v51, 0 }
 0x22e   : > { %v1312_v61 = vpop.f32.mrb[24].mxu1 }
 0x22f   : > { %v1721_v62 = vadd.f32 %v1720_v52, %v1312_v61  ;;  %v2120_v63 = vpop.f32.mrb[25].mxu1 }
 0x230   : > { %v1315_v0 = vpop.f32.mrb[26].mxu1 }
 0x231   : > { %v2121_v2 = vpop.f32.mrb[27].mxu1 }
 0x23e   : > { %v1379_v3 = vpop.f32.mrb[28].mxu1 }
 0x23f   : > { %v1722_v4 = vadd.f32 %v1721_v62, %v1379_v3  ;;  %v2132_v5 = vpop.f32.mrb[29].mxu1 }
 0x240   : > { %v1382_v6 = vpop.f32.mrb[30].mxu1 }
 0x241   : > { %v2133_v8 = vpop.f32.mrb[31].mxu1 }
 0x25e   : > { %v1446_v10 = vpop.f32.mrb[32].mxu1  ;;  %v1513_v11 = vpop.f32.mrb[20].mxu0 }
 0x25f   : > { %v1723_v12 = vadd.f32 %v1722_v4, %v1446_v10  ;;  %v2144_v13 = vpop.f32.mrb[33].mxu1  ;;  %v2156_v14 = vpop.f32.mrb[21].mxu0 }
 0x260   : > { %v1449_v15 = vpop.f32.mrb[34].mxu1  ;;  %v1516_v16 = vpop.f32.mrb[22].mxu0 }
 0x261   : > { %v1724_v17 = vadd.f32 %v1723_v12, %v1513_v11  ;;  %v2145_v18 = vpop.f32.mrb[35].mxu1  ;;  %v2157_v19 = vpop.f32.mrb[23].mxu0 }
 0x28e   : > { %v1580_v20 = vpop.f32.mrb[36].mxu1  ;;  %v1647_v21 = vpop.f32.mrb[24].mxu0 }
 0x28f   : > { %v1725_v22 = vadd.f32 %v1724_v17, %v1580_v20  ;;  %v2168_v23 = vpop.f32.mrb[37].mxu1  ;;  %v2180_v48 = vpop.f32.mrb[25].mxu0 }
 0x290   : > { %v1583_v24 = vpop.f32.mrb[38].mxu1  ;;  %v1650_v25 = vpop.f32.mrb[26].mxu0 }
 0x291   : > { %v1726_v26 = vadd.f32 %v1725_v22, %v1647_v21  ;;  %v2169_v27 = vpop.f32.mrb[39].mxu1  ;;  %v2181_v28 = vpop.f32.mrb[27].mxu0 }
 0x2be   : > { %v1714_v29 = vpop.f32.mrb[40].mxu1 }
 0x2bf   : > { %v1727_v31 = vadd.f32 %v1726_v26, %v1714_v29  ;;  %v2192_v32 = vpop.f32.mrb[41].mxu1 }
 0x2c0   : > { %v1717_v34 = vpop.f32.mrb[42].mxu1 }
 0x2c1   : > { %v1735_v35 = vadd.f32 %v2018_v30, %v1727_v31  ;;  %v2193_v36 = vpop.f32.mrb[43].mxu1 }
 0x2c3   : > { %vm1737_vm11 = vcmp.gt.f32.partialorder %v1735_v35, 0.0  ;;  %v1739_v37 = vmul.f32 %v1738_v33, %v1735_v35 }
 0x2c5   : > { %v1740_v38 = vsel %vm1737_vm11, %v1735_v35, %v1739_v37 }
 0x2c6   : > { %v1741_v39 = vpack.c.bf16 %v1740_v38, %v1740_v38 }
 0x2c8   : > { %2211 = vmatmul.mubr.bf16.vlgmr.msra.gmra.mrb[28].mxu0 %v1741_v39 }
 0x39b   : > { %v1847_v41 = vpop.f32.mrb[28].mxu0 }
 0x39c   : > { %v1848_v42 = vadd.f32 %v2019_v40, %v1847_v41  ;;  %v2212_v43 = vpop.f32.mrb[29].mxu0 }
 0x39d   : > { %v1850_v44 = vpop.f32.mrb[30].mxu0 }
 0x39e   : > { %v2028_v45 = vmul.f32 -1.442695, %v1848_v42  ;;  %v2213_v46 = vpop.f32.mrb[31].mxu0 }
 0x3a0   : > { %2317 = vpow2.f32 %v2028_v45 }
 0x3aa   : > { %v2318_v47 = vpop.eup %2317 }
 0x3ab   : > { %v1859_v49 = vadd.f32 1.0, %v2318_v47 }
 0x3ad   : > { %2319 = vrcp.f32 %v1859_v49 }
 0x3b7   : > { %v2320_v52 = vpop.eup %2319 }
 0x3b8   : > { %v1862_v53 = vsel %vm1855_vm12, %v2320_v52, %v1848_v42 }
 0x3b9   : > { %1864 = vst.msk [vmem:[%s426_s21] sm:$0xff] %vm1863_vm13, %v1862_v53 }
 0x3ba PF: > { %p19_p9 = scmp.ge.s32.totalorder %s2426_s7, 4   ;;  %s3056_s17 = smov %s2339_s18 }
 0x3bb   : > { %s3057_s18 = smov %s2435_s22  ;;  %s3058_s19 = smov %s2426_s7 }
 0x3bc   :  { %21 = sbr.rel (!%p19_p9) target bundleno = 5 (0x5), region = 133 }

</bundles_post_ra>
